<compile_context>
chip_gen: v7x
topology: tpu7x:2x2x1
jax: 0.10.0
libtpu: 0.0.40
codegen_flags: <defaults>
</compile_context>

<pallas_src>
import functools

import jax
import jax.numpy as jnp
from jax import lax
from jax.experimental import pallas as pl
from jax.experimental.pallas import tpu as pltpu

EPS = 1e-6
INV_SQRT2 = 0.7071067811865476


def ln_linear_gelu_kernel(x_ref, g_ref, b_ref, w_ref, bias_ref, o_ref):
    # x_ref:    (T, C)   full token slab (same block every grid step -> DMA'd once)
    # g_ref:    (1, C)   layernorm gamma
    # b_ref:    (1, C)   layernorm beta
    # w_ref:    (tn, C)  contiguous row block of the PyTorch (out, in) weight, bf16
    # bias_ref: (1, tn)  bias slice
    # o_ref:    (T, tn)  output slice
    x = x_ref[...].astype(jnp.float32)

    # LayerNorm over the channel dim, eps=1e-6, elementwise affine.
    mean = jnp.mean(x, axis=-1, keepdims=True)
    centered = x - mean
    var = jnp.mean(centered * centered, axis=-1, keepdims=True)
    xn = centered * lax.rsqrt(var + EPS)
    xn = xn * g_ref[...].astype(jnp.float32) + b_ref[...].astype(jnp.float32)

    # Linear: contract on C with the weight kept in (out, in) layout (trans_b matmul).
    # bf16 operands, f32 accumulation on the MXU.
    y = lax.dot_general(
        xn.astype(jnp.bfloat16),
        w_ref[...].astype(jnp.bfloat16),
        dimension_numbers=(((1,), (1,)), ((), ())),
        preferred_element_type=jnp.float32,
    ) + bias_ref[...].astype(jnp.float32)

    # Exact GELU (approximate='none'): 0.5 * y * (1 + erf(y / sqrt(2)))
    o_ref[...] = (0.5 * y * (1.0 + lax.erf(y * INV_SQRT2))).astype(o_ref.dtype)


@functools.partial(jax.jit, static_argnames=("tn",))
def layernorm_linear_gelu(x_nhwc, gamma, beta, weight, bias, *, tn=512):
    """x_nhwc: [N,H,W,C]; weight: [out, in] (PyTorch layout, ideally bf16); bias: [out]."""
    N, H, W, C = x_nhwc.shape
    F = weight.shape[0]
    T = N * H * W

    # Dominant HBM term is the weight: insist on bf16 at the boundary.  The cast here
    # is a trace-time fallback only; callers should ship bf16 (as the demo does).
    if weight.dtype != jnp.bfloat16:
        weight = weight.astype(jnp.bfloat16)

    # No pad, no post-kernel slice: (T, C) in, (T, F) out, reshapes are metadata-only.
    x2d = x_nhwc.reshape(T, C)
    g2d = gamma.reshape(1, C)
    b2d = beta.reshape(1, C)
    bias2d = bias.reshape(1, F)

    grid = (F // tn,)

    cost = pl.CostEstimate(
        flops=2 * T * C * F,
        transcendentals=T * F,
        bytes_accessed=(x2d.size * 4 + weight.size * 2 + (gamma.size + beta.size + bias.size) * 4
                        + T * F * 4),
    )

    out2d = pl.pallas_call(
        ln_linear_gelu_kernel,
        out_shape=jax.ShapeDtypeStruct((T, F), x_nhwc.dtype),
        grid_spec=pl.GridSpec(
            grid=grid,
            in_specs=[
                pl.BlockSpec((T, C), lambda j: (0, 0)),    # x slab (resident across tiles)
                pl.BlockSpec((1, C), lambda j: (0, 0)),    # gamma
                pl.BlockSpec((1, C), lambda j: (0, 0)),    # beta
                pl.BlockSpec((tn, C), lambda j: (j, 0)),   # contiguous weight row block
                pl.BlockSpec((1, tn), lambda j: (0, j)),   # bias tile
            ],
            out_specs=pl.BlockSpec((T, tn), lambda j: (0, j)),
        ),
        compiler_params=pltpu.CompilerParams(
            dimension_semantics=("parallel",),
        ),
        cost_estimate=cost,
    )(x2d, g2d, b2d, weight, bias2d)

    return out2d.reshape(N, H, W, F)


def reference(x_nhwc, gamma, beta, weight, bias):
    x = x_nhwc.astype(jnp.float32)
    mean = jnp.mean(x, axis=-1, keepdims=True)
    var = jnp.mean((x - mean) ** 2, axis=-1, keepdims=True)
    xn = (x - mean) * lax.rsqrt(var + EPS) * gamma + beta
    y = jnp.einsum("nhwc,oc->nhwo", xn, weight) + bias
    return 0.5 * y * (1.0 + lax.erf(y / jnp.sqrt(2.0)))


if __name__ == "__main__":
    key = jax.random.PRNGKey(0)
    kx, kg, kb, kw, kbias = jax.random.split(key, 5)

    # Shapes implied by the module's forward: x274 is [1, 14, 14, 512] (channels-last).
    N, H, W, C, F = 1, 14, 14, 512, 2048
    x = jax.random.normal(kx, (N, H, W, C), dtype=jnp.float32)

    # Deterministic synthetic parameters (module __init__ shapes).
    gamma = 1.0 + 0.02 * jax.random.normal(kg, (C,), dtype=jnp.float32)
    beta = 0.02 * jax.random.normal(kb, (C,), dtype=jnp.float32)
    weight = 0.02 * jax.random.normal(kw, (F, C), dtype=jnp.float32)   # PyTorch Linear: (out, in)
    bias = 0.02 * jax.random.normal(kbias, (F,), dtype=jnp.float32)

    # One-time (outside the hot path) parameter prep: keep (out, in) layout, ship in bf16.
    weight_bf16 = jax.block_until_ready(weight.astype(jnp.bfloat16))

    out = layernorm_linear_gelu(x, gamma, beta, weight_bf16, bias)
    out = jax.block_until_ready(out)

    ref = jax.block_until_ready(reference(x, gamma, beta, weight, bias))
    assert out.shape == (N, H, W, F), out.shape
    max_err = float(jnp.max(jnp.abs(out - ref)))
    # bf16 matmul operands (f32 accumulate): tolerance loosened vs a pure-f32 path.
    assert max_err < 2e-2, f"max abs error {max_err}"

    print("KERNEL_OK")
</pallas_src>

<mosaic_0001>
module attributes {stable_mosaic.version = 11 : i64} {
  func.func @ln_linear_gelu_kernel(%arg0: i32, %arg1: memref<196x512xf32, #tpu.memory_space<vmem>>, %arg2: memref<1x512xf32, #tpu.memory_space<vmem>>, %arg3: memref<1x512xf32, #tpu.memory_space<vmem>>, %arg4: memref<512x512xbf16, #tpu.memory_space<vmem>>, %arg5: memref<1x512xf32, #tpu.memory_space<vmem>>, %arg6: memref<196x512xf32, #tpu.memory_space<vmem>>) attributes {dimension_semantics = [#tpu.dimension_semantics<parallel>], iteration_bounds = array<i64: 4>, scalar_prefetch = 0 : i64, scratch_operands = 0 : i64, tpu.core_type = #tpu.core_type<tc>, window_params = [{pipeline_mode = #tpu.pipeline_mode<synchronous>, transform_indices = @transform_0, window_bounds = array<i64: 196, 512>}, {pipeline_mode = #tpu.pipeline_mode<synchronous>, transform_indices = @transform_1, window_bounds = array<i64: 1, 512>}, {pipeline_mode = #tpu.pipeline_mode<synchronous>, transform_indices = @transform_2, window_bounds = array<i64: 1, 512>}, {transform_indices = @transform_3, window_bounds = array<i64: 512, 512>}, {transform_indices = @transform_4, window_bounds = array<i64: 1, 512>}, {transform_indices = @transform_5, window_bounds = array<i64: 196, 512>}]} {
    %c0 = arith.constant 0 : index
    %c0_0 = arith.constant 0 : index
    %0 = vector.load %arg1[%c0, %c0_0] : memref<196x512xf32, #tpu.memory_space<vmem>>, vector<196x512xf32>
    %cst = arith.constant dense<0.000000e+00> : vector<196xf32>
    %1 = vector.multi_reduction <add>, %0, %cst [1] : vector<196x512xf32> to vector<196xf32>
    %2 = vector.shape_cast %1 : vector<196xf32> to vector<196x1xf32>
    %cst_1 = arith.constant 5.120000e+02 : f32
    %3 = vector.broadcast %cst_1 : f32 to vector<196x1xf32>
    %4 = arith.divf %2, %3 : vector<196x1xf32>
    %5 = vector.broadcast %4 : vector<196x1xf32> to vector<196x512xf32>
    %6 = arith.subf %0, %5 : vector<196x512xf32>
    %7 = arith.mulf %6, %6 : vector<196x512xf32>
    %cst_2 = arith.constant dense<0.000000e+00> : vector<196xf32>
    %8 = vector.multi_reduction <add>, %7, %cst_2 [1] : vector<196x512xf32> to vector<196xf32>
    %9 = vector.shape_cast %8 : vector<196xf32> to vector<196x1xf32>
    %cst_3 = arith.constant 5.120000e+02 : f32
    %10 = vector.broadcast %cst_3 : f32 to vector<196x1xf32>
    %11 = arith.divf %9, %10 : vector<196x1xf32>
    %cst_4 = arith.constant 9.99999997E-7 : f32
    %12 = vector.broadcast %cst_4 : f32 to vector<196x1xf32>
    %13 = arith.addf %11, %12 : vector<196x1xf32>
    %14 = math.rsqrt %13 : vector<196x1xf32>
    %15 = vector.broadcast %14 : vector<196x1xf32> to vector<196x512xf32>
    %16 = arith.mulf %6, %15 : vector<196x512xf32>
    %c0_5 = arith.constant 0 : index
    %c0_6 = arith.constant 0 : index
    %17 = vector.load %arg2[%c0_5, %c0_6] : memref<1x512xf32, #tpu.memory_space<vmem>>, vector<1x512xf32>
    %18 = vector.broadcast %17 : vector<1x512xf32> to vector<196x512xf32>
    %19 = arith.mulf %16, %18 : vector<196x512xf32>
    %c0_7 = arith.constant 0 : index
    %c0_8 = arith.constant 0 : index
    %20 = vector.load %arg3[%c0_7, %c0_8] : memref<1x512xf32, #tpu.memory_space<vmem>>, vector<1x512xf32>
    %21 = vector.broadcast %20 : vector<1x512xf32> to vector<196x512xf32>
    %22 = arith.addf %19, %21 : vector<196x512xf32>
    %23 = arith.truncf %22 : vector<196x512xf32> to vector<196x512xbf16>
    %c0_9 = arith.constant 0 : index
    %c0_10 = arith.constant 0 : index
    %24 = vector.load %arg4[%c0_9, %c0_10] : memref<512x512xbf16, #tpu.memory_space<vmem>>, vector<512x512xbf16>
    %cst_11 = arith.constant dense<0.000000e+00> : vector<196x512xf32>
    %25 = tpu.matmul %23, %24, %cst_11 {dimension_numbers = #tpu.dot_dimension_numbers<[1], [1], [0], [0], [0, 0, 1, 0], [], []>} : vector<196x512xbf16>, vector<512x512xbf16>, vector<196x512xf32> -> vector<196x512xf32>
    %c0_12 = arith.constant 0 : index
    %c0_13 = arith.constant 0 : index
    %26 = vector.load %arg5[%c0_12, %c0_13] : memref<1x512xf32, #tpu.memory_space<vmem>>, vector<1x512xf32>
    %27 = vector.broadcast %26 : vector<1x512xf32> to vector<196x512xf32>
    %28 = arith.addf %25, %27 : vector<196x512xf32>
    %cst_14 = arith.constant 5.000000e-01 : f32
    %29 = vector.broadcast %cst_14 : f32 to vector<196x512xf32>
    %30 = arith.mulf %29, %28 : vector<196x512xf32>
    %cst_15 = arith.constant 0.707106769 : f32
    %31 = vector.broadcast %cst_15 : f32 to vector<196x512xf32>
    %32 = arith.mulf %28, %31 : vector<196x512xf32>
    %33 = math.erf %32 : vector<196x512xf32>
    %cst_16 = arith.constant 1.000000e+00 : f32
    %34 = vector.broadcast %cst_16 : f32 to vector<196x512xf32>
    %35 = arith.addf %34, %33 : vector<196x512xf32>
    %36 = arith.mulf %30, %35 : vector<196x512xf32>
    %c0_17 = arith.constant 0 : index
    %c0_18 = arith.constant 0 : index
    %37 = vector.load %arg6[%c0_17, %c0_18] : memref<196x512xf32, #tpu.memory_space<vmem>>, vector<196x512xf32>
    tpu.vector_store %arg6[%c0_17, %c0_18], %36 {strides = array<i32>} : memref<196x512xf32, #tpu.memory_space<vmem>>, vector<196x512xf32>,
    return
  }
  func.func @transform_0(%arg0: i32) -> (i32, i32) {
    %c0_i32 = arith.constant 0 : i32
    %c0_i32_0 = arith.constant 0 : i32
    %c0_i32_1 = arith.constant 0 : i32
    return %c0_i32, %c0_i32_0 : i32, i32
  }
  func.func @transform_1(%arg0: i32) -> (i32, i32) {
    %c0_i32 = arith.constant 0 : i32
    %c0_i32_0 = arith.constant 0 : i32
    %c0_i32_1 = arith.constant 0 : i32
    return %c0_i32, %c0_i32_0 : i32, i32
  }
  func.func @transform_2(%arg0: i32) -> (i32, i32) {
    %c0_i32 = arith.constant 0 : i32
    %c0_i32_0 = arith.constant 0 : i32
    %c0_i32_1 = arith.constant 0 : i32
    return %c0_i32, %c0_i32_0 : i32, i32
  }
  func.func @transform_3(%arg0: i32) -> (i32, i32) {
    %c0_i32 = arith.constant 0 : i32
    %c0_i32_0 = arith.constant 0 : i32
    return %arg0, %c0_i32 : i32, i32
  }
  func.func @transform_4(%arg0: i32) -> (i32, i32) {
    %c0_i32 = arith.constant 0 : i32
    %c0_i32_0 = arith.constant 0 : i32
    return %c0_i32, %arg0 : i32, i32
  }
  func.func @transform_5(%arg0: i32) -> (i32, i32) {
    %c0_i32 = arith.constant 0 : i32
    %c0_i32_0 = arith.constant 0 : i32
    return %c0_i32, %arg0 : i32, i32
  }
}

</mosaic_0001>

<bundles_post_ra>
// kernel: layernorm_linear_gelu.1
= control target key start
LH: loop header
LB: loop body
LE: loop exit
PB: predicated region body
PF: predicated region fallthrough
CT: control target
= control target key end

     0   :  { %10 = vsyncpa [#allocation3], 0  ;;  %s7640_s0 = inlined_call_operand.vmem [shape: f32[196,512], index: 0, kind: input, shape index: {}]   ;;  %s7641_s1 = inlined_call_operand.vmem [shape: f32[1,512], index: 1, kind: input, shape index: {}]   ;;  %s7642_s2 = inlined_call_operand.vmem [shape: f32[1,512], index: 2, kind: input, shape index: {}]   ;;  %s7643_s3 = inlined_call_operand.hbm [shape: bf16[2048,512], index: 3, kind: input, shape index: {}]   ;;  %s7644_s4 = inlined_call_operand.vmem [shape: f32[1,2048], index: 4, kind: input, shape index: {}]   ;;  %s7645_s5 = inlined_call_operand.vmem [shape: f32[196,2048], index: 5, kind: output, shape index: {}]  }
   0x1   :  { %12 = vsyncpa [#allocation3 + $0x1], 0  ;;  %s4589_s18 = smov 0   ;;  %s4591_s19 = smov 0  }
   0x2   :  { %s4593_s20 = smov 0   ;;  %s4595_s21 = smov 0  }
   0x3 LB: > { %s4608_s22 = sadd.s32 4294967295, %s4554_s21   ;;  %s4611_s23 = sadd.s32 1, %s4554_s21   ;;  %s4554_s21 = sphi %s4595_s21, %s8039_s21   ;;  %s4550_s20 = sphi %s4593_s20, %s8038_s20   ;;  %s4546_s19 = sphi %s4591_s19, %s8037_s19   ;;  %s4542_s18 = sphi %s4589_s18, %s8036_s18  }
   0x4   : > { %s85_s24 = ssub.s32 %s4554_s21, %s4611_s23  ;;  %s88_s25 = sadd.s32 1, %s4550_s20 }
   0x5   : > { %p86_p0 = scmp.eq.s32.totalorder %s85_s24, 0  ;;  %p95_p1 = scmp.ne.s32.totalorder %s4550_s20, %s4546_s19 }
   0x6   : > { %p96_p2 = scmp.eq.s32.totalorder %s4554_s21, 0  ;;  %p101_p3 = scmp.ne.s32.totalorder %s4546_s19, %s4542_s18 }
   0x7   : > { %s4621_s26 = scalar_select %p86_p0, %s4550_s20, %s88_s25  }
   0x8   : > { %p4623_p4 = por %p96_p2, %p95_p1  ;;  %p102_p5 = scmp.eq.s32.totalorder %s4608_s22, 0 }
   0x9   : > { %p151_p6 = scmp.eq.s32.totalorder %s4608_s22, 3  ;;  %p4003_p8 = scmp.lt.s32.totalorder %s4554_s21, 4 }
   0xa   : > { %p4629_p7 = por %p102_p5, %p101_p3  ;;  %s186_s30 = sand.u32 1, %s4550_s20  }
   0xb   : > { %p4634_p9 = por %p151_p6, %p95_p1  ;;  %s3650_s6 = sshll.u32 %s186_s30, 10 }
   0xc   : > { %s3790_s7 = sshll.u32 %s4554_s21, 14  ;;  %s190_s11 = scalar_lea.vmem [#allocation2], %s3650_s6 }
   0xd   : > { %s7776_s29 = scalar_select %p4634_p9, 1, 0 }
   0xe   : > { %s4643_s10 = scalar_lea.hbm %s7643_s3, %s3790_s7  ;;  %s198_s12 = sshll.u32 %s190_s11, 4  ;;  %s4645_s12 = int_to_ptr.vmem [resolvable:$true] %s198_s12 }
   0xf   : > { %p4649_p10 = pnand %p4003_p8, %p4623_p4  ;;  %s4654_s14 = scalar_lea.sflag [#allocation3], %s186_s30 }
  0x10   : > { %s4490_s15 = scalar_lea.hbm %s4643_s10, 16384  ;;  %s4495_s18 = scalar_lea.hbm %s7643_s3, 65536 }
  0x11   : > { %p4491_p12 = scmp.ne.s32.totalorder %s4643_s10, %s4490_s15  ;;  %p4492_p13 = pneg %p4649_p10 }
  0x12   : > { %p4496_p2 = scmp.lt.u32.totalorder %s4643_s10, %s7643_s3  ;;  %p4497_p3 = scmp.lt.u32.totalorder %s4495_s18, %s4490_s15 }
  0x13   : > { %p4493_p0 = pnand %p4492_p13, %p4491_p12  ;;  %p4499_p5 = scmp.lt.u32.totalorder %s4490_s15, %s4643_s10 }
  0x14   : > { %p4498_p4 = por %p4497_p3, %p4496_p2 }
  0x15   : > { %p4494_p1 = pneg %p4493_p0 }
  0x16   : > { %p4500_p6 = por %p4499_p5, %p4498_p4 }
  0x18   : > { %p4501_p8 = pnand %p4500_p6, %p4494_p1 }
  0x1a   : > { %4504 = shalt.err (!%p4501_p8)
}
  0x1b   : > { %s4505_s27 = scalar_lea.vmem %s4645_s12, 16384  ;;  %s4556_s30 = smov [#allocation2]  }
  0x1c   : > { %p4506_p12 = scmp.ne.s32.totalorder %s4645_s12, %s4505_s27  ;;  %s4510_s6 = sshll.u32 %s4556_s30, 4  ;;  %s4511_s6 = int_to_ptr.vmem [resolvable:$false] %s4510_s6 }
  0x1d   : > { %s4512_s7 = scalar_lea.vmem %s4511_s6, 32768  ;;  %p4513_p9 = scmp.lt.s32.totalorder %s4645_s12, %s4511_s6 }
  0x1e   : > { %p4508_p0 = pnand %p4506_p12, %p4492_p13  ;;  %p4514_p2 = scmp.lt.s32.totalorder %s4512_s7, %s4505_s27 }
  0x20   : > { %p4509_p11 = pneg %p4508_p0  ;;  %p4515_p3 = por %p4514_p2, %p4513_p9 }
  0x22   : > { %p4516_p4 = pnand %p4515_p3, %p4509_p11 }
  0x24   : > { %4519 = shalt.err (!%p4516_p4)
}
  0x25   : > { %s4557_s8 = smov 256   ;;  %s4558_s9 = smov 16  }
  0x26   : > { %4002 = dma.hbm_to_vmem [thread:$0]  (!%p4649_p10), %s4643_s10, 16384, %s4645_s12, %s4654_s14, %s4557_s8, %s4557_s8, %s4558_s9  }
  0x27   : > { %p214_p13 = scmp.lt.s32.totalorder %s4554_s21, 5  ;;  %p7778_p1 = scmp.ge.s32.totalorder %s4554_s21, 1 }
  0x29   : > { %p215_p5 = pnand %p7778_p1, %p214_p13 }
  0x2b   : > { %218 = sbr.rel (%p215_p5) target bundleno = 997 (0x3e5), region = 40 }
  0x32   : > { %s4686_s11 = sand.u32 1, %s4546_s19  }
  0x33   : > { %s3655_s15 = sshll.u32 %s4686_s11, 10  ;;  %s221_s16 = scalar_lea.sflag [#allocation3], %s4686_s11 }
  0x34   : > { %s4690_s17 = scalar_lea.vmem [#allocation2], %s3655_s15 }
  0x35   : > { %4537 = dma.done.wait (%p4629_p7), %s221_s16, 16384  }
  0x36   : > { %4539 = vsyncadd (%p4629_p7), %s221_s16, 4294950912  ;;  %v4699_v0 = vld [vmem:[%s7640_s0] sm:$0xff]  ;;  %v4704_v1 = vld [vmem:[%s7640_s0 + $0x8] sm:$0xff]  ;;  %vm481_vm0 = vcmask 1043456   ;;  %s3996_s28 = smul.u32 800, %s4686_s11  ;;  %p8035_p9 = scmp.ne.s32.totalorder %s7776_s29, 0 }
  0x37   : > { %v4709_v2 = vld [vmem:[%s7640_s0 + $0x10] sm:$0xff]  ;;  %v361_v3 = vadd.f32 %v4704_v1, %v4699_v0  ;;  %v4716_v4 = vld [vmem:[%s7640_s0 + $0x20] sm:$0xff]  ;;  %v4721_v5 = vld [vmem:[%s7640_s0 + $0x28] sm:$0xff]  ;;  %s3791_s11 = sshll.u32 (%p8035_p9), %s4608_s22, 5 }
  0x38   : > { %v4726_v6 = vld [vmem:[%s7640_s0 + $0x18] sm:$0xff]  ;;  %v4731_v7 = vld [vmem:[%s7640_s0 + $0x30] sm:$0xff]  ;;  %v366_v8 = vadd.f32 %v4721_v5, %v4716_v4  ;;  %v4738_v9 = vld [vmem:[%s7640_s0 + $0x40] sm:$0xff]  ;;  %s6670_s24 = scalar_lea.vmem [#allocation4], %s3996_s28  ;;  %s7428_s30 = scalar_lea.vmem (%p8035_p9), %s7645_s5, %s3791_s11 }
  0x39   : > { %v362_v10 = vadd.f32 %v361_v3, %v4709_v2  ;;  %v4744_v11 = vld [vmem:[%s7640_s0 + $0x38] sm:$0xff]  ;;  %v4749_v12 = vld [vmem:[%s7640_s0 + $0x48] sm:$0xff]  ;;  %v4754_v13 = vld [vmem:[%s7640_s0 + $0x50] sm:$0xff] }
  0x3a   : > { %v367_v14 = vadd.f32 %v366_v8, %v4731_v7  ;;  %v371_v15 = vadd.f32 %v4749_v12, %v4738_v9  ;;  %v4762_v16 = vld [vmem:[%s7640_s0 + $0x60] sm:$0xff]  ;;  %v4767_v17 = vld [vmem:[%s7640_s0 + $0x68] sm:$0xff]  ;;  %v4772_v18 = vld [vmem:[%s7640_s0 + $0x70] sm:$0xff] }
  0x3b   : > { %v363_v19 = vadd.f32 %v362_v10, %v4726_v6  ;;  %v4778_v20 = vld [vmem:[%s7640_s0 + $0x58] sm:$0xff]  ;;  %v376_v21 = vadd.f32 %v4767_v17, %v4762_v16  ;;  %v4785_v22 = vld [vmem:[%s7640_s0 + $0xa0] sm:$0xff]  ;;  %v4790_v23 = vld [vmem:[%s7640_s0 + $0xa8] sm:$0xff] }
  0x3c   : > { %v372_v24 = vadd.f32 %v371_v15, %v4754_v13  ;;  %v4796_v25 = vld [vmem:[%s7640_s0 + $0xb0] sm:$0xff]  ;;  %v386_v26 = vadd.f32 %v4790_v23, %v4785_v22  ;;  %v4803_v27 = vld [vmem:[%s7640_s0 + $0x80] sm:$0xff]  ;;  %v368_v28 = vadd.f32 %v367_v14, %v4744_v11  ;;  %v4809_v29 = vld [vmem:[%s7640_s0 + $0x78] sm:$0xff] }
  0x3d   : > { %364 = vadd.xlane.f32.xlu0 %v363_v19  ;;  %v377_v30 = vadd.f32 %v376_v21, %v4772_v18  ;;  %v4815_v31 = vld [vmem:[%s7640_s0 + $0x88] sm:$0xff]  ;;  %v4820_v32 = vld [vmem:[%s7640_s0 + $0x90] sm:$0xff]  ;;  %v4828_v35 = vld [vmem:[%s7640_s0 + $0xe0] sm:$0xff] }
  0x3e   : > { %v373_v33 = vadd.f32 %v372_v24, %v4778_v20  ;;  %v381_v34 = vadd.f32 %v4815_v31, %v4803_v27  ;;  %v4833_v36 = vld [vmem:[%s7640_s0 + $0xe8] sm:$0xff]  ;;  %v387_v37 = vadd.f32 %v386_v26, %v4796_v25  ;;  %v4839_v38 = vld [vmem:[%s7640_s0 + $0x98] sm:$0xff]  ;;  %v4844_v39 = vld [vmem:[%s7640_s0 + $0xc0] sm:$0xff] }
  0x3f   : > { %v4849_v40 = vld [vmem:[%s7640_s0 + $0xc8] sm:$0xff]  ;;  %v378_v41 = vadd.f32 %v377_v30, %v4809_v29  ;;  %v4855_v42 = vld [vmem:[%s7640_s0 + $0xb8] sm:$0xff]  ;;  %v4861_v44 = vld [vmem:[%s7640_s0 + $0xf0] sm:$0xff]  ;;  %v396_v45 = vadd.f32 %v4833_v36, %v4828_v35 }
  0x40   : > { %374 = vadd.xlane.f32.xlu1 %v373_v33  ;;  %v382_v43 = vadd.f32 %v381_v34, %v4820_v32  ;;  %7779 = vst [vmem:[#allocation6_spill] sm:$0xff] %v4861_v44  ;;  %v4868_v46 = vld [vmem:[%s7640_s0 + $0xd0] sm:$0xff]  ;;  %v391_v47 = vadd.f32 %v4849_v40, %v4844_v39  ;;  %v4875_v48 = vld [vmem:[%s7640_s0 + $0xd8] sm:$0xff]  ;;  %v4880_v49 = vld [vmem:[%s7640_s0 + $0x120] sm:$0xff]  ;;  %v388_v57 = vadd.f32 %v387_v37, %v4855_v42 }
  0x41   : > { %7780 = vst [vmem:[#allocation7_spill] sm:$0xff] %v4868_v46  ;;  %369 = vadd.xlane.f32.xlu0 %v368_v28  ;;  %7781 = vst [vmem:[#allocation8_spill] sm:$0xff] %v4875_v48  ;;  %v4885_v50 = vld [vmem:[%s7640_s0 + $0x128] sm:$0xff]  ;;  %v4892_v53 = vld [vmem:[%s7640_s0 + $0x100] sm:$0xff]  ;;  %v397_v59 = vadd.f32 %v396_v45, %v4861_v44 }
  0x42   : > { %v383_v51 = vadd.f32 %v382_v43, %v4839_v38  ;;  %v392_v52 = vadd.f32 %v391_v47, %v4868_v46  ;;  %v4897_v54 = vld [vmem:[%s7640_s0 + $0x108] sm:$0xff]  ;;  %v295_v55 = vld [vmem:[%s7640_s0 + $0x110] sm:$0xff]  ;;  %v4908_v58 = vld [vmem:[%s7640_s0 + $0xf8] sm:$0xff]  ;;  %v406_v61 = vadd.f32 %v4885_v50, %v4880_v49 }
  0x43   : > { %v401_v56 = vadd.f32 %v4897_v54, %v4892_v53  ;;  %7782 = vst [vmem:[#allocation9_spill] sm:$0xff] %v4908_v58  ;;  %v4914_v60 = vld [vmem:[%s7640_s0 + $0x130] sm:$0xff]  ;;  %v4921_v62 = vld [vmem:[%s7640_s0 + $0x140] sm:$0xff]  ;;  %v4932_v10 = vld [vmem:[%s7640_s0 + $0x168] sm:$0xff]  ;;  %v398_v28 = vadd.f32 %v397_v59, %v4908_v58 }
  0x44   : > { %379 = vadd.xlane.f32.xlu1 %v378_v41  ;;  %7783 = vst [vmem:[#allocation10_spill] sm:$0xff] %v4914_v60  ;;  %v393_v63 = vadd.f32 %v392_v52, %v4875_v48  ;;  %v4927_v8 = vld [vmem:[%s7640_s0 + $0x160] sm:$0xff]  ;;  %7785 = vst [vmem:[#allocation12_spill] sm:$0xff] %v4932_v10  ;;  %v4937_v14 = vld [vmem:[%s7640_s0 + $0x148] sm:$0xff]  ;;  %v407_v33 = vadd.f32 %v406_v61, %v4914_v60 }
  0x45   : > { %384 = vadd.xlane.f32.xlu0 %v383_v51  ;;  %v402_v3 = vadd.f32 %v401_v56, %v295_v55  ;;  %7784 = vst [vmem:[#allocation11_spill] sm:$0xff] %v4927_v8  ;;  %7786 = vst [vmem:[#allocation13_spill] sm:$0xff] %v4937_v14  ;;  %v296_v15 = vld [vmem:[%s7640_s0 + $0x118] sm:$0xff]  ;;  %v303_v19 = vld [vmem:[%s7640_s0 + $0x150] sm:$0xff]  ;;  %v411_v21 = vadd.f32 %v4937_v14, %v4921_v62  ;;  %v416_v37 = vadd.f32 %v4932_v10, %v4927_v8 }
  0x46   : > { %v4950_v24 = vld [vmem:[%s7640_s0 + $0x180] sm:$0xff]  ;;  %v4955_v26 = vld [vmem:[%s7640_s0 + $0x188] sm:$0xff]  ;;  %v4961_v30 = vld [vmem:[%s7640_s0 + $0x138] sm:$0xff] }
  0x47   : > { %7787 = vst [vmem:[#allocation14_spill] sm:$0xff] %v4950_v24  ;;  %7788 = vst [vmem:[#allocation15_spill] sm:$0xff] %v4955_v26  ;;  %v4967_v34 = vld [vmem:[%s7640_s0 + $0x170] sm:$0xff]  ;;  %v403_v41 = vadd.f32 %v402_v3, %v296_v15  ;;  %v304_v43 = vld [vmem:[%s7640_s0 + $0x158] sm:$0xff]  ;;  %v412_v45 = vadd.f32 %v411_v21, %v303_v19  ;;  %v421_v52 = vadd.f32 %v4955_v26, %v4950_v24 }
  0x48   : > { %389 = vadd.xlane.f32.xlu1 %v388_v57  ;;  %7789 = vst [vmem:[#allocation16_spill] sm:$0xff] %v4961_v30  ;;  %7790 = vst [vmem:[#allocation17_spill] sm:$0xff] %v4967_v34  ;;  %v4977_v47 = vld [vmem:[%s7640_s0 + $0x1a0] sm:$0xff]  ;;  %v4982_v51 = vld [vmem:[%s7640_s0 + $0x1a8] sm:$0xff]  ;;  %v408_v15 = vadd.f32 %v407_v33, %v4961_v30  ;;  %v417_v19 = vadd.f32 %v416_v37, %v4967_v34 }
  0x49   : > { %394 = vadd.xlane.f32.xlu0 %v393_v63  ;;  %7791 = vst [vmem:[#allocation18_spill] sm:$0xff] %v4977_v47  ;;  %7792 = vst [vmem:[#allocation19_spill] sm:$0xff] %v4982_v51  ;;  %v311_v55 = vld [vmem:[%s7640_s0 + $0x190] sm:$0xff]  ;;  %v4992_v56 = vld [vmem:[%s7640_s0 + $0x1c0] sm:$0xff]  ;;  %v426_v21 = vadd.f32 %v4982_v51, %v4977_v47  ;;  %v413_v46 = vadd.f32 %v412_v45, %v304_v43 }
  0x4a   : > { %7793 = vst [vmem:[#allocation20_spill] sm:$0xff] %v4992_v56  ;;  %v4997_v57 = vld [vmem:[%s7640_s0 + $0x1c8] sm:$0xff]  ;;  %v5002_v59 = vld [vmem:[%s7640_s0 + $0x178] sm:$0xff]  ;;  %v315_v61 = vld [vmem:[%s7640_s0 + $0x1b0] sm:$0xff]  ;;  %v422_v26 = vadd.f32 %v421_v52, %v311_v55 }
  0x4b   : > { %7794 = vst [vmem:[#allocation21_spill] sm:$0xff] %v4997_v57  ;;  %7795 = vst [vmem:[#allocation22_spill] sm:$0xff] %v5002_v59  ;;  %v5010_v63 = vld [vmem:[%s7640_s0 + $0x1e0] sm:$0xff]  ;;  %v5015_v3 = vld [vmem:[%s7640_s0 + $0x1e8] sm:$0xff]  ;;  %v418_v34 = vadd.f32 %v417_v19, %v5002_v59  ;;  %v427_v30 = vadd.f32 %v426_v21, %v315_v61 }
  0x4c   : > { %7796 = vst [vmem:[#allocation23_spill] sm:$0xff] %v5010_v63  ;;  %7797 = vst [vmem:[#allocation24_spill] sm:$0xff] %v5015_v3  ;;  %399 = vadd.xlane.f32.xlu1 %v398_v28  ;;  %v312_v60 = vld [vmem:[%s7640_s0 + $0x198] sm:$0xff]  ;;  %v319_v48 = vld [vmem:[%s7640_s0 + $0x1d0] sm:$0xff]  ;;  %v431_v28 = vadd.f32 %v4997_v57, %v4992_v56 }
  0x4d   : > { %404 = vadd.xlane.f32.xlu0 %v403_v41  ;;  %v5032_v33 = vld [vmem:[%s7640_s0 + $0x1b8] sm:$0xff]  ;;  %v323_v37 = vld [vmem:[%s7640_s0 + $0x1f0] sm:$0xff]  ;;  %v436_v41 = vadd.f32 %v5015_v3, %v5010_v63  ;;  %v423_v45 = vadd.f32 %v422_v26, %v312_v60  ;;  %v5161_v59 = vld [vmem:[%s7640_s0 + $0x2a0] sm:$0xff] }
  0x4e   : > { %7798 = vst [vmem:[#allocation25_spill] sm:$0xff] %v5032_v33  ;;  %v320_v43 = vld [vmem:[%s7640_s0 + $0x1d8] sm:$0xff]  ;;  %v432_v52 = vadd.f32 %v431_v28, %v319_v48  ;;  %v428_v55 = vadd.f32 %v427_v30, %v5032_v33  ;;  %v4038_v48 = vld [vmem:[%s4690_s17 + $0x4] ss:$16 sps:$4 sm:$0xff]   ;;  %v4042_v26 = vld [vmem:[%s4690_s17] ss:$16 sps:$4 sm:$0xff]  }
  0x4f   : > { %v5047_v61 = vld [vmem:[%s7640_s0 + $0x1f8] sm:$0xff]  ;;  %v4040_v60 = vld [vmem:[%s4690_s17 + $0x204] ss:$16 sps:$4 sm:$0xff]   ;;  %v4043_v30 = vld [vmem:[%s4690_s17 + $0x200] ss:$16 sps:$4 sm:$0xff]   ;;  %2107 = vmatprep.subr.bf16.mxu0 %v4038_v48  ;;  %7814 = vst [vmem:[#allocation41_spill] sm:$0xff] %v5161_v59 }
  0x50   : > { %409 = vadd.xlane.f32.xlu1 %v408_v15  ;;  %v437_v15 = vadd.f32 %v436_v41, %v323_v37  ;;  %7799 = vst [vmem:[#allocation26_spill] sm:$0xff] %v5047_v61  ;;  %v433_v19 = vadd.f32 %v432_v52, %v320_v43  ;;  %2429 = vmatprep.subr.bf16.mxu1 %v4040_v60  ;;  %v4046_v21 = vld [vmem:[%s4690_s17 + $0x224] ss:$16 sps:$4 sm:$0xff]   ;;  %v4048_v28 = vld [vmem:[%s4690_s17 + $0x20] ss:$16 sps:$4 sm:$0xff]   ;;  %v5166_v3 = vld [vmem:[%s7640_s0 + $0x2a8] sm:$0xff] }
  0x51   : > { %414 = vadd.xlane.f32.xlu0 %v413_v46  ;;  %2108 = vmatpush1.bf16.xpose.msra.mxu0 %v4042_v26  ;;  %v4049_v37 = vld [vmem:[%s4690_s17 + $0x220] ss:$16 sps:$4 sm:$0xff]   ;;  %v4050_v41 = vld [vmem:[%s4690_s17 + $0x44] ss:$16 sps:$4 sm:$0xff]   ;;  %7815 = vst [vmem:[#allocation42_spill] sm:$0xff] %v5166_v3  ;;  %v5252_v14 = vld [vmem:[%s7640_s0 + $0x258] sm:$0xff] }
  0x52   : > { %v438_v46 = vadd.f32 %v437_v15, %v5047_v61  ;;  %2430 = vmatpush1.bf16.xpose.msra.mxu1 %v4043_v30  ;;  %v4052_v43 = vld [vmem:[%s4690_s17 + $0x244] ss:$16 sps:$4 sm:$0xff]   ;;  %v4055_v52 = vld [vmem:[%s4690_s17 + $0x240] ss:$16 sps:$4 sm:$0xff]  }
  0x53   : > { %2431 = vmatprep.subr.bf16.mxu1 %v4046_v21  ;;  %v4058_v15 = vld [vmem:[%s4690_s17 + $0x264] ss:$16 sps:$4 sm:$0xff]   ;;  %v4066_v26 = vld [vmem:[%s4690_s17 + $0x80] ss:$16 sps:$4 sm:$0xff]  }
  0x54   : > { %419 = vadd.xlane.f32.xlu1 %v418_v34  ;;  %v4044_v34 = vld [vmem:[%s4690_s17 + $0x24] ss:$16 sps:$4 sm:$0xff]   ;;  %v4067_v30 = vld [vmem:[%s4690_s17 + $0x280] ss:$16 sps:$4 sm:$0xff]  }
  0x55   : > { %424 = vadd.xlane.f32.xlu0 %v423_v45  ;;  %2109 = vmatprep.subr.bf16.mxu0 %v4044_v34  ;;  %v4054_v45 = vld [vmem:[%s4690_s17 + $0x40] ss:$16 sps:$4 sm:$0xff]   ;;  %v4062_v48 = vld [vmem:[%s4690_s17 + $0x84] ss:$16 sps:$4 sm:$0xff]  }
  0x56   : > { %v4064_v60 = vld [vmem:[%s4690_s17 + $0x284] ss:$16 sps:$4 sm:$0xff]  }
  0x57   : > { %v4068_v34 = vld [vmem:[%s4690_s17 + $0xa4] ss:$16 sps:$4 sm:$0xff]  }
  0x58   : > { %429 = vadd.xlane.f32.xlu1 %v428_v55  ;;  %v4056_v55 = vld [vmem:[%s4690_s17 + $0x64] ss:$16 sps:$4 sm:$0xff]  }
  0x59   : > { %434 = vadd.xlane.f32.xlu0 %v433_v19  ;;  %2110 = vmatpush1.bf16.xpose.msra.mxu0 %v4048_v28  ;;  %v4060_v19 = vld [vmem:[%s4690_s17 + $0x60] ss:$16 sps:$4 sm:$0xff]   ;;  %v4070_v21 = vld [vmem:[%s4690_s17 + $0x2a4] ss:$16 sps:$4 sm:$0xff]  }
  0x5a   : > { %2432 = vmatpush1.bf16.xpose.msra.mxu1 %v4049_v37  ;;  %2111 = vmatprep.subr.bf16.mxu0 %v4050_v41  ;;  %v4072_v28 = vld [vmem:[%s4690_s17 + $0xa0] ss:$16 sps:$4 sm:$0xff]   ;;  %v4074_v41 = vld [vmem:[%s4690_s17 + $0xc4] ss:$16 sps:$4 sm:$0xff]  }
  0x5b   : > { %2433 = vmatprep.subr.bf16.mxu1 %v4052_v43  ;;  %v4073_v37 = vld [vmem:[%s4690_s17 + $0x2a0] ss:$16 sps:$4 sm:$0xff]   ;;  %v4076_v43 = vld [vmem:[%s4690_s17 + $0x2c4] ss:$16 sps:$4 sm:$0xff]  }
  0x5c   : > { %439 = vadd.xlane.f32.xlu1 %v438_v46  ;;  %v4061_v46 = vld [vmem:[%s4690_s17 + $0x260] ss:$16 sps:$4 sm:$0xff]   ;;  %v4098_v8 = vld [vmem:[%s4690_s17 + $0x144] ss:$16 sps:$4 sm:$0xff]  }
  0x5d   : > { %v5151_v61 = vld [vmem:[%s7640_s0 + $0x210] sm:$0xff]  ;;  %v5182_v47 = vld [vmem:[%s7640_s0 + $0x2e0] sm:$0xff] }
  0x5e   : > { %7812 = vst [vmem:[#allocation39_spill] sm:$0xff] %v5151_v61  ;;  %v5156_v33 = vld [vmem:[%s7640_s0 + $0x250] sm:$0xff]  ;;  %7817 = vst [vmem:[#allocation44_spill] sm:$0xff] %v5182_v47 }
  0x5f   : > { %7813 = vst [vmem:[#allocation40_spill] sm:$0xff] %v5156_v33  ;;  %v5175_v56 = vld [vmem:[%s7640_s0 + $0x230] sm:$0xff] }
  0x60   : > { %7816 = vst [vmem:[#allocation43_spill] sm:$0xff] %v5175_v56  ;;  %v4100_v58 = vld [vmem:[%s4690_s17 + $0x344] ss:$16 sps:$4 sm:$0xff]  }
  0x61   : > { %2112 = vmatpush1.bf16.xpose.msra.mxu0 %v4054_v45  ;;  %v4078_v45 = vld [vmem:[%s4690_s17 + $0xc0] ss:$16 sps:$4 sm:$0xff]  }
  0x62   : > { %2434 = vmatpush1.bf16.xpose.msra.mxu1 %v4055_v52  ;;  %2113 = vmatprep.subr.bf16.mxu0 %v4056_v55  ;;  %v4079_v52 = vld [vmem:[%s4690_s17 + $0x2c0] ss:$16 sps:$4 sm:$0xff]   ;;  %v4080_v55 = vld [vmem:[%s4690_s17 + $0xe4] ss:$16 sps:$4 sm:$0xff]  }
  0x63   : > { %2435 = vmatprep.subr.bf16.mxu1 %v4058_v15  ;;  %v4082_v15 = vld [vmem:[%s4690_s17 + $0x2e4] ss:$16 sps:$4 sm:$0xff]  }
  0x69   : > { %2114 = vmatpush1.bf16.xpose.msra.mxu0 %v4060_v19  ;;  %v4084_v19 = vld [vmem:[%s4690_s17 + $0xe0] ss:$16 sps:$4 sm:$0xff]  }
  0x6a   : > { %2436 = vmatpush1.bf16.xpose.msra.mxu1 %v4061_v46  ;;  %2115 = vmatprep.subr.bf16.mxu0 %v4062_v48  ;;  %v4085_v46 = vld [vmem:[%s4690_s17 + $0x2e0] ss:$16 sps:$4 sm:$0xff]   ;;  %v4086_v48 = vld [vmem:[%s4690_s17 + $0x104] ss:$16 sps:$4 sm:$0xff]  }
  0x6b   : > { %2437 = vmatprep.subr.bf16.mxu1 %v4064_v60  ;;  %v4088_v60 = vld [vmem:[%s4690_s17 + $0x304] ss:$16 sps:$4 sm:$0xff]  }
  0x71   : > { %2116 = vmatpush1.bf16.xpose.msra.mxu0 %v4066_v26  ;;  %v5087_v26 = vld [vmem:[%s7640_s0 + $0x200] sm:$0xff] }
  0x72   : > { %2438 = vmatpush1.bf16.xpose.msra.mxu1 %v4067_v30  ;;  %2117 = vmatprep.subr.bf16.mxu0 %v4068_v34  ;;  %7800 = vst [vmem:[#allocation27_spill] sm:$0xff] %v5087_v26  ;;  %v5092_v30 = vld [vmem:[%s7640_s0 + $0x208] sm:$0xff]  ;;  %v5097_v34 = vld [vmem:[%s7640_s0 + $0x240] sm:$0xff] }
  0x73   : > { %2439 = vmatprep.subr.bf16.mxu1 %v4070_v21  ;;  %7801 = vst [vmem:[#allocation28_spill] sm:$0xff] %v5092_v30  ;;  %7802 = vst [vmem:[#allocation29_spill] sm:$0xff] %v5097_v34  ;;  %v5102_v21 = vld [vmem:[%s7640_s0 + $0x248] sm:$0xff]  ;;  %v441_v63 = vadd.f32 %v5092_v30, %v5087_v26  ;;  %v4096_v30 = vld [vmem:[%s4690_s17 + $0x120] ss:$16 sps:$4 sm:$0xff]  }
  0x74   : > { %7803 = vst [vmem:[#allocation30_spill] sm:$0xff] %v5102_v21  ;;  %v451_v57 = vadd.f32 %v5102_v21, %v5097_v34  ;;  %v4097_v26 = vld [vmem:[%s4690_s17 + $0x320] ss:$16 sps:$4 sm:$0xff]  }
  0x75   : > { %v442_v24 = vadd.f32 %v441_v63, %v5151_v61 }
  0x76   : > { %v452_v10 = vadd.f32 %v451_v57, %v5156_v33  ;;  %v5271_v33 = vld [vmem:[%s7640_s0 + $0x298] sm:$0xff] }
  0x78   : > { %v5294_v44 = vadd.f32 %v452_v10, %v5252_v14 }
  0x79   : > { %2118 = vmatpush1.bf16.xpose.msra.mxu0 %v4072_v28  ;;  %v5107_v28 = vld [vmem:[%s7640_s0 + $0x220] sm:$0xff] }
  0x7a   : > { %2440 = vmatpush1.bf16.xpose.msra.mxu1 %v4073_v37  ;;  %2119 = vmatprep.subr.bf16.mxu0 %v4074_v41  ;;  %7804 = vst [vmem:[#allocation31_spill] sm:$0xff] %v5107_v28  ;;  %v4090_v37 = vld [vmem:[%s4690_s17 + $0x100] ss:$16 sps:$4 sm:$0xff]  }
  0x7b   : > { %2441 = vmatprep.subr.bf16.mxu1 %v4076_v43  ;;  %v4091_v41 = vld [vmem:[%s4690_s17 + $0x300] ss:$16 sps:$4 sm:$0xff]   ;;  %v5114_v43 = vld [vmem:[%s7640_s0 + $0x228] sm:$0xff] }
  0x7c   : > { %7805 = vst [vmem:[#allocation32_spill] sm:$0xff] %v5114_v43  ;;  %v446_v51 = vadd.f32 %v5114_v43, %v5107_v28 }
  0x7e   : > { %v447_v57 = vadd.f32 %v446_v51, %v5175_v56  ;;  %v5276_v51 = vld [vmem:[%s7640_s0 + $0x278] sm:$0xff] }
  0x81   : > { %2120 = vmatpush1.bf16.xpose.msra.mxu0 %v4078_v45  ;;  %v4092_v45 = vld [vmem:[%s4690_s17 + $0x124] ss:$16 sps:$4 sm:$0xff]  }
  0x82   : > { %2442 = vmatpush1.bf16.xpose.msra.mxu1 %v4079_v52  ;;  %2121 = vmatprep.subr.bf16.mxu0 %v4080_v55  ;;  %v4094_v52 = vld [vmem:[%s4690_s17 + $0x324] ss:$16 sps:$4 sm:$0xff]  }
  0x83   : > { %2443 = vmatprep.subr.bf16.mxu1 %v4082_v15  ;;  %v5121_v55 = vld [vmem:[%s7640_s0 + $0x280] sm:$0xff]  ;;  %v5126_v15 = vld [vmem:[%s7640_s0 + $0x288] sm:$0xff] }
  0x84   : > { %7806 = vst [vmem:[#allocation33_spill] sm:$0xff] %v5121_v55  ;;  %7807 = vst [vmem:[#allocation34_spill] sm:$0xff] %v5126_v15  ;;  %v461_v21 = vadd.f32 %v5126_v15, %v5121_v55  ;;  %v5213_v15 = vld [vmem:[%s7640_s0 + $0x270] sm:$0xff]  ;;  %v466_v55 = vadd.f32 %v5166_v3, %v5161_v59 }
  0x85   : > { %7822 = vst [vmem:[#allocation49_spill] sm:$0xff] %v5213_v15 }
  0x89   : > { %2122 = vmatpush1.bf16.xpose.msra.mxu0 %v4084_v19  ;;  %v5131_v19 = vld [vmem:[%s7640_s0 + $0x260] sm:$0xff] }
  0x8a   : > { %2444 = vmatpush1.bf16.xpose.msra.mxu1 %v4085_v46  ;;  %2123 = vmatprep.subr.bf16.mxu0 %v4086_v48  ;;  %7808 = vst [vmem:[#allocation35_spill] sm:$0xff] %v5131_v19  ;;  %v5136_v46 = vld [vmem:[%s7640_s0 + $0x268] sm:$0xff]  ;;  %v5141_v48 = vld [vmem:[%s7640_s0 + $0x2c0] sm:$0xff] }
  0x8b   : > { %2445 = vmatprep.subr.bf16.mxu1 %v4088_v60  ;;  %7809 = vst [vmem:[#allocation36_spill] sm:$0xff] %v5136_v46  ;;  %7810 = vst [vmem:[#allocation37_spill] sm:$0xff] %v5141_v48  ;;  %v5146_v60 = vld [vmem:[%s7640_s0 + $0x2c8] sm:$0xff]  ;;  %v456_v34 = vadd.f32 %v5136_v46, %v5131_v19  ;;  %v5230_v46 = vld [vmem:[%s7640_s0 + $0x218] sm:$0xff] }
  0x8c   : > { %7811 = vst [vmem:[#allocation38_spill] sm:$0xff] %v5146_v60  ;;  %v471_v43 = vadd.f32 %v5146_v60, %v5141_v48  ;;  %v5218_v60 = vld [vmem:[%s7640_s0 + $0x2d0] sm:$0xff]  ;;  %v5291_v61 = vadd.f32 %v442_v24, %v5230_v46 }
  0x8d   : > { %7823 = vst [vmem:[#allocation50_spill] sm:$0xff] %v5218_v60  ;;  %v5223_v48 = vld [vmem:[%s7640_s0 + $0x2b0] sm:$0xff] }
  0x8e   : > { %7824 = vst [vmem:[#allocation51_spill] sm:$0xff] %v5223_v48  ;;  %v5235_v19 = vld [vmem:[%s7640_s0 + $0x2f0] sm:$0xff] }
  0x8f   : > { %7825 = vst [vmem:[#allocation52_spill] sm:$0xff] %v5235_v19 }
  0x91   : > { %2124 = vmatpush1.bf16.xpose.msra.mxu0 %v4090_v37  ;;  %v5187_v37 = vld [vmem:[%s7640_s0 + $0x2e8] sm:$0xff] }
  0x92   : > { %2446 = vmatpush1.bf16.xpose.msra.mxu1 %v4091_v41  ;;  %7818 = vst [vmem:[#allocation45_spill] sm:$0xff] %v5187_v37  ;;  %2125 = vmatprep.subr.bf16.mxu0 %v4092_v45  ;;  %v5192_v41 = vld [vmem:[%s7640_s0 + $0x290] sm:$0xff]  ;;  %v5203_v45 = vld [vmem:[%s7640_s0 + $0x300] sm:$0xf]  ;;  %v476_v28 = vadd.f32 %v5187_v37, %v5182_v47  ;;  %v5257_v37 = vld [vmem:[%s7640_s0 + $0x238] sm:$0xff] }
  0x93   : > { %2447 = vmatprep.subr.bf16.mxu1 %v4094_v52  ;;  %7819 = vst [vmem:[#allocation46_spill] sm:$0xff] %v5192_v41  ;;  %7820 = vst [vmem:[#allocation47_spill] sm:$0xff] %v5203_v45  ;;  %v5208_v52 = vld [vmem:[%s7640_s0 + $0x308] sm:$0xf]  ;;  %v482_v3 = vsel %vm481_vm0, %v5203_v45, 0.0  ;;  %v462_v63 = vadd.f32 %v461_v21, %v5192_v41  ;;  %v457_v45 = vadd.f32 %v456_v34, %v5213_v15  ;;  %v5281_v34 = vld [vmem:[%s7640_s0 + $0x2d8] sm:$0xff] }
  0x94   : > { %7821 = vst [vmem:[#allocation48_spill] sm:$0xff] %v5208_v52  ;;  %v483_v59 = vsel %vm481_vm0, %v5208_v52, 0.0  ;;  %v472_v52 = vadd.f32 %v471_v43, %v5218_v60  ;;  %v5266_v47 = vld [vmem:[%s7640_s0 + $0x310] sm:$0xf]  ;;  %7827 = vst [vmem:[#allocation54_spill] sm:$0xff] %v5281_v34  ;;  %v467_v21 = vadd.f32 %v466_v55, %v5223_v48  ;;  %v5287_v60 = vld [vmem:[%s7640_s0 + $0x2b8] sm:$0xff]  ;;  %v477_v41 = vadd.f32 %v476_v28, %v5235_v19 }
  0x95   : > { %7826 = vst [vmem:[#allocation53_spill] sm:$0xff] %v5266_v47  ;;  %7828 = vst [vmem:[#allocation55_spill] sm:$0xff] %v5287_v60  ;;  %v484_v15 = vadd.f32 %v483_v59, %v482_v3  ;;  %v5299_v55 = vld [vmem:[%s7640_s0 + $0x2f8] sm:$0xff]  ;;  %v485_v48 = vsel %vm481_vm0, %v5266_v47, 0.0  ;;  %v5304_v59 = vadd.f32 %v447_v57, %v5257_v37  ;;  %v5307_v24 = vadd.f32 %v462_v63, %v5271_v33  ;;  %v4102_v47 = vld [vmem:[%s4690_s17 + $0x140] ss:$16 sps:$4 sm:$0xff]  }
  0x96   : > { %7829 = vst [vmem:[#allocation56_spill] sm:$0xff] %v5299_v55  ;;  %v5310_v10 = vadd.f32 %v457_v45, %v5276_v51  ;;  %v5313_v3 = vadd.f32 %v472_v52, %v5281_v34  ;;  %v5330_v45 = vadd.f32 %v467_v21, %v5287_v60  ;;  %v4104_v60 = vld [vmem:[%s4690_s17 + $0x164] ss:$16 sps:$4 sm:$0xff]  }
  0x99   : > { %2126 = vmatpush1.bf16.xpose.msra.mxu0 %v4096_v30 }
  0x9a   : > { %2448 = vmatpush1.bf16.xpose.msra.mxu1 %v4097_v26  ;;  %2127 = vmatprep.subr.bf16.mxu0 %v4098_v8  ;;  %v5318_v26 = vld [vmem:[%s7640_s0 + $0x318] sm:$0xf] }
  0x9b   : > { %2449 = vmatprep.subr.bf16.mxu1 %v4100_v58  ;;  %7830 = vst [vmem:[#allocation57_spill] sm:$0xff] %v5318_v26  ;;  %v487_v34 = vsel %vm481_vm0, %v5318_v26, 0.0 }
  0xa1   : > { %2128 = vmatpush1.bf16.xpose.msra.mxu0 %v4102_v47 }
  0xa2   : > { %2129 = vmatprep.subr.bf16.mxu0 %v4104_v60 }
  0xca   : > { %v365_v43 = vpop.xlane.xlu0 %364 }
  0xcb   : > { %v492_v56 = vmul.f32 0.001953125, %v365_v43  ;;  %v486_v43 = vadd.f32 %v485_v48, %v484_v15 }
  0xcd   : > { %v5321_v58 = vsub.f32 %v4699_v0, %v492_v56  ;;  %v5324_v8 = vsub.f32 %v4704_v1, %v492_v56  ;;  %v5327_v30 = vsub.f32 %v4709_v2, %v492_v56  ;;  %v375_v28 = vpop.xlane.xlu1 %374  ;;  %v5333_v57 = vsub.f32 %v4726_v6, %v492_v56  ;;  %v4103_v1 = vld [vmem:[%s4690_s17 + $0x340] ss:$16 sps:$4 sm:$0xff]  }
  0xce   : > { %v370_v52 = vpop.xlane.xlu0 %369  ;;  %v494_v63 = vmul.f32 0.001953125, %v375_v28  ;;  %v5336_v0 = vadd.f32 %v477_v41, %v5299_v55  ;;  %v4106_v41 = vld [vmem:[%s4690_s17 + $0x364] ss:$16 sps:$4 sm:$0xff]   ;;  %2450 = vmatpush1.bf16.xpose.msra.mxu1 %v4103_v1 }
  0xcf   : > { %7831 = vst [vmem:[#allocation58_spill] sm:$0xff] %v5321_v58  ;;  %7832 = vst [vmem:[#allocation59_spill] sm:$0xff] %v5324_v8  ;;  %v493_v19 = vmul.f32 0.001953125, %v370_v52  ;;  %v617_v2 = vmul.f32 %v5321_v58, %v5321_v58  ;;  %v618_v21 = vmul.f32 %v5324_v8, %v5324_v8  ;;  %v619_v6 = vmul.f32 %v5327_v30, %v5327_v30 }
  0xd0   : > { %7833 = vst [vmem:[#allocation60_spill] sm:$0xff] %v5327_v30  ;;  %7834 = vst [vmem:[#allocation61_spill] sm:$0xff] %v5333_v57  ;;  %v5350_v56 = vsub.f32 %v4738_v9, %v494_v63  ;;  %v5353_v15 = vsub.f32 %v4749_v12, %v494_v63  ;;  %v5356_v48 = vsub.f32 %v4754_v13, %v494_v63  ;;  %2451 = vmatprep.subr.bf16.mxu1 %v4106_v41  ;;  %v4109_v41 = vld [vmem:[%s4690_s17 + $0x360] ss:$16 sps:$4 sm:$0xff]  }
  0xd1   : > { %v5360_v28 = vsub.f32 %v4716_v4, %v493_v19  ;;  %v5363_v52 = vsub.f32 %v4721_v5, %v493_v19  ;;  %v717_v26 = vadd.f32 %v618_v21, %v617_v2  ;;  %v5366_v55 = vsub.f32 %v4731_v7, %v493_v19  ;;  %v380_v30 = vpop.xlane.xlu1 %379 }
  0xd2   : > { %7835 = vst [vmem:[#allocation62_spill] sm:$0xff] %v5356_v48  ;;  %v620_v9 = vmul.f32 %v5333_v57, %v5333_v57  ;;  %v5371_v12 = vsub.f32 %v4744_v11, %v493_v19  ;;  %v495_v13 = vmul.f32 0.001953125, %v380_v30  ;;  %v385_v58 = vpop.xlane.xlu0 %384  ;;  %v5373_v8 = vadd.f32 %v487_v34, %v486_v43 }
  0xd3   : > { %7836 = vst [vmem:[#allocation63_spill] sm:$0xff] %v5366_v55  ;;  %v718_v4 = vadd.f32 %v717_v26, %v619_v6  ;;  %v621_v5 = vmul.f32 %v5360_v28, %v5360_v28  ;;  %v622_v7 = vmul.f32 %v5363_v52, %v5363_v52  ;;  %v625_v2 = vmul.f32 %v5350_v56, %v5350_v56  ;;  %v4108_v6 = vld [vmem:[%s4690_s17 + $0x160] ss:$16 sps:$4 sm:$0xff]  }
  0xd4   : > { %7837 = vst [vmem:[#allocation64_spill] sm:$0xff] %v5371_v12  ;;  %v623_v11 = vmul.f32 %v5366_v55, %v5366_v55  ;;  %v5384_v19 = vsub.f32 %v4762_v16, %v495_v13  ;;  %v5386_v47 = vmul.f32 0.001953125, %v385_v58  ;;  %v5389_v34 = vsub.f32 %v4778_v20, %v494_v63  ;;  %2130 = vmatpush1.bf16.xpose.msra.mxu0 %v4108_v6 }
  0xd5   : > { %v719_v26 = vadd.f32 %v718_v4, %v620_v9  ;;  %v722_v30 = vadd.f32 %v622_v7, %v621_v5  ;;  %v390_v43 = vpop.xlane.xlu1 %389  ;;  %v626_v60 = vmul.f32 %v5353_v15, %v5353_v15  ;;  %v627_v1 = vmul.f32 %v5356_v48, %v5356_v48 }
  0xd6   : > { %7838 = vst [vmem:[#allocation65_spill] sm:$0xff] %v5389_v34  ;;  %v624_v21 = vmul.f32 %v5371_v12, %v5371_v12  ;;  %v5398_v16 = vsub.f32 %v4767_v17, %v495_v13  ;;  %v497_v58 = vmul.f32 0.001953125, %v390_v43  ;;  %v5402_v20 = vsub.f32 %v4803_v27, %v5386_v47  ;;  %v395_v63 = vpop.xlane.xlu0 %394  ;;  %2452 = vmatpush1.bf16.xpose.msra.mxu1 %v4109_v41 }
  0xd7   : > { %720 = vadd.xlane.f32.xlu0 %v719_v26  ;;  %v723_v9 = vadd.f32 %v722_v30, %v623_v11  ;;  %v5406_v4 = vmul.f32 0.001953125, %v395_v63  ;;  %v727_v5 = vadd.f32 %v626_v60, %v625_v2  ;;  %v5409_v7 = vsub.f32 %v4772_v18, %v495_v13  ;;  %v4110_v26 = vld [vmem:[%s4690_s17 + $0x184] ss:$16 sps:$4 sm:$0xff]  }
  0xd8   : > { %v5412_v17 = vsub.f32 %v4785_v22, %v497_v58  ;;  %v628_v43 = vmul.f32 %v5389_v34, %v5389_v34  ;;  %v5417_v27 = vsub.f32 %v4809_v29, %v495_v13  ;;  %v629_v48 = vmul.f32 %v5384_v19, %v5384_v19  ;;  %v4112_v60 = vld [vmem:[%s4690_s17 + $0x384] ss:$16 sps:$4 sm:$0xff]   ;;  %2131 = vmatprep.subr.bf16.mxu0 %v4110_v26  ;;  %v4114_v26 = vld [vmem:[%s4690_s17 + $0x180] ss:$16 sps:$4 sm:$0xff]  }
  0xd9   : > { %7839 = vst [vmem:[#allocation66_spill] sm:$0xff] %v5409_v7  ;;  %v724_v11 = vadd.f32 %v723_v9, %v624_v21  ;;  %v5423_v30 = vsub.f32 %v4790_v23, %v497_v58  ;;  %v5427_v18 = vsub.f32 %v4815_v31, %v5386_v47  ;;  %v400_v22 = vpop.xlane.xlu1 %399  ;;  %v728_v2 = vadd.f32 %v727_v5, %v627_v1 }
  0xda   : > { %7840 = vst [vmem:[#allocation67_spill] sm:$0xff] %v5417_v27  ;;  %v499_v63 = vmul.f32 0.001953125, %v400_v22  ;;  %v5432_v29 = vsub.f32 %v4844_v39, %v5406_v4  ;;  %v405_v13 = vpop.xlane.xlu0 %404  ;;  %v630_v34 = vmul.f32 %v5398_v16, %v5398_v16  ;;  %v631_v23 = vmul.f32 %v5409_v7, %v5409_v7  ;;  %2453 = vmatprep.subr.bf16.mxu1 %v4112_v60  ;;  %v7861_v7 = vld [vmem:[#allocation19_spill] sm:$0xff] }
  0xdb   : > { %444 = vadd.xlane.f32.xlu0 %v5291_v61  ;;  %725 = vadd.xlane.f32.xlu1 %v724_v11  ;;  %v5441_v31 = vsub.f32 %v4849_v40, %v5406_v4  ;;  %v5443_v1 = vmul.f32 0.001953125, %v405_v13  ;;  %v632_v39 = vmul.f32 %v5417_v27, %v5417_v27  ;;  %v5448_v21 = vsub.f32 %v4796_v25, %v497_v58  ;;  %v4115_v11 = vld [vmem:[%s4690_s17 + $0x380] ss:$16 sps:$4 sm:$0xff]  }
  0xdc   : > { %v5450_v9 = vadd.f32 %v728_v2, %v628_v43  ;;  %v732_v6 = vadd.f32 %v630_v34, %v629_v48  ;;  %v5453_v61 = vsub.f32 %v4855_v42, %v497_v58  ;;  %v637_v40 = vmul.f32 %v5412_v17, %v5412_v17  ;;  %2132 = vmatpush1.bf16.xpose.msra.mxu0 %v4114_v26 }
  0xdd   : > { %7841 = vst [vmem:[#allocation68_spill] sm:$0xff] %v5448_v21  ;;  %v5458_v41 = vsub.f32 %v4828_v35, %v499_v63  ;;  %v5461_v5 = vsub.f32 %v4833_v36, %v499_v63  ;;  %v410_v25 = vpop.xlane.xlu1 %409  ;;  %v638_v43 = vmul.f32 %v5423_v30, %v5423_v30  ;;  %v639_v48 = vmul.f32 %v5448_v21, %v5448_v21 }
  0xde   : > { %7842 = vst [vmem:[#allocation69_spill] sm:$0xff] %v5453_v61  ;;  %v5467_v42 = vmul.f32 0.001953125, %v410_v25  ;;  %v5471_v34 = vsub.f32 %v4892_v53, %v5443_v1  ;;  %v733_v58 = vadd.f32 %v732_v6, %v631_v23  ;;  %v415_v35 = vpop.xlane.xlu0 %414  ;;  %v5475_v36 = vsub.f32 %v4820_v32, %v5386_v47  ;;  %2454 = vmatpush1.bf16.xpose.msra.mxu1 %v4115_v11  ;;  %v7848_v11 = vld [vmem:[#allocation9_spill] sm:$0xff] }
  0xdf   : > { %454 = vadd.xlane.f32.xlu0 %v5294_v44  ;;  %449 = vadd.xlane.f32.xlu1 %v5304_v59  ;;  %v5481_v22 = vmul.f32 0.001953125, %v415_v35  ;;  %v742_v2 = vadd.f32 %v638_v43, %v637_v40  ;;  %v5485_v60 = vsub.f32 %v4839_v38, %v5386_v47  ;;  %v633_v53 = vmul.f32 %v5402_v20, %v5402_v20  ;;  %v7845_v35 = vld [vmem:[#allocation6_spill] sm:$0xff] }
  0xe0   : > { %7843 = vst [vmem:[#allocation70_spill] sm:$0xff] %v5475_v36  ;;  %v5491_v32 = vsub.f32 %v4880_v49, %v5467_v42  ;;  %v5495_v13 = vsub.f32 %v4897_v54, %v5443_v1  ;;  %v640_v44 = vmul.f32 %v5453_v61, %v5453_v61  ;;  %v634_v59 = vmul.f32 %v5427_v18, %v5427_v18  ;;  %v7859_v61 = vld [vmem:[#allocation18_spill] sm:$0xff] }
  0xe1   : > { %7844 = vst [vmem:[#allocation71_spill] sm:$0xff] %v5485_v60  ;;  %v5503_v38 = vsub.f32 %v4885_v50, %v5467_v42  ;;  %v5505_v47 = vadd.f32 %v733_v58, %v632_v39  ;;  %v420_v23 = vpop.xlane.xlu1 %419  ;;  %v743_v6 = vadd.f32 %v742_v2, %v639_v48  ;;  %v635_v49 = vmul.f32 %v5475_v36, %v5475_v36  ;;  %v7847_v50 = vld [vmem:[#allocation13_spill] sm:$0xff] }
  0xe2   : > { %v5509_v40 = vmul.f32 0.001953125, %v420_v23  ;;  %v5513_v54 = vsub.f32 %v4921_v62, %v5481_v22  ;;  %v737_v25 = vadd.f32 %v634_v59, %v633_v53  ;;  %v425_v43 = vpop.xlane.xlu0 %424  ;;  %v5516_v21 = vsub.f32 %v7845_v35, %v499_v63  ;;  %v7852_v23 = vld [vmem:[#allocation12_spill] sm:$0xff] }
  0xe3   : > { %464 = vadd.xlane.f32.xlu0 %v5307_v24  ;;  %459 = vadd.xlane.f32.xlu1 %v5310_v10  ;;  %v5522_v39 = vsub.f32 %v7847_v50, %v5481_v22  ;;  %v636_v48 = vmul.f32 %v5485_v60, %v5485_v60  ;;  %v5526_v62 = vmul.f32 0.001953125, %v425_v43  ;;  %v645_v58 = vmul.f32 %v5458_v41, %v5458_v41  ;;  %v7850_v10 = vld [vmem:[#allocation11_spill] sm:$0xff]  ;;  %v7853_v50 = vld [vmem:[#allocation14_spill] sm:$0xff] }
  0xe4   : > { %7846 = vst [vmem:[#allocation6_spill] sm:$0xff] %v5516_v21  ;;  %v5530_v2 = vadd.f32 %v743_v6, %v640_v44  ;;  %v738_v26 = vadd.f32 %v737_v25, %v635_v49  ;;  %v5533_v53 = vsub.f32 %v7848_v11, %v499_v63  ;;  %v646_v24 = vmul.f32 %v5461_v5, %v5461_v5  ;;  %v7854_v49 = vld [vmem:[#allocation15_spill] sm:$0xff] }
  0xe5   : > { %v5539_v59 = vsub.f32 %v7850_v10, %v5509_v40  ;;  %v5543_v43 = vsub.f32 %v7852_v23, %v5509_v40  ;;  %v430_v35 = vpop.xlane.xlu1 %429  ;;  %v5547_v44 = vsub.f32 %v7853_v50, %v5526_v62  ;;  %v647_v63 = vmul.f32 %v5516_v21, %v5516_v21  ;;  %v7855_v10 = vld [vmem:[#allocation7_spill] sm:$0xff]  ;;  %v7857_v50 = vld [vmem:[#allocation8_spill] sm:$0xff] }
  0xe6   : > { %7849 = vst [vmem:[#allocation13_spill] sm:$0xff] %v5533_v53  ;;  %v5551_v6 = vmul.f32 0.001953125, %v430_v35  ;;  %v5555_v25 = vsub.f32 %v7854_v49, %v5526_v62  ;;  %v752_v11 = vadd.f32 %v646_v24, %v645_v58  ;;  %v5559_v23 = vsub.f32 %v7855_v10, %v5406_v4  ;;  %v435_v36 = vpop.xlane.xlu0 %434 }
  0xe7   : > { %7851 = vst [vmem:[#allocation9_spill] sm:$0xff] %v5539_v59  ;;  %474 = vadd.xlane.f32.xlu0 %v5313_v3  ;;  %469 = vadd.xlane.f32.xlu1 %v5330_v45  ;;  %v5565_v35 = vsub.f32 %v7857_v50, %v5406_v4  ;;  %v641_v49 = vmul.f32 %v5432_v29, %v5432_v29  ;;  %v5571_v24 = vmul.f32 0.001953125, %v435_v36  ;;  %v4116_v4 = vld [vmem:[%s4690_s17 + $0x1a4] ss:$16 sps:$4 sm:$0xff]  }
  0xe8   : > { %7856 = vst [vmem:[#allocation11_spill] sm:$0xff] %v5559_v23  ;;  %v642_v58 = vmul.f32 %v5441_v31, %v5441_v31  ;;  %v5573_v10 = vadd.f32 %v738_v26, %v636_v48  ;;  %v648_v3 = vmul.f32 %v5533_v53, %v5533_v53  ;;  %v753_v45 = vadd.f32 %v752_v11, %v647_v63  ;;  %v4118_v50 = vld [vmem:[%s4690_s17 + $0x3a4] ss:$16 sps:$4 sm:$0xff]   ;;  %v4120_v53 = vld [vmem:[%s4690_s17 + $0x1a0] ss:$16 sps:$4 sm:$0xff]  }
  0xe9   : > { %7858 = vst [vmem:[#allocation12_spill] sm:$0xff] %v5565_v35  ;;  %v643_v21 = vmul.f32 %v5559_v23, %v5559_v23  ;;  %v5583_v60 = vsub.f32 %v7859_v61, %v5551_v6  ;;  %v5587_v27 = vsub.f32 %v7861_v7, %v5551_v6  ;;  %v644_v36 = vmul.f32 %v5565_v35, %v5565_v35  ;;  %v440_v26 = vpop.xlane.xlu1 %439  ;;  %v4121_v63 = vld [vmem:[%s4690_s17 + $0x3a0] ss:$16 sps:$4 sm:$0xff]  }
  0xea   : > { %v747_v48 = vadd.f32 %v642_v58, %v641_v49  ;;  %v5593_v11 = vmul.f32 0.001953125, %v440_v26  ;;  %v7862_v23 = vld [vmem:[#allocation20_spill] sm:$0xff]  ;;  %v7864_v61 = vld [vmem:[#allocation10_spill] sm:$0xff]  ;;  %2133 = vmatprep.subr.bf16.mxu0 %v4116_v4  ;;  %2455 = vmatprep.subr.bf16.mxu1 %v4118_v50  ;;  %v7868_v49 = vld [vmem:[#allocation21_spill] sm:$0xff]  ;;  %v654_v26 = vmul.f32 %v5503_v38, %v5503_v38 }
  0xeb   : > { %7860 = vst [vmem:[#allocation14_spill] sm:$0xff] %v5583_v60  ;;  %v5597_v55 = vsub.f32 %v7862_v23, %v5571_v24  ;;  %v5601_v12 = vsub.f32 %v7864_v61, %v5467_v42  ;;  %v7866_v7 = vld [vmem:[#allocation16_spill] sm:$0xff]  ;;  %730 = vadd.xlane.f32.xlu0 %v5450_v9  ;;  %479 = vadd.xlane.f32.xlu1 %v5336_v0 }
  0xec   : > { %v5605_v57 = vsub.f32 %v7866_v7, %v5467_v42  ;;  %v5611_v58 = vsub.f32 %v7868_v49, %v5571_v24  ;;  %v653_v23 = vmul.f32 %v5491_v32, %v5491_v32  ;;  %v754_v61 = vadd.f32 %v753_v45, %v648_v3  ;;  %v7870_v42 = vld [vmem:[#allocation23_spill] sm:$0xff]  ;;  %2134 = vmatpush1.bf16.xpose.msra.mxu0 %v4120_v53  ;;  %v7872_v0 = vld [vmem:[#allocation24_spill] sm:$0xff] }
  0xed   : > { %7863 = vst [vmem:[#allocation15_spill] sm:$0xff] %v5597_v55  ;;  %7865 = vst [vmem:[#allocation7_spill] sm:$0xff] %v5601_v12  ;;  %v748_v35 = vadd.f32 %v747_v48, %v643_v21  ;;  %v5619_v4 = vsub.f32 %v7870_v42, %v5593_v11  ;;  %v655_v9 = vmul.f32 %v5601_v12, %v5601_v12  ;;  %v4480_v49 = vld [vmem:[%s7640_s0 + $0x110] sm:$0xff]  ;;  %v4481_v21 = vld [vmem:[%s7640_s0 + $0x118] sm:$0xff]  ;;  %2456 = vmatpush1.bf16.xpose.msra.mxu1 %v4121_v63 }
  0xee   : > { %7867 = vst [vmem:[#allocation8_spill] sm:$0xff] %v5605_v57  ;;  %7869 = vst [vmem:[#allocation18_spill] sm:$0xff] %v5611_v58  ;;  %v5625_v50 = vsub.f32 %v7872_v0, %v5593_v11  ;;  %v762_v7 = vadd.f32 %v654_v26, %v653_v23  ;;  %v5631_v3 = vsub.f32 %v4480_v49, %v5443_v1  ;;  %v7876_v26 = vld [vmem:[#allocation17_spill] sm:$0xff]  ;;  %v7878_v0 = vld [vmem:[#allocation22_spill] sm:$0xff] }
  0xef   : > { %7871 = vst [vmem:[#allocation19_spill] sm:$0xff] %v5619_v4  ;;  %v5637_v45 = vsub.f32 %v4481_v21, %v5443_v1  ;;  %v656_v53 = vmul.f32 %v5605_v57, %v5605_v57  ;;  %v649_v48 = vmul.f32 %v5471_v34, %v5471_v34  ;;  %v650_v23 = vmul.f32 %v5495_v13, %v5495_v13 }
  0xf0   : > { %7873 = vst [vmem:[#allocation20_spill] sm:$0xff] %v5625_v50  ;;  %7874 = vst [vmem:[#allocation10_spill] sm:$0xff] %v5631_v3  ;;  %v5647_v42 = vsub.f32 %v7876_v26, %v5509_v40  ;;  %489 = vadd.xlane.f32.xlu0 %v5373_v8  ;;  %735 = vadd.xlane.f32.xlu1 %v5505_v47  ;;  %v763_v1 = vadd.f32 %v762_v7, %v655_v9  ;;  %v4122_v47 = vld [vmem:[%s4690_s17 + $0x1c4] ss:$16 sps:$4 sm:$0xff]  }
  0xf1   : > { %7875 = vst [vmem:[#allocation16_spill] sm:$0xff] %v5637_v45  ;;  %v651_v63 = vmul.f32 %v5631_v3, %v5631_v3  ;;  %v5655_v49 = vsub.f32 %v7878_v0, %v5509_v40  ;;  %v757_v21 = vadd.f32 %v650_v23, %v649_v48  ;;  %v661_v12 = vmul.f32 %v5539_v59, %v5539_v59  ;;  %v4124_v9 = vld [vmem:[%s4690_s17 + $0x3c4] ss:$16 sps:$4 sm:$0xff]   ;;  %v4483_v23 = vld [vmem:[%s7640_s0 + $0x158] sm:$0xff]  ;;  %v4127_v59 = vld [vmem:[%s4690_s17 + $0x3c0] ss:$16 sps:$4 sm:$0xff]  }
  0xf2   : > { %7877 = vst [vmem:[#allocation21_spill] sm:$0xff] %v5647_v42  ;;  %v662_v26 = vmul.f32 %v5543_v43, %v5543_v43  ;;  %v663_v8 = vmul.f32 %v5647_v42, %v5647_v42  ;;  %v749_v7 = vadd.f32 %v748_v35, %v644_v36  ;;  %v652_v3 = vmul.f32 %v5637_v45, %v5637_v45  ;;  %v4482_v40 = vld [vmem:[%s7640_s0 + $0x150] sm:$0xff] }
  0xf3   : > { %7879 = vst [vmem:[#allocation23_spill] sm:$0xff] %v5655_v49  ;;  %v5671_v48 = vsub.f32 %v4482_v40, %v5481_v22  ;;  %v5677_v0 = vsub.f32 %v4483_v23, %v5481_v22  ;;  %v4126_v42 = vld [vmem:[%s4690_s17 + $0x1c0] ss:$16 sps:$4 sm:$0xff]   ;;  %v758_v57 = vadd.f32 %v757_v21, %v651_v63  ;;  %v657_v36 = vmul.f32 %v5513_v54, %v5513_v54 }
  0xf4   : > { %v772_v35 = vadd.f32 %v662_v26, %v661_v12  ;;  %v658_v45 = vmul.f32 %v5522_v39, %v5522_v39  ;;  %2135 = vmatprep.subr.bf16.mxu0 %v4122_v47  ;;  %745 = vadd.xlane.f32.xlu0 %v5530_v2  ;;  %v764_v40 = vadd.f32 %v763_v1, %v656_v53  ;;  %v4484_v12 = vld [vmem:[%s7640_s0 + $0x1b0] sm:$0xff]  ;;  %v7883_v2 = vld [vmem:[#allocation25_spill] sm:$0xff] }
  0xf5   : > { %7880 = vst [vmem:[#allocation24_spill] sm:$0xff] %v5671_v48  ;;  %7881 = vst [vmem:[#allocation17_spill] sm:$0xff] %v5677_v0  ;;  %740 = vadd.xlane.f32.xlu1 %v5573_v10  ;;  %v659_v22 = vmul.f32 %v5671_v48, %v5671_v48  ;;  %v5693_v63 = vsub.f32 %v4484_v12, %v5551_v6  ;;  %v664_v21 = vmul.f32 %v5655_v49, %v5655_v49  ;;  %v4485_v12 = vld [vmem:[%s7640_s0 + $0x190] sm:$0xff]  ;;  %v7912_v48 = vld [vmem:[#allocation43_spill] sm:$0xff] }
  0xf6   : > { %v773_v26 = vadd.f32 %v772_v35, %v663_v8  ;;  %v767_v47 = vadd.f32 %v658_v45, %v657_v36  ;;  %v5699_v23 = vsub.f32 %v7883_v2, %v5551_v6  ;;  %2457 = vmatprep.subr.bf16.mxu1 %v4124_v9  ;;  %v660_v10 = vmul.f32 %v5677_v0, %v5677_v0  ;;  %v4486_v35 = vld [vmem:[%s7640_s0 + $0x198] sm:$0xff] }
  0xf7   : > { %7882 = vst [vmem:[#allocation22_spill] sm:$0xff] %v5693_v63  ;;  %v669_v53 = vmul.f32 %v5583_v60, %v5583_v60  ;;  %v670_v1 = vmul.f32 %v5587_v27, %v5587_v27  ;;  %v5711_v45 = vsub.f32 %v4485_v12, %v5526_v62  ;;  %2136 = vmatpush1.bf16.xpose.msra.mxu0 %v4126_v42 }
  0xf8   : > { %7884 = vst [vmem:[#allocation25_spill] sm:$0xff] %v5699_v23  ;;  %v759_v6 = vadd.f32 %v758_v57, %v652_v3  ;;  %v768_v8 = vadd.f32 %v767_v47, %v659_v22  ;;  %v671_v9 = vmul.f32 %v5693_v63, %v5693_v63  ;;  %v5719_v36 = vsub.f32 %v4486_v35, %v5526_v62  ;;  %v4487_v62 = vld [vmem:[%s7640_s0 + $0x1f0] sm:$0xff]  ;;  %v7888_v35 = vld [vmem:[#allocation26_spill] sm:$0xff] }
  0xf9   : > { %7885 = vst [vmem:[#allocation72_spill] sm:$0xff] %v5711_v45  ;;  %2458 = vmatpush1.bf16.xpose.msra.mxu1 %v4127_v59  ;;  %755 = vadd.xlane.f32.xlu0 %v754_v61  ;;  %v782_v2 = vadd.f32 %v670_v1, %v669_v53  ;;  %v665_v57 = vmul.f32 %v5547_v44, %v5547_v44  ;;  %v4128_v61 = vld [vmem:[%s4690_s17 + $0x1e4] ss:$16 sps:$4 sm:$0xff]  }
  0xfa   : > { %7886 = vst [vmem:[#allocation73_spill] sm:$0xff] %v5719_v36  ;;  %750 = vadd.xlane.f32.xlu1 %v749_v7  ;;  %v666_v3 = vmul.f32 %v5555_v25, %v5555_v25  ;;  %v774_v42 = vadd.f32 %v773_v26, %v664_v21  ;;  %v672_v22 = vmul.f32 %v5699_v23, %v5699_v23  ;;  %v4130_v7 = vld [vmem:[%s4690_s17 + $0x3e4] ss:$16 sps:$4 sm:$0xff]  }
  0xfb   : > { %v667_v47 = vmul.f32 %v5711_v45, %v5711_v45  ;;  %v5733_v59 = vsub.f32 %v4487_v62, %v5593_v11  ;;  %v769_v53 = vadd.f32 %v768_v8, %v660_v10  ;;  %v668_v21 = vmul.f32 %v5719_v36, %v5719_v36  ;;  %v4488_v10 = vld [vmem:[%s7640_s0 + $0x1d0] sm:$0xff]  ;;  %2137 = vmatprep.subr.bf16.mxu0 %v4128_v61 }
  0xfc   : > { %v777_v26 = vadd.f32 %v666_v3, %v665_v57  ;;  %v677_v1 = vmul.f32 %v5619_v4, %v5619_v4  ;;  %v783_v12 = vadd.f32 %v782_v2, %v671_v9  ;;  %v5743_v63 = vsub.f32 %v7888_v35, %v5593_v11  ;;  %v4489_v11 = vld [vmem:[%s7640_s0 + $0x1d8] sm:$0xff]  ;;  %v4132_v3 = vld [vmem:[%s4690_s17 + $0x1e0] ss:$16 sps:$4 sm:$0xff]   ;;  %2459 = vmatprep.subr.bf16.mxu1 %v4130_v7 }
  0xfd   : > { %7887 = vst [vmem:[#allocation74_spill] sm:$0xff] %v5733_v59  ;;  %v678_v62 = vmul.f32 %v5625_v50, %v5625_v50  ;;  %v5751_v8 = vsub.f32 %v4488_v10, %v5571_v24  ;;  %765 = vadd.xlane.f32.xlu0 %v764_v40  ;;  %v679_v9 = vmul.f32 %v5733_v59, %v5733_v59  ;;  %v4133_v35 = vld [vmem:[%s4690_s17 + $0x3e0] ss:$16 sps:$4 sm:$0xff]  }
  0xfe   : > { %7889 = vst [vmem:[#allocation26_spill] sm:$0xff] %v5743_v63  ;;  %760 = vadd.xlane.f32.xlu1 %v759_v6  ;;  %v778_v57 = vadd.f32 %v777_v26, %v667_v47  ;;  %v5759_v2 = vsub.f32 %v4489_v11, %v5571_v24  ;;  %v673_v10 = vmul.f32 %v5597_v55, %v5597_v55 }
  0xff   : > { %7890 = vst [vmem:[#allocation75_spill] sm:$0xff] %v5751_v8  ;;  %v792_v45 = vadd.f32 %v678_v62, %v677_v1  ;;  %v674_v40 = vmul.f32 %v5611_v58, %v5611_v58  ;;  %v675_v6 = vmul.f32 %v5751_v8, %v5751_v8  ;;  %2138 = vmatpush1.bf16.xpose.msra.mxu0 %v4132_v3 }
 0x100   : > { %7891 = vst [vmem:[#allocation76_spill] sm:$0xff] %v5759_v2  ;;  %v784_v47 = vadd.f32 %v783_v12, %v672_v22  ;;  %v680_v24 = vmul.f32 %v5743_v63, %v5743_v63  ;;  %v779_v26 = vadd.f32 %v778_v57, %v668_v21  ;;  %v676_v62 = vmul.f32 %v5759_v2, %v5759_v2  ;;  %v4136_v22 = vld [vmem:[%s4690_s17 + $0xc] ss:$16 sps:$4 sm:$0xff]   ;;  %v5782_v57 = vld [vmem:[%s7641_s1] sm:$0xf] }
 0x101   : > { %v787_v61 = vadd.f32 %v674_v40, %v673_v10  ;;  %2460 = vmatpush1.bf16.xpose.msra.mxu1 %v4133_v35  ;;  %775 = vadd.xlane.f32.xlu0 %v774_v42  ;;  %v793_v1 = vadd.f32 %v792_v45, %v679_v9  ;;  %v4139_v12 = vld [vmem:[%s4690_s17 + $0x20c] ss:$16 sps:$4 sm:$0xff]   ;;  %v1023_v10 = vlaneseq  ;;  %v5787_v9 = vld [vmem:[%s7642_s2] sm:$0xf] }
 0x102   : > { %770 = vadd.xlane.f32.xlu1 %v769_v53  ;;  %2268 = vmatprep.subr.bf16.mxu0 %v4136_v22  ;;  %v7897_v22 = vld [vmem:[#allocation27_spill] sm:$0xff] }
 0x103   : > { %v788_v11 = vadd.f32 %v787_v61, %v675_v6  ;;  %v794_v7 = vadd.f32 %v793_v1, %v680_v24  ;;  %2590 = vmatprep.subr.bf16.mxu1 %v4139_v12  ;;  %v1024_v35 = vshrl.u32 %v1023_v10, 7  ;;  %v7899_v10 = vld [vmem:[#allocation28_spill] sm:$0xff] }
 0x105   : > { %785 = vadd.xlane.f32.xlu0 %v784_v47  ;;  %v789_v3 = vadd.f32 %v788_v11, %v676_v62  ;;  %v5775_v21 = vsub.s32 1, %v1024_v35  ;;  %v5777_v45 = vsub.s32 2, %v1024_v35  ;;  %v5789_v47 = vsub.s32 0, %v1024_v35 }
 0x106   : > { %780 = vadd.xlane.f32.xlu1 %v779_v26 }
 0x107   : > { %7892 = vst [vmem:[#allocation77_spill] sm:$0xff] %v5775_v21  ;;  %7893 = vst [vmem:[#allocation78_spill] sm:$0xff] %v5777_v45  ;;  %v5793_v1 = vrot.slane %v5782_v57, %v5775_v21  ;;  %v5797_v62 = vrot.slane %v5782_v57, %v5777_v45  ;;  %v5801_v11 = vrot.slane %v5787_v9, %v5775_v21 }
 0x108   : > { %7894 = vst [vmem:[#allocation79_spill] sm:$0xff] %v5789_v47  ;;  %v5821_v21 = vrot.slane %v5782_v57, %v5789_v47 }
 0x109   : > { %795 = vadd.xlane.f32.xlu0 %v794_v7  ;;  %7895 = vst [vmem:[#allocation80_spill] sm:$0xff] %v5797_v62  ;;  %v5805_v7 = vrot.slane %v5787_v9, %v5777_v45 }
 0x10a   : > { %790 = vadd.xlane.f32.xlu1 %v789_v3 }
 0x10b   : > { %7896 = vst [vmem:[#allocation81_spill] sm:$0xff] %v5805_v7 }
 0x164   : > { %v721_v42 = vpop.xlane.xlu0 %720 }
 0x165   : > { %v846_v53 = vmul.f32 0.001953125, %v721_v42 }
 0x167   : > { %v871_v24 = vadd.f32 1e-06, %v846_v53  ;;  %v7901_v53 = vld [vmem:[#allocation39_spill] sm:$0xff] }
 0x168   : > { %v726_v40 = vpop.xlane.xlu1 %725  ;;  %v445_v6 = vpop.xlane.xlu0 %444 }
 0x169   : > { %v847_v61 = vmul.f32 0.001953125, %v726_v40  ;;  %v508_v26 = vmul.f32 0.001953125, %v445_v6  ;;  %4230 = vrsqrt.f32 %v871_v24 }
 0x16b   : > { %v872_v3 = vadd.f32 1e-06, %v847_v61  ;;  %v5808_v12 = vsub.f32 %v7897_v22, %v508_v26  ;;  %v5811_v42 = vsub.f32 %v7899_v10, %v508_v26  ;;  %v5814_v40 = vsub.f32 %v7901_v53, %v508_v26 }
 0x16c   : > { %v450_v6 = vpop.xlane.xlu1 %449  ;;  %v455_v59 = vpop.xlane.xlu0 %454  ;;  %v5817_v8 = vsub.f32 %v5230_v46, %v508_v26  ;;  %v5825_v61 = vrot.slane %v5787_v9, %v5789_v47  ;;  %v5827_v22 = vsub.s32 3, %v1024_v35  ;;  %v7904_v47 = vld [vmem:[#allocation31_spill] sm:$0xff]  ;;  %v7906_v35 = vld [vmem:[#allocation32_spill] sm:$0xff] }
 0x16d   : > { %7898 = vst [vmem:[#allocation27_spill] sm:$0xff] %v5808_v12  ;;  %7900 = vst [vmem:[#allocation28_spill] sm:$0xff] %v5811_v42  ;;  %v509_v10 = vmul.f32 0.001953125, %v450_v6  ;;  %v510_v45 = vmul.f32 0.001953125, %v455_v59  ;;  %v681_v53 = vmul.f32 %v5808_v12, %v5808_v12  ;;  %4232 = vrsqrt.f32 %v872_v3  ;;  %v7908_v59 = vld [vmem:[#allocation29_spill] sm:$0xff]  ;;  %v7910_v12 = vld [vmem:[#allocation30_spill] sm:$0xff] }
 0x16e   : > { %7902 = vst [vmem:[#allocation39_spill] sm:$0xff] %v5814_v40  ;;  %7903 = vst [vmem:[#allocation82_spill] sm:$0xff] %v5817_v8  ;;  %v682_v46 = vmul.f32 %v5811_v42, %v5811_v42  ;;  %v683_v26 = vmul.f32 %v5814_v40, %v5814_v40  ;;  %v684_v63 = vmul.f32 %v5817_v8, %v5817_v8 }
 0x16f   : > { %v5838_v2 = vsub.f32 %v7904_v47, %v509_v10  ;;  %v5841_v24 = vsub.f32 %v7906_v35, %v509_v10  ;;  %v5844_v6 = vsub.f32 %v7908_v59, %v510_v45  ;;  %v5847_v3 = vsub.f32 %v7910_v12, %v510_v45  ;;  %v7915_v47 = vld [vmem:[#allocation40_spill] sm:$0xff] }
 0x170   : > { %v460_v23 = vpop.xlane.xlu1 %459  ;;  %v465_v42 = vpop.xlane.xlu0 %464  ;;  %v797_v36 = vadd.f32 %v682_v46, %v681_v53  ;;  %v5850_v40 = vsub.f32 %v7912_v48, %v509_v10  ;;  %v5853_v8 = vsub.f32 %v5257_v37, %v509_v10  ;;  %v5856_v49 = vsub.f32 %v7915_v47, %v510_v45  ;;  %v7918_v10 = vld [vmem:[#allocation35_spill] sm:$0xff]  ;;  %v7922_v47 = vld [vmem:[#allocation33_spill] sm:$0xff] }
 0x171   : > { %7905 = vst [vmem:[#allocation31_spill] sm:$0xff] %v5838_v2  ;;  %7907 = vst [vmem:[#allocation32_spill] sm:$0xff] %v5841_v24  ;;  %v511_v35 = vmul.f32 0.001953125, %v460_v23  ;;  %v512_v0 = vmul.f32 0.001953125, %v465_v42  ;;  %v685_v59 = vmul.f32 %v5838_v2, %v5838_v2  ;;  %v686_v12 = vmul.f32 %v5841_v24, %v5841_v24  ;;  %v7920_v23 = vld [vmem:[#allocation36_spill] sm:$0xff]  ;;  %v7924_v24 = vld [vmem:[#allocation34_spill] sm:$0xff] }
 0x172   : > { %7909 = vst [vmem:[#allocation29_spill] sm:$0xff] %v5844_v6  ;;  %7911 = vst [vmem:[#allocation30_spill] sm:$0xff] %v5847_v3  ;;  %v798_v7 = vadd.f32 %v797_v36, %v683_v26  ;;  %v687_v53 = vmul.f32 %v5850_v40, %v5850_v40  ;;  %v688_v48 = vmul.f32 %v5853_v8, %v5853_v8 }
 0x173   : > { %7913 = vst [vmem:[#allocation43_spill] sm:$0xff] %v5850_v40  ;;  %7914 = vst [vmem:[#allocation83_spill] sm:$0xff] %v5853_v8  ;;  %v5867_v37 = vsub.f32 %v5252_v14, %v510_v45  ;;  %v5870_v46 = vsub.f32 %v7918_v10, %v511_v35  ;;  %v5873_v42 = vsub.f32 %v7920_v23, %v511_v35 }
 0x174   : > { %7916 = vst [vmem:[#allocation40_spill] sm:$0xff] %v5856_v49  ;;  %v5876_v2 = vsub.f32 %v7922_v47, %v512_v0  ;;  %v5879_v36 = vsub.f32 %v7924_v24, %v512_v0  ;;  %v470_v26 = vpop.xlane.xlu1 %469  ;;  %v475_v40 = vpop.xlane.xlu0 %474  ;;  %v799_v62 = vadd.f32 %v798_v7, %v684_v63  ;;  %v802_v4 = vadd.f32 %v686_v12, %v685_v59  ;;  %v7926_v63 = vld [vmem:[#allocation49_spill] sm:$0xff] }
 0x175   : > { %7917 = vst [vmem:[#allocation84_spill] sm:$0xff] %v5867_v37  ;;  %7919 = vst [vmem:[#allocation35_spill] sm:$0xff] %v5870_v46  ;;  %v689_v14 = vmul.f32 %v5844_v6, %v5844_v6  ;;  %v690_v45 = vmul.f32 %v5847_v3, %v5847_v3  ;;  %v513_v10 = vmul.f32 0.001953125, %v470_v26  ;;  %v5885_v8 = vmul.f32 0.001953125, %v475_v40  ;;  %v5897_v12 = vpop.eup %4230  ;;  %v7929_v26 = vld [vmem:[#allocation41_spill] sm:$0xff]  ;;  %v7930_v6 = vld [vmem:[#allocation42_spill] sm:$0xff] }
 0x176   : > { %7921 = vst [vmem:[#allocation36_spill] sm:$0xff] %v5873_v42  ;;  %7923 = vst [vmem:[#allocation33_spill] sm:$0xff] %v5876_v2  ;;  %v691_v23 = vmul.f32 %v5856_v49, %v5856_v49  ;;  %v692_v24 = vmul.f32 %v5867_v37, %v5867_v37  ;;  %800 = vadd.xlane.f32.xlu1 %v799_v62  ;;  %v803_v47 = vadd.f32 %v802_v4, %v687_v53  ;;  %v7931_v49 = vld [vmem:[#allocation37_spill] sm:$0xff]  ;;  %v7933_v4 = vld [vmem:[#allocation38_spill] sm:$0xff] }
 0x177   : > { %7925 = vst [vmem:[#allocation34_spill] sm:$0xff] %v5879_v36  ;;  %v807_v55 = vadd.f32 %v690_v45, %v689_v14  ;;  %v5892_v7 = vsub.f32 %v7926_v63, %v511_v35  ;;  %v5895_v59 = vsub.f32 %v5276_v51, %v511_v35  ;;  %v5900_v40 = vsub.f32 %v7929_v26, %v513_v10  ;;  %v5913_v53 = vpop.eup %4232 }
 0x178   : > { %v5903_v3 = vsub.f32 %v7930_v6, %v513_v10  ;;  %v5907_v37 = vsub.f32 %v7931_v49, %v5885_v8  ;;  %v5911_v62 = vsub.f32 %v7933_v4, %v5885_v8  ;;  %v480_v51 = vpop.xlane.xlu1 %479  ;;  %v731_v35 = vpop.xlane.xlu0 %730  ;;  %v804_v14 = vadd.f32 %v803_v47, %v688_v48  ;;  %v7935_v48 = vld [vmem:[#allocation46_spill] sm:$0xff]  ;;  %v7938_v47 = vld [vmem:[#allocation44_spill] sm:$0xff] }
 0x179   : > { %7927 = vst [vmem:[#allocation49_spill] sm:$0xff] %v5892_v7  ;;  %7928 = vst [vmem:[#allocation85_spill] sm:$0xff] %v5895_v59  ;;  %v808_v45 = vadd.f32 %v807_v55, %v691_v23  ;;  %v693_v63 = vmul.f32 %v5870_v46, %v5870_v46  ;;  %v694_v6 = vmul.f32 %v5873_v42, %v5873_v42  ;;  %v5919_v26 = vmul.f32 0.001953125, %v480_v51 }
 0x17a   : > { %7932 = vst [vmem:[#allocation41_spill] sm:$0xff] %v5907_v37  ;;  %7934 = vst [vmem:[#allocation42_spill] sm:$0xff] %v5911_v62  ;;  %v848_v49 = vmul.f32 0.001953125, %v731_v35  ;;  %v695_v50 = vmul.f32 %v5892_v7, %v5892_v7  ;;  %v696_v4 = vmul.f32 %v5895_v59, %v5895_v59  ;;  %805 = vadd.xlane.f32.xlu0 %v804_v14  ;;  %v7940_v35 = vld [vmem:[#allocation45_spill] sm:$0xff] }
 0x17b   : > { %v809_v58 = vadd.f32 %v808_v45, %v692_v24  ;;  %v812_v60 = vadd.f32 %v694_v6, %v693_v63  ;;  %v5926_v55 = vsub.f32 %v7935_v48, %v512_v0  ;;  %v5929_v23 = vsub.f32 %v5271_v33, %v512_v0 }
 0x17c   : > { %v5933_v51 = vsub.f32 %v7938_v47, %v5919_v26  ;;  %v5937_v46 = vsub.f32 %v7940_v35, %v5919_v26  ;;  %v873_v7 = vadd.f32 1e-06, %v848_v49  ;;  %v697_v14 = vmul.f32 %v5876_v2, %v5876_v2  ;;  %v7942_v49 = vld [vmem:[#allocation59_spill] sm:$0xff] }
 0x17d   : > { %7936 = vst [vmem:[#allocation37_spill] sm:$0xff] %v5926_v55  ;;  %7937 = vst [vmem:[#allocation38_spill] sm:$0xff] %v5929_v23  ;;  %810 = vadd.xlane.f32.xlu1 %v809_v58  ;;  %v736_v24 = vpop.xlane.xlu1 %735  ;;  %v490_v45 = vpop.xlane.xlu0 %489  ;;  %v813_v63 = vadd.f32 %v812_v60, %v695_v50  ;;  %v698_v33 = vmul.f32 %v5879_v36, %v5879_v36  ;;  %v699_v0 = vmul.f32 %v5926_v55, %v5926_v55  ;;  %v7943_v50 = vld [vmem:[#allocation51_spill] sm:$0xff] }
 0x17e   : > { %7939 = vst [vmem:[#allocation46_spill] sm:$0xff] %v5933_v51  ;;  %7941 = vst [vmem:[#allocation44_spill] sm:$0xff] %v5937_v46  ;;  %v700_v6 = vmul.f32 %v5929_v23, %v5929_v23  ;;  %4234 = vrsqrt.f32 %v873_v7  ;;  %v849_v48 = vmul.f32 0.001953125, %v736_v24  ;;  %v5947_v47 = vmul.f32 0.001953125, %v490_v45  ;;  %v7945_v55 = vld [vmem:[#allocation47_spill] sm:$0xff]  ;;  %v7946_v7 = vld [vmem:[#allocation48_spill] sm:$0xff] }
 0x17f   : > { %v922_v35 = vmul.f32 %v5897_v12, %v7942_v49  ;;  %v814_v58 = vadd.f32 %v813_v63, %v696_v4  ;;  %v817_v2 = vadd.f32 %v698_v33, %v697_v14  ;;  %v926_v60 = vmul.f32 %v5913_v53, %v5363_v52  ;;  %v7947_v33 = vld [vmem:[#allocation55_spill] sm:$0xff] }
 0x180   : > { %v5954_v36 = vsub.f32 %v7943_v50, %v513_v10  ;;  %v874_v59 = vadd.f32 1e-06, %v849_v48  ;;  %v5958_v42 = vsub.f32 %v7945_v55, %v5947_v47  ;;  %v5962_v24 = vsub.f32 %v7946_v7, %v5947_v47 }
 0x181   : > { %v1044_v45 = vmul.f32 %v5793_v1, %v922_v35  ;;  %815 = vadd.xlane.f32.xlu0 %v814_v58  ;;  %v818_v4 = vadd.f32 %v817_v2, %v699_v0  ;;  %v1048_v63 = vmul.f32 %v5793_v1, %v926_v60  ;;  %v746_v52 = vpop.xlane.xlu0 %745  ;;  %v5967_v49 = vsub.f32 %v7947_v33, %v513_v10  ;;  %v7949_v33 = vld [vmem:[#allocation58_spill] sm:$0xff] }
 0x182   : > { %7944 = vst [vmem:[#allocation45_spill] sm:$0xff] %v5954_v36  ;;  %v741_v14 = vpop.xlane.xlu1 %740  ;;  %v701_v48 = vmul.f32 %v5900_v40, %v5900_v40  ;;  %4236 = vrsqrt.f32 %v874_v59  ;;  %v851_v7 = vmul.f32 0.001953125, %v746_v52  ;;  %v702_v2 = vmul.f32 %v5903_v3, %v5903_v3 }
 0x183   : > { %7948 = vst [vmem:[#allocation59_spill] sm:$0xff] %v5967_v49  ;;  %v850_v55 = vmul.f32 0.001953125, %v741_v14  ;;  %v1166_v50 = vadd.f32 %v5801_v11, %v1044_v45  ;;  %v819_v23 = vadd.f32 %v818_v4, %v700_v6  ;;  %v1170_v35 = vadd.f32 %v5801_v11, %v1048_v63  ;;  %v7950_v4 = vld [vmem:[#allocation50_spill] sm:$0xff] }
 0x184   : > { %v703_v0 = vmul.f32 %v5954_v36, %v5954_v36  ;;  %v876_v10 = vadd.f32 1e-06, %v851_v7  ;;  %v704_v60 = vmul.f32 %v5967_v49, %v5967_v49  ;;  %v921_v59 = vmul.f32 %v5897_v12, %v7949_v33  ;;  %v7952_v7 = vld [vmem:[#allocation54_spill] sm:$0xff] }
 0x185   : > { %v875_v58 = vadd.f32 1e-06, %v850_v55  ;;  %820 = vadd.xlane.f32.xlu1 %v819_v23  ;;  %v1266_v45 = vpack.c.bf16 %v1170_v35, %v1166_v50  ;;  %v822_v14 = vadd.f32 %v702_v2, %v701_v48  ;;  %v925_v6 = vmul.f32 %v5913_v53, %v5360_v28 }
 0x186   : > { %v5985_v63 = vsub.f32 %v7950_v4, %v5885_v8  ;;  %v756_v36 = vpop.xlane.xlu0 %755  ;;  %v1043_v55 = vmul.f32 %v5821_v21, %v921_v59  ;;  %v5990_v49 = vsub.f32 %v7952_v7, %v5885_v8  ;;  %v705_v23 = vmul.f32 %v5907_v37, %v5907_v37  ;;  %v7954_v7 = vld [vmem:[#allocation52_spill] sm:$0xff] }
 0x187   : > { %v751_v52 = vpop.xlane.xlu1 %750  ;;  %4238 = vrsqrt.f32 %v875_v58  ;;  %2139 = vmatprep.mubr.bf16.mxu0 %v1266_v45  ;;  %2461 = vmatprep.mubr.bf16.mxu1 %v1266_v45  ;;  %v823_v28 = vadd.f32 %v822_v14, %v703_v0  ;;  %v1047_v48 = vmul.f32 %v5821_v21, %v925_v6  ;;  %v706_v50 = vmul.f32 %v5911_v62, %v5911_v62 }
 0x188   : > { %7951 = vst [vmem:[#allocation51_spill] sm:$0xff] %v5985_v63  ;;  %7953 = vst [vmem:[#allocation47_spill] sm:$0xff] %v5990_v49  ;;  %4240 = vrsqrt.f32 %v876_v10  ;;  %v5997_v35 = vpop.eup %4234  ;;  %v1165_v2 = vadd.f32 %v5825_v61, %v1043_v55  ;;  %v707_v8 = vmul.f32 %v5985_v63, %v5985_v63  ;;  %v708_v58 = vmul.f32 %v5990_v49, %v5990_v49  ;;  %v7956_v55 = vld [vmem:[#allocation56_spill] sm:$0xff]  ;;  %v4145_v49 = vld [vmem:[%s4690_s17 + $0x22c] ss:$16 sps:$4 sm:$0xff]  }
 0x189   : > { %v852_v33 = vmul.f32 0.001953125, %v751_v52  ;;  %v824_v10 = vadd.f32 %v823_v28, %v704_v60  ;;  %v1169_v0 = vadd.f32 %v5825_v61, %v1047_v48  ;;  %v827_v59 = vadd.f32 %v706_v50, %v705_v23  ;;  %v4134_v52 = vld [vmem:[%s4690_s17 + $0x8] ss:$16 sps:$4 sm:$0xff]  }
 0x18a   : > { %v853_v45 = vmul.f32 0.001953125, %v756_v36  ;;  %v766_v6 = vpop.xlane.xlu0 %765  ;;  %v6007_v37 = vsub.f32 %v7954_v7, %v5919_v26  ;;  %v6011_v63 = vsub.f32 %v7956_v55, %v5919_v26  ;;  %v709_v60 = vmul.f32 %v5933_v51, %v5933_v51  ;;  %v4137_v28 = vld [vmem:[%s4690_s17 + $0x208] ss:$16 sps:$4 sm:$0xff]  }
 0x18b   : > { %v761_v14 = vpop.xlane.xlu1 %760  ;;  %v877_v4 = vadd.f32 1e-06, %v852_v33  ;;  %825 = vadd.xlane.f32.xlu0 %v824_v10  ;;  %v1265_v23 = vpack.c.bf16 %v1169_v0, %v1165_v2  ;;  %v828_v36 = vadd.f32 %v827_v59, %v707_v8  ;;  %v710_v50 = vmul.f32 %v5937_v46, %v5937_v46  ;;  %v4142_v33 = vld [vmem:[%s4690_s17 + $0x2c] ss:$16 sps:$4 sm:$0xff]  }
 0x18c   : > { %7955 = vst [vmem:[#allocation48_spill] sm:$0xff] %v6007_v37  ;;  %v878_v48 = vadd.f32 1e-06, %v853_v45  ;;  %v6020_v7 = vpop.eup %4236  ;;  %v711_v26 = vmul.f32 %v6007_v37, %v6007_v37  ;;  %v712_v55 = vmul.f32 %v6011_v63, %v6011_v63  ;;  %v854_v51 = vmul.f32 0.001953125, %v761_v14  ;;  %v7957_v46 = vld [vmem:[#allocation53_spill] sm:$0xff] }
 0x18d   : > { %4242 = vrsqrt.f32 %v877_v4  ;;  %2140 = vmatmul.mubr.bf16.vlgmr.msra.gmra.mrb[0].mxu0 %v1265_v23  ;;  %2462 = vmatmul.mubr.bf16.vlgmr.msra.gmra.mrb[0].mxu1 %v1265_v23  ;;  %v829_v2 = vadd.f32 %v828_v36, %v708_v58  ;;  %v832_v8 = vadd.f32 %v710_v50, %v709_v60  ;;  %v855_v10 = vmul.f32 0.001953125, %v766_v6  ;;  %v7959_v37 = vld [vmem:[#allocation57_spill] sm:$0xff] }
 0x18e   : > { %4244 = vrsqrt.f32 %v878_v48  ;;  %v776_v59 = vpop.xlane.xlu0 %775  ;;  %v879_v45 = vadd.f32 1e-06, %v854_v51  ;;  %v6029_v4 = vsub.f32 %v7957_v46, %v5947_v47  ;;  %v6033_v62 = vsub.f32 %v7959_v37, %v5947_v47  ;;  %2269 = vmatpush1.bf16.xpose.msra.mxu0 %v4134_v52  ;;  %2591 = vmatpush1.bf16.xpose.msra.mxu1 %v4137_v28 }
 0x18f   : > { %v771_v0 = vpop.xlane.xlu1 %770  ;;  %v713_v14 = vmul.f32 %v5958_v42, %v5958_v42  ;;  %830 = vadd.xlane.f32.xlu1 %v829_v2  ;;  %v833_v58 = vadd.f32 %v832_v8, %v711_v26  ;;  %v880_v60 = vadd.f32 1e-06, %v855_v10  ;;  %v714_v51 = vmul.f32 %v5962_v24, %v5962_v24  ;;  %2270 = vmatprep.subr.bf16.mxu0 %v4142_v33  ;;  %v4140_v33 = vld [vmem:[%s4690_s17 + $0x28] ss:$16 sps:$4 sm:$0xff]  }
 0x190   : > { %7958 = vst [vmem:[#allocation55_spill] sm:$0xff] %v6029_v4  ;;  %7960 = vst [vmem:[#allocation58_spill] sm:$0xff] %v6033_v62  ;;  %v856_v6 = vmul.f32 0.001953125, %v771_v0  ;;  %4246 = vrsqrt.f32 %v879_v45  ;;  %v715_v37 = vmul.f32 %v6029_v4, %v6029_v4  ;;  %v716_v47 = vmul.f32 %v6033_v62, %v6033_v62  ;;  %2592 = vmatprep.subr.bf16.mxu1 %v4145_v49  ;;  %v4143_v26 = vld [vmem:[%s4690_s17 + $0x228] ss:$16 sps:$4 sm:$0xff]  }
 0x191   : > { %v6039_v46 = vpop.eup %4238  ;;  %v837_v52 = vsel %vm481_vm0, %v713_v14, 0.0  ;;  %v834_v23 = vadd.f32 %v833_v58, %v712_v55  ;;  %4248 = vrsqrt.f32 %v880_v60  ;;  %v838_v36 = vsel %vm481_vm0, %v714_v51, 0.0  ;;  %v4148_v45 = vld [vmem:[%s4690_s17 + $0x4c] ss:$16 sps:$4 sm:$0xff]  }
 0x192   : > { %v6046_v28 = vpop.eup %4240  ;;  %v786_v50 = vpop.xlane.xlu0 %785  ;;  %v6053_v2 = vrot.slane %v5782_v57, %v5827_v22  ;;  %v839_v8 = vadd.f32 %v838_v36, %v837_v52  ;;  %v840_v10 = vsel %vm481_vm0, %v715_v37, 0.0  ;;  %v881_v0 = vadd.f32 1e-06, %v856_v6  ;;  %v4151_v51 = vld [vmem:[%s4690_s17 + $0x24c] ss:$16 sps:$4 sm:$0xff]  }
 0x193   : > { %v781_v48 = vpop.xlane.xlu1 %780  ;;  %v857_v49 = vmul.f32 0.001953125, %v776_v59  ;;  %835 = vadd.xlane.f32.xlu0 %v834_v23  ;;  %v842_v55 = vsel %vm481_vm0, %v716_v47, 0.0  ;;  %v859_v58 = vmul.f32 0.001953125, %v786_v50  ;;  %v930_v60 = vmul.f32 %v5997_v35, %v5353_v15 }
 0x194   : > { %v858_v14 = vmul.f32 0.001953125, %v781_v48  ;;  %v841_v4 = vadd.f32 %v840_v10, %v839_v8  ;;  %v934_v57 = vmul.f32 %v6020_v7, %v5398_v16  ;;  %v929_v37 = vmul.f32 %v5997_v35, %v5350_v56 }
 0x195   : > { %v882_v62 = vadd.f32 1e-06, %v857_v49  ;;  %v1052_v52 = vmul.f32 %v5793_v1, %v930_v60  ;;  %v933_v47 = vmul.f32 %v6020_v7, %v5384_v19  ;;  %v6070_v15 = vrot.slane %v5787_v9, %v5827_v22 }
 0x196   : > { %v883_v6 = vadd.f32 1e-06, %v858_v14  ;;  %v796_v23 = vpop.xlane.xlu0 %795  ;;  %v843_v48 = vadd.f32 %v842_v55, %v841_v4  ;;  %4250 = vrsqrt.f32 %v881_v0  ;;  %v1056_v50 = vmul.f32 %v5793_v1, %v934_v57  ;;  %2271 = vmatpush1.bf16.xpose.msra.mxu0 %v4140_v33  ;;  %2593 = vmatpush1.bf16.xpose.msra.mxu1 %v4143_v26 }
 0x197   : > { %v791_v59 = vpop.xlane.xlu1 %790  ;;  %v6072_v36 = vpop.eup %4242  ;;  %4252 = vrsqrt.f32 %v882_v62  ;;  %v884_v8 = vadd.f32 1e-06, %v859_v58  ;;  %v861_v10 = vmul.f32 0.001953125, %v796_v23  ;;  %v1051_v19 = vmul.f32 %v5821_v21, %v929_v37  ;;  %2272 = vmatprep.subr.bf16.mxu0 %v4148_v45  ;;  %2594 = vmatprep.subr.bf16.mxu1 %v4151_v51  ;;  %v4146_v37 = vld [vmem:[%s4690_s17 + $0x48] ss:$16 sps:$4 sm:$0xff]  }
 0x198   : > { %v860_v16 = vmul.f32 0.001953125, %v791_v59  ;;  %v6075_v56 = vpop.eup %4244  ;;  %844 = vadd.xlane.f32.xlu1 %v843_v48  ;;  %v1174_v49 = vadd.f32 %v5801_v11, %v1052_v52  ;;  %v1178_v4 = vadd.f32 %v5801_v11, %v1056_v50  ;;  %v1055_v0 = vmul.f32 %v5821_v21, %v933_v47  ;;  %v4149_v52 = vld [vmem:[%s4690_s17 + $0x248] ss:$16 sps:$4 sm:$0xff]  }
 0x199   : > { %4254 = vrsqrt.f32 %v883_v6  ;;  %v886_v33 = vadd.f32 1e-06, %v861_v10  ;;  %v938_v62 = vmul.f32 %v6039_v46, %v5427_v18  ;;  %v942_v26 = vmul.f32 %v6046_v28, %v5423_v30 }
 0x19a   : > { %v885_v9 = vadd.f32 1e-06, %v860_v16  ;;  %v6085_v55 = vpop.eup %4246  ;;  %v1270_v45 = vpack.c.bf16 %v1178_v4, %v1174_v49  ;;  %v1173_v14 = vadd.f32 %v5825_v61, %v1051_v19  ;;  %v1177_v58 = vadd.f32 %v5825_v61, %v1055_v0 }
 0x19b   : > { %v937_v60 = vmul.f32 %v6039_v46, %v5402_v20  ;;  %v6091_v51 = vpop.eup %4248  ;;  %4256 = vrsqrt.f32 %v884_v8  ;;  %v1060_v57 = vmul.f32 %v5793_v1, %v938_v62  ;;  %v1064_v18 = vmul.f32 %v5793_v1, %v942_v26  ;;  %v4154_v8 = vld [vmem:[%s4690_s17 + $0x6c] ss:$16 sps:$4 sm:$0xff]  }
 0x19c   : > { %v941_v30 = vmul.f32 %v6046_v28, %v5412_v17  ;;  %4258 = vrsqrt.f32 %v885_v9  ;;  %2149 = vmatprep.mubr.bf16.mxu0 %v1270_v45  ;;  %2471 = vmatprep.mubr.bf16.mxu1 %v1270_v45  ;;  %v1269_v6 = vpack.c.bf16 %v1177_v58, %v1173_v14  ;;  %v946_v20 = vmul.f32 %v6072_v36, %v5441_v31 }
 0x19d   : > { %v1059_v59 = vmul.f32 %v5821_v21, %v937_v60  ;;  %v1182_v23 = vadd.f32 %v5801_v11, %v1060_v57  ;;  %v1186_v47 = vadd.f32 %v5801_v11, %v1064_v18  ;;  %v950_v17 = vmul.f32 %v6075_v56, %v5461_v5  ;;  %v4157_v5 = vld [vmem:[%s4690_s17 + $0x26c] ss:$16 sps:$4 sm:$0xff]  }
 0x19e   : > { %v1063_v48 = vmul.f32 %v5821_v21, %v941_v30  ;;  %4260 = vrsqrt.f32 %v886_v33  ;;  %2150 = vmatmul.mubr.bf16.gmra.mrb[4].mxu0 %v1269_v6  ;;  %2472 = vmatmul.mubr.bf16.gmra.mrb[4].mxu1 %v1269_v6  ;;  %v1068_v50 = vmul.f32 %v5793_v1, %v946_v20  ;;  %v945_v31 = vmul.f32 %v6072_v36, %v5432_v29 }
 0x19f   : > { %v1181_v16 = vadd.f32 %v5825_v61, %v1059_v59  ;;  %v1274_v10 = vpack.c.bf16 %v1186_v47, %v1182_v23  ;;  %v1072_v9 = vmul.f32 %v5793_v1, %v950_v17  ;;  %v949_v49 = vmul.f32 %v6075_v56, %v5458_v41  ;;  %2273 = vmatpush1.bf16.xpose.msra.mxu0 %v4146_v37  ;;  %v4152_v23 = vld [vmem:[%s4690_s17 + $0x68] ss:$16 sps:$4 sm:$0xff]  }
 0x1a0   : > { %v1185_v19 = vadd.f32 %v5825_v61, %v1063_v48  ;;  %v6117_v4 = vpop.eup %4250  ;;  %v1190_v0 = vadd.f32 %v5801_v11, %v1068_v50  ;;  %v1067_v33 = vmul.f32 %v5821_v21, %v945_v31  ;;  %v954_v29 = vmul.f32 %v6085_v55, %v5495_v13  ;;  %2595 = vmatpush1.bf16.xpose.msra.mxu1 %v4149_v52 }
 0x1a1   : > { %v958_v62 = vmul.f32 %v6091_v51, %v5503_v38  ;;  %v6125_v26 = vpop.eup %4252  ;;  %2159 = vmatprep.mubr.bf16.mxu0 %v1274_v10  ;;  %2481 = vmatprep.mubr.bf16.mxu1 %v1274_v10  ;;  %v1194_v45 = vadd.f32 %v5801_v11, %v1072_v9  ;;  %v1071_v14 = vmul.f32 %v5821_v21, %v949_v49  ;;  %v4160_v10 = vld [vmem:[%s4690_s17 + $0x8c] ss:$16 sps:$4 sm:$0xff]  }
 0x1a2   : > { %v1273_v41 = vpack.c.bf16 %v1185_v19, %v1181_v16  ;;  %v1189_v58 = vadd.f32 %v5825_v61, %v1067_v33  ;;  %v1076_v60 = vmul.f32 %v5793_v1, %v954_v29  ;;  %v953_v38 = vmul.f32 %v6085_v55, %v5471_v34  ;;  %2274 = vmatprep.subr.bf16.mxu0 %v4154_v8  ;;  %v4155_v16 = vld [vmem:[%s4690_s17 + $0x268] ss:$16 sps:$4 sm:$0xff]  }
 0x1a3   : > { %v1080_v13 = vmul.f32 %v5793_v1, %v958_v62  ;;  %v6134_v57 = vpop.eup %4254  ;;  %v1278_v18 = vpack.c.bf16 %v1194_v45, %v1190_v0  ;;  %v1193_v30 = vadd.f32 %v5825_v61, %v1071_v14  ;;  %v957_v37 = vmul.f32 %v6091_v51, %v5491_v32  ;;  %2596 = vmatprep.subr.bf16.mxu1 %v4157_v5  ;;  %v7961_v49 = vld [vmem:[#allocation9_spill] sm:$0xff] }
 0x1a4   : > { %v962_v6 = vmul.f32 %v6117_v4, %v5522_v39  ;;  %v1198_v59 = vadd.f32 %v5801_v11, %v1076_v60  ;;  %v1075_v34 = vmul.f32 %v5821_v21, %v953_v38  ;;  %v966_v52 = vmul.f32 %v6125_v26, %v5543_v43  ;;  %v4163_v5 = vld [vmem:[%s4690_s17 + $0x28c] ss:$16 sps:$4 sm:$0xff]   ;;  %v7962_v60 = vld [vmem:[#allocation14_spill] sm:$0xff] }
 0x1a5   : > { %v1202_v20 = vadd.f32 %v5801_v11, %v1080_v13  ;;  %v6147_v47 = vpop.eup %4256  ;;  %v1277_v48 = vpack.c.bf16 %v1193_v30, %v1189_v58  ;;  %v1079_v32 = vmul.f32 %v5821_v21, %v957_v37  ;;  %v961_v17 = vmul.f32 %v6117_v4, %v5513_v54 }
 0x1a6   : > { %v1084_v39 = vmul.f32 %v5793_v1, %v962_v6  ;;  %v6154_v50 = vpop.eup %4258  ;;  %2160 = vmatmul.mubr.bf16.gmra.mrb[8].mxu0 %v1273_v41  ;;  %2482 = vmatmul.mubr.bf16.gmra.mrb[8].mxu1 %v1273_v41  ;;  %v1197_v43 = vadd.f32 %v5825_v61, %v1075_v34  ;;  %v1088_v8 = vmul.f32 %v5793_v1, %v966_v52  ;;  %v7963_v6 = vld [vmem:[#allocation18_spill] sm:$0xff]  ;;  %v7964_v52 = vld [vmem:[#allocation20_spill] sm:$0xff] }
 0x1a7   : > { %v1282_v31 = vpack.c.bf16 %v1202_v20, %v1198_v59  ;;  %2169 = vmatprep.mubr.bf16.mxu0 %v1278_v18  ;;  %2491 = vmatprep.mubr.bf16.mxu1 %v1278_v18  ;;  %v1201_v19 = vadd.f32 %v5825_v61, %v1079_v32  ;;  %v965_v54 = vmul.f32 %v6125_v26, %v7961_v49  ;;  %v7965_v32 = vld [vmem:[#allocation15_spill] sm:$0xff] }
 0x1a8   : > { %v1206_v9 = vadd.f32 %v5801_v11, %v1084_v39  ;;  %v6164_v0 = vpop.eup %4260  ;;  %v1210_v33 = vadd.f32 %v5801_v11, %v1088_v8  ;;  %v1083_v29 = vmul.f32 %v5821_v21, %v961_v17  ;;  %v970_v62 = vmul.f32 %v6134_v57, %v5555_v25  ;;  %2275 = vmatpush1.bf16.xpose.msra.mxu0 %v4152_v23  ;;  %v4158_v17 = vld [vmem:[%s4690_s17 + $0x88] ss:$16 sps:$4 sm:$0xff]  }
 0x1a9   : > { %v974_v41 = vmul.f32 %v6147_v47, %v5587_v27  ;;  %v6172_v45 = vpack.c.bf16 %v1201_v19, %v1197_v43  ;;  %v1087_v14 = vmul.f32 %v5821_v21, %v965_v54  ;;  %v969_v58 = vmul.f32 %v6134_v57, %v5547_v44  ;;  %2597 = vmatpush1.bf16.xpose.msra.mxu1 %v4155_v16  ;;  %v4161_v19 = vld [vmem:[%s4690_s17 + $0x288] ss:$16 sps:$4 sm:$0xff]  }
 0x1aa   : > { %v973_v13 = vmul.f32 %v6147_v47, %v7962_v60  ;;  %v6179_v38 = vpack.c.bf16 %v1210_v33, %v1206_v9  ;;  %v1205_v25 = vadd.f32 %v5825_v61, %v1083_v29  ;;  %v1092_v18 = vmul.f32 %v5793_v1, %v970_v62  ;;  %2276 = vmatprep.subr.bf16.mxu0 %v4160_v10  ;;  %v4166_v9 = vld [vmem:[%s4690_s17 + $0xac] ss:$16 sps:$4 sm:$0xff]  }
 0x1ab   : > { %v1096_v27 = vmul.f32 %v5793_v1, %v974_v41  ;;  %v1209_v30 = vadd.f32 %v5825_v61, %v1087_v14  ;;  %v1091_v44 = vmul.f32 %v5821_v21, %v969_v58  ;;  %v978_v59 = vmul.f32 %v6154_v50, %v7963_v6  ;;  %2598 = vmatprep.subr.bf16.mxu1 %v4163_v5  ;;  %v7966_v5 = vld [vmem:[#allocation19_spill] sm:$0xff]  ;;  %v7967_v60 = vld [vmem:[#allocation61_spill] sm:$0xff] }
 0x1ac   : > { %v1095_v37 = vmul.f32 %v5821_v21, %v973_v13  ;;  %v1214_v20 = vadd.f32 %v5801_v11, %v1092_v18  ;;  %v982_v23 = vmul.f32 %v6164_v0, %v7964_v52  ;;  %v977_v39 = vmul.f32 %v6154_v50, %v7965_v32  ;;  %v4169_v29 = vld [vmem:[%s4690_s17 + $0x2ac] ss:$16 sps:$4 sm:$0xff]   ;;  %v7971_v52 = vld [vmem:[#allocation80_spill] sm:$0xff] }
 0x1ad   : > { %v1218_v34 = vadd.f32 %v5801_v11, %v1096_v27  ;;  %v6196_v16 = vpack.c.bf16 %v1209_v30, %v1205_v25  ;;  %v1213_v43 = vadd.f32 %v5825_v61, %v1091_v44  ;;  %v1100_v10 = vmul.f32 %v5793_v1, %v978_v59  ;;  %v7968_v25 = vld [vmem:[#allocation64_spill] sm:$0xff]  ;;  %v7970_v44 = vld [vmem:[#allocation63_spill] sm:$0xff] }
 0x1ae   : > { %v1217_v8 = vadd.f32 %v5825_v61, %v1095_v37  ;;  %2170 = vmatmul.mubr.bf16.gmra.mrb[12].mxu0 %v1277_v48  ;;  %2492 = vmatmul.mubr.bf16.gmra.mrb[12].mxu1 %v1277_v48  ;;  %v1104_v54 = vmul.f32 %v5793_v1, %v982_v23  ;;  %v981_v33 = vmul.f32 %v6164_v0, %v7966_v5  ;;  %v7969_v27 = vld [vmem:[#allocation60_spill] sm:$0xff]  ;;  %v4167_v5 = vld [vmem:[%s4690_s17 + $0x2a8] ss:$16 sps:$4 sm:$0xff]  }
 0x1af   : > { %v6203_v49 = vpack.c.bf16 %v1218_v34, %v1214_v20  ;;  %2179 = vmatprep.mubr.bf16.mxu0 %v1282_v31  ;;  %2501 = vmatprep.mubr.bf16.mxu1 %v1282_v31  ;;  %v1222_v41 = vadd.f32 %v5801_v11, %v1100_v10  ;;  %v1099_v14 = vmul.f32 %v5821_v21, %v977_v39  ;;  %v7972_v39 = vld [vmem:[#allocation65_spill] sm:$0xff] }
 0x1b0   : > { %v6209_v62 = vpack.c.bf16 %v1217_v8, %v1213_v43  ;;  %v1226_v58 = vadd.f32 %v5801_v11, %v1104_v54  ;;  %v1103_v48 = vmul.f32 %v5821_v21, %v981_v33  ;;  %2277 = vmatpush1.bf16.xpose.msra.mxu0 %v4158_v17  ;;  %v924_v13 = vmul.f32 %v5897_v12, %v7967_v60  ;;  %v7973_v17 = vld [vmem:[#allocation67_spill] sm:$0xff] }
 0x1b1   : > { %v928_v18 = vmul.f32 %v5913_v53, %v7968_v25  ;;  %v1221_v31 = vadd.f32 %v5825_v61, %v1099_v14  ;;  %2599 = vmatpush1.bf16.xpose.msra.mxu1 %v4161_v19  ;;  %2278 = vmatprep.subr.bf16.mxu0 %v4166_v9  ;;  %v923_v30 = vmul.f32 %v5897_v12, %v7969_v27  ;;  %v4164_v8 = vld [vmem:[%s4690_s17 + $0xa8] ss:$16 sps:$4 sm:$0xff]   ;;  %v7974_v9 = vld [vmem:[#allocation62_spill] sm:$0xff]  ;;  %v4172_v33 = vld [vmem:[%s4690_s17 + $0xcc] ss:$16 sps:$4 sm:$0xff]  }
 0x1b2   : > { %v927_v37 = vmul.f32 %v5913_v53, %v7970_v44  ;;  %v6224_v6 = vpack.c.bf16 %v1226_v58, %v1222_v41  ;;  %v1225_v59 = vadd.f32 %v5825_v61, %v1103_v48  ;;  %2600 = vmatprep.subr.bf16.mxu1 %v4169_v29  ;;  %v1046_v20 = vmul.f32 %v6053_v2, %v924_v13  ;;  %v7975_v29 = vld [vmem:[#allocation81_spill] sm:$0xff]  ;;  %v7976_v25 = vld [vmem:[#allocation66_spill] sm:$0xff] }
 0x1b3   : > { %v1050_v34 = vmul.f32 %v6053_v2, %v928_v18  ;;  %v1045_v23 = vmul.f32 %v7971_v52, %v923_v30  ;;  %v932_v12 = vmul.f32 %v5997_v35, %v7972_v39  ;;  %v936_v53 = vmul.f32 %v6020_v7, %v7973_v17  ;;  %v4175_v60 = vld [vmem:[%s4690_s17 + $0x2cc] ss:$16 sps:$4 sm:$0xff]  }
 0x1b4   : > { %v1049_v32 = vmul.f32 %v7971_v52, %v927_v37  ;;  %v6235_v43 = vpack.c.bf16 %v1225_v59, %v1221_v31  ;;  %v1168_v10 = vadd.f32 %v6070_v15, %v1046_v20  ;;  %v931_v54 = vmul.f32 %v5997_v35, %v7974_v9  ;;  %v7977_v37 = vld [vmem:[#allocation71_spill] sm:$0xff]  ;;  %v7978_v59 = vld [vmem:[#allocation69_spill] sm:$0xff] }
 0x1b5   : > { %v1172_v19 = vadd.f32 %v6070_v15, %v1050_v34  ;;  %v1167_v41 = vadd.f32 %v7975_v29, %v1045_v23  ;;  %v1054_v58 = vmul.f32 %v6053_v2, %v932_v12  ;;  %v1058_v48 = vmul.f32 %v6053_v2, %v936_v53  ;;  %v7979_v34 = vld [vmem:[#allocation70_spill] sm:$0xff] }
 0x1b6   : > { %v1171_v14 = vadd.f32 %v7975_v29, %v1049_v32  ;;  %2180 = vmatmul.mubr.bf16.gmra.mrb[16].mxu0 %v6172_v45  ;;  %2502 = vmatmul.mubr.bf16.gmra.mrb[16].mxu1 %v6172_v45  ;;  %v935_v35 = vmul.f32 %v6020_v7, %v7976_v25  ;;  %v1053_v18 = vmul.f32 %v7971_v52, %v931_v54  ;;  %v7980_v32 = vld [vmem:[#allocation68_spill] sm:$0xff]  ;;  %v4178_v25 = vld [vmem:[%s4690_s17 + $0xec] ss:$16 sps:$4 sm:$0xff]  }
 0x1b7   : > { %v6251_v13 = vpack.c.bf16 %v1172_v19, %v1168_v10  ;;  %2189 = vmatprep.mubr.bf16.mxu0 %v6179_v38  ;;  %2511 = vmatprep.mubr.bf16.mxu1 %v6179_v38  ;;  %v1176_v27 = vadd.f32 %v6070_v15, %v1054_v58  ;;  %v1180_v30 = vadd.f32 %v6070_v15, %v1058_v48 }
 0x1b8   : > { %v6258_v31 = vpack.c.bf16 %v1171_v14, %v1167_v41  ;;  %2279 = vmatpush1.bf16.xpose.msra.mxu0 %v4164_v8  ;;  %v1057_v45 = vmul.f32 %v7971_v52, %v935_v35  ;;  %v1175_v44 = vadd.f32 %v7975_v29, %v1053_v18  ;;  %v940_v7 = vmul.f32 %v6039_v46, %v7977_v37  ;;  %v7981_v8 = vld [vmem:[#allocation12_spill] sm:$0xff] }
 0x1b9   : > { %v944_v20 = vmul.f32 %v6046_v28, %v7978_v59  ;;  %2601 = vmatpush1.bf16.xpose.msra.mxu1 %v4167_v5  ;;  %2280 = vmatprep.subr.bf16.mxu0 %v4172_v33  ;;  %v6268_v38 = vpack.c.bf16 %v1180_v30, %v1176_v27  ;;  %v939_v23 = vmul.f32 %v6039_v46, %v7979_v34  ;;  %v7982_v46 = vld [vmem:[#allocation13_spill] sm:$0xff]  ;;  %v7984_v30 = vld [vmem:[#allocation6_spill] sm:$0xff]  ;;  %v7985_v34 = vld [vmem:[#allocation16_spill] sm:$0xff] }
 0x1ba   : > { %v943_v39 = vmul.f32 %v6046_v28, %v7980_v32  ;;  %2602 = vmatprep.subr.bf16.mxu1 %v4175_v60  ;;  %v1179_v12 = vadd.f32 %v7975_v29, %v1057_v45  ;;  %v1062_v17 = vmul.f32 %v6053_v2, %v940_v7  ;;  %v948_v10 = vmul.f32 %v6072_v36, %v7981_v8  ;;  %v7983_v28 = vld [vmem:[#allocation11_spill] sm:$0xff]  ;;  %v7986_v32 = vld [vmem:[#allocation8_spill] sm:$0xff] }
 0x1bb   : > { %v1066_v53 = vmul.f32 %v6053_v2, %v944_v20  ;;  %v1061_v19 = vmul.f32 %v7971_v52, %v939_v23  ;;  %v952_v54 = vmul.f32 %v6075_v56, %v7982_v46  ;;  %v947_v5 = vmul.f32 %v6072_v36, %v7983_v28  ;;  %v4170_v33 = vld [vmem:[%s4690_s17 + $0xc8] ss:$16 sps:$4 sm:$0xff]   ;;  %v4181_v45 = vld [vmem:[%s4690_s17 + $0x2ec] ss:$16 sps:$4 sm:$0xff]  }
 0x1bc   : > { %v1065_v9 = vmul.f32 %v7971_v52, %v943_v39  ;;  %v6286_v41 = vpack.c.bf16 %v1179_v12, %v1175_v44  ;;  %v1184_v14 = vadd.f32 %v6070_v15, %v1062_v17  ;;  %v1070_v48 = vmul.f32 %v6053_v2, %v948_v10  ;;  %v4173_v60 = vld [vmem:[%s4690_s17 + $0x2c8] ss:$16 sps:$4 sm:$0xff]   ;;  %v7987_v12 = vld [vmem:[#allocation10_spill] sm:$0xff] }
 0x1bd   : > { %v1188_v58 = vadd.f32 %v6070_v15, %v1066_v53  ;;  %v1183_v35 = vadd.f32 %v7975_v29, %v1061_v19  ;;  %v1074_v27 = vmul.f32 %v6053_v2, %v952_v54  ;;  %v951_v36 = vmul.f32 %v6075_v56, %v7984_v30  ;;  %v7988_v8 = vld [vmem:[#allocation7_spill] sm:$0xff]  ;;  %v7989_v54 = vld [vmem:[#allocation17_spill] sm:$0xff] }
 0x1be   : > { %v1187_v18 = vadd.f32 %v7975_v29, %v1065_v9  ;;  %2190 = vmatmul.mubr.bf16.gmra.mrb[20].mxu0 %v6196_v16  ;;  %2512 = vmatmul.mubr.bf16.gmra.mrb[20].mxu1 %v6196_v16  ;;  %v1192_v37 = vadd.f32 %v6070_v15, %v1070_v48  ;;  %v1069_v7 = vmul.f32 %v7971_v52, %v947_v5  ;;  %v4176_v48 = vld [vmem:[%s4690_s17 + $0xe8] ss:$16 sps:$4 sm:$0xff]   ;;  %v4184_v30 = vld [vmem:[%s4690_s17 + $0x10c] ss:$16 sps:$4 sm:$0xff]  }
 0x1bf   : > { %v6301_v44 = vpack.c.bf16 %v1188_v58, %v1184_v14  ;;  %2199 = vmatprep.mubr.bf16.mxu0 %v6203_v49  ;;  %2521 = vmatprep.mubr.bf16.mxu1 %v6203_v49  ;;  %v1196_v20 = vadd.f32 %v6070_v15, %v1074_v27  ;;  %v1073_v56 = vmul.f32 %v7971_v52, %v951_v36  ;;  %v4179_v27 = vld [vmem:[%s4690_s17 + $0x2e8] ss:$16 sps:$4 sm:$0xff]  }
 0x1c0   : > { %v6307_v59 = vpack.c.bf16 %v1187_v18, %v1183_v35  ;;  %2281 = vmatpush1.bf16.xpose.msra.mxu0 %v4170_v33  ;;  %v1191_v16 = vadd.f32 %v7975_v29, %v1069_v7  ;;  %v956_v23 = vmul.f32 %v6085_v55, %v7985_v34  ;;  %v960_v39 = vmul.f32 %v6091_v51, %v7986_v32  ;;  %v7990_v33 = vld [vmem:[#allocation23_spill] sm:$0xff]  ;;  %v7993_v34 = vld [vmem:[#allocation73_spill] sm:$0xff] }
 0x1c1   : > { %v955_v17 = vmul.f32 %v6085_v55, %v7987_v12  ;;  %2603 = vmatpush1.bf16.xpose.msra.mxu1 %v4173_v60  ;;  %2282 = vmatprep.subr.bf16.mxu0 %v4178_v25  ;;  %v6318_v49 = vpack.c.bf16 %v1196_v20, %v1192_v37  ;;  %v1195_v53 = vadd.f32 %v7975_v29, %v1073_v56  ;;  %v7992_v37 = vld [vmem:[#allocation21_spill] sm:$0xff] }
 0x1c2   : > { %v959_v10 = vmul.f32 %v6091_v51, %v7988_v8  ;;  %2604 = vmatprep.subr.bf16.mxu1 %v4181_v45  ;;  %v1078_v19 = vmul.f32 %v6053_v2, %v956_v23  ;;  %v1082_v9 = vmul.f32 %v6053_v2, %v960_v39  ;;  %v964_v55 = vmul.f32 %v6117_v4, %v7989_v54  ;;  %v7991_v51 = vld [vmem:[#allocation24_spill] sm:$0xff]  ;;  %v4187_v20 = vld [vmem:[%s4690_s17 + $0x30c] ss:$16 sps:$4 sm:$0xff]  }
 0x1c3   : > { %v1077_v46 = vmul.f32 %v7971_v52, %v955_v17  ;;  %v6328_v28 = vpack.c.bf16 %v1195_v53, %v1191_v16  ;;  %v968_v14 = vmul.f32 %v6125_v26, %v7990_v33  ;;  %v963_v58 = vmul.f32 %v6117_v4, %v7991_v51  ;;  %v7994_v12 = vld [vmem:[#allocation25_spill] sm:$0xff]  ;;  %v7995_v8 = vld [vmem:[#allocation72_spill] sm:$0xff] }
 0x1c4   : > { %v1081_v5 = vmul.f32 %v7971_v52, %v959_v10  ;;  %v1200_v60 = vadd.f32 %v6070_v15, %v1078_v19  ;;  %v1204_v25 = vadd.f32 %v6070_v15, %v1082_v9  ;;  %v1086_v18 = vmul.f32 %v6053_v2, %v964_v55  ;;  %v7996_v9 = vld [vmem:[#allocation22_spill] sm:$0xff]  ;;  %v7997_v33 = vld [vmem:[#allocation76_spill] sm:$0xff] }
 0x1c5   : > { %v1199_v35 = vadd.f32 %v7975_v29, %v1077_v46  ;;  %v1090_v45 = vmul.f32 %v6053_v2, %v968_v14  ;;  %v967_v7 = vmul.f32 %v6125_v26, %v7992_v37  ;;  %v1085_v4 = vmul.f32 %v7971_v52, %v963_v58  ;;  %v7998_v58 = vld [vmem:[#allocation26_spill] sm:$0xff]  ;;  %v4190_v37 = vld [vmem:[%s4690_s17 + $0x12c] ss:$16 sps:$4 sm:$0xff]  }
 0x1c6   : > { %v1203_v36 = vadd.f32 %v7975_v29, %v1081_v5  ;;  %2200 = vmatmul.mubr.bf16.gmra.mrb[24].mxu0 %v6209_v62  ;;  %2522 = vmatmul.mubr.bf16.gmra.mrb[24].mxu1 %v6209_v62  ;;  %v6350_v56 = vpack.c.bf16 %v1204_v25, %v1200_v60  ;;  %v1208_v16 = vadd.f32 %v6070_v15, %v1086_v18  ;;  %v4182_v25 = vld [vmem:[%s4690_s17 + $0x108] ss:$16 sps:$4 sm:$0xff]  }
 0x1c7   : > { %v972_v23 = vmul.f32 %v6134_v57, %v7993_v34  ;;  %2209 = vmatprep.mubr.bf16.mxu0 %v6224_v6  ;;  %2531 = vmatprep.mubr.bf16.mxu1 %v6224_v6  ;;  %v1212_v26 = vadd.f32 %v6070_v15, %v1090_v45  ;;  %v1089_v39 = vmul.f32 %v7971_v52, %v967_v7  ;;  %v4185_v45 = vld [vmem:[%s4690_s17 + $0x308] ss:$16 sps:$4 sm:$0xff]  }
 0x1c8   : > { %v6357_v32 = vpack.c.bf16 %v1203_v36, %v1199_v35  ;;  %2283 = vmatpush1.bf16.xpose.msra.mxu0 %v4176_v48  ;;  %v1207_v62 = vadd.f32 %v7975_v29, %v1085_v4  ;;  %v976_v17 = vmul.f32 %v6147_v47, %v7994_v12  ;;  %v971_v10 = vmul.f32 %v6134_v57, %v7995_v8  ;;  %v4196_v8 = vld [vmem:[%s4690_s17 + $0x14c] ss:$16 sps:$4 sm:$0xff]  }
 0x1c9   : > { %v1094_v53 = vmul.f32 %v6053_v2, %v972_v23  ;;  %2605 = vmatpush1.bf16.xpose.msra.mxu1 %v4179_v27  ;;  %2284 = vmatprep.subr.bf16.mxu0 %v4184_v30  ;;  %v6367_v6 = vpack.c.bf16 %v1212_v26, %v1208_v16  ;;  %v1211_v19 = vadd.f32 %v7975_v29, %v1089_v39  ;;  %v8000_v30 = vld [vmem:[#allocation74_spill] sm:$0xff] }
 0x1ca   : > { %v975_v46 = vmul.f32 %v6147_v47, %v7996_v9  ;;  %2606 = vmatprep.subr.bf16.mxu1 %v4187_v20  ;;  %v1098_v54 = vmul.f32 %v6053_v2, %v976_v17  ;;  %v1093_v5 = vmul.f32 %v7971_v52, %v971_v10  ;;  %v980_v57 = vmul.f32 %v6154_v50, %v7997_v33  ;;  %v7999_v47 = vld [vmem:[#allocation75_spill] sm:$0xff] }
 0x1cb   : > { %v1216_v55 = vadd.f32 %v6070_v15, %v1094_v53  ;;  %v6377_v14 = vpack.c.bf16 %v1211_v19, %v1207_v62  ;;  %v984_v48 = vmul.f32 %v6164_v0, %v7998_v58  ;;  %v979_v60 = vmul.f32 %v6154_v50, %v7999_v47  ;;  %v4193_v50 = vld [vmem:[%s4690_s17 + $0x32c] ss:$16 sps:$4 sm:$0xff]   ;;  %v4188_v17 = vld [vmem:[%s4690_s17 + $0x128] ss:$16 sps:$4 sm:$0xff]  }
 0x1cc   : > { %v1097_v51 = vmul.f32 %v7971_v52, %v975_v46  ;;  %v1220_v35 = vadd.f32 %v6070_v15, %v1098_v54  ;;  %v1215_v18 = vadd.f32 %v7975_v29, %v1093_v5  ;;  %v1102_v27 = vmul.f32 %v6053_v2, %v980_v57  ;;  %v4191_v53 = vld [vmem:[%s4690_s17 + $0x328] ss:$16 sps:$4 sm:$0xff]   ;;  %v4199_v10 = vld [vmem:[%s4690_s17 + $0x34c] ss:$16 sps:$4 sm:$0xff]  }
 0x1cd   : > { %v983_v36 = vmul.f32 %v6164_v0, %v8000_v30  ;;  %v1106_v4 = vmul.f32 %v6053_v2, %v984_v48  ;;  %v1101_v20 = vmul.f32 %v7971_v52, %v979_v60  ;;  %v4194_v19 = vld [vmem:[%s4690_s17 + $0x148] ss:$16 sps:$4 sm:$0xff]   ;;  %v4202_v46 = vld [vmem:[%s4690_s17 + $0x16c] ss:$16 sps:$4 sm:$0xff]  }
 0x1ce   : > { %v1219_v7 = vadd.f32 %v7975_v29, %v1097_v51  ;;  %2210 = vmatmul.mubr.bf16.gmra.mrb[28].mxu0 %v6235_v43  ;;  %2532 = vmatmul.mubr.bf16.gmra.mrb[28].mxu1 %v6235_v43  ;;  %v6398_v16 = vpack.c.bf16 %v1220_v35, %v1216_v55  ;;  %v1224_v0 = vadd.f32 %v6070_v15, %v1102_v27  ;;  %v4197_v9 = vld [vmem:[%s4690_s17 + $0x348] ss:$16 sps:$4 sm:$0xff]   ;;  %v4205_v54 = vld [vmem:[%s4690_s17 + $0x36c] ss:$16 sps:$4 sm:$0xff]  }
 0x1cf   : > { %v1105_v34 = vmul.f32 %v7971_v52, %v983_v36  ;;  %v1228_v26 = vadd.f32 %v6070_v15, %v1106_v4  ;;  %v1223_v39 = vadd.f32 %v7975_v29, %v1101_v20  ;;  %v4200_v55 = vld [vmem:[%s4690_s17 + $0x168] ss:$16 sps:$4 sm:$0xff]   ;;  %v4208_v33 = vld [vmem:[%s4690_s17 + $0x18c] ss:$16 sps:$4 sm:$0xff]  }
 0x1d0   : > { %v6402_v23 = vpack.c.bf16 %v1219_v7, %v1215_v18  ;;  %2285 = vmatpush1.bf16.xpose.msra.mxu0 %v4182_v25  ;;  %v4203_v5 = vld [vmem:[%s4690_s17 + $0x368] ss:$16 sps:$4 sm:$0xff]   ;;  %v4211_v57 = vld [vmem:[%s4690_s17 + $0x38c] ss:$16 sps:$4 sm:$0xff]  }
 0x1d1   : > { %v1227_v43 = vadd.f32 %v7975_v29, %v1105_v34  ;;  %2607 = vmatpush1.bf16.xpose.msra.mxu1 %v4185_v45  ;;  %2286 = vmatprep.subr.bf16.mxu0 %v4190_v37  ;;  %v6407_v62 = vpack.c.bf16 %v1228_v26, %v1224_v0  ;;  %v4206_v51 = vld [vmem:[%s4690_s17 + $0x188] ss:$16 sps:$4 sm:$0xff]   ;;  %v4214_v48 = vld [vmem:[%s4690_s17 + $0x1ac] ss:$16 sps:$4 sm:$0xff]  }
 0x1d2   : > { %2608 = vmatprep.subr.bf16.mxu1 %v4193_v50  ;;  %v4209_v58 = vld [vmem:[%s4690_s17 + $0x388] ss:$16 sps:$4 sm:$0xff]   ;;  %v4217_v47 = vld [vmem:[%s4690_s17 + $0x3ac] ss:$16 sps:$4 sm:$0xff]  }
 0x1d3   : > { %v6409_v12 = vpack.c.bf16 %v1227_v43, %v1223_v39  ;;  %v4212_v60 = vld [vmem:[%s4690_s17 + $0x1a8] ss:$16 sps:$4 sm:$0xff]   ;;  %v4220_v35 = vld [vmem:[%s4690_s17 + $0x1cc] ss:$16 sps:$4 sm:$0xff]  }
 0x1d4   : > { %v4215_v25 = vld [vmem:[%s4690_s17 + $0x3a8] ss:$16 sps:$4 sm:$0xff]   ;;  %v4223_v18 = vld [vmem:[%s4690_s17 + $0x3cc] ss:$16 sps:$4 sm:$0xff]  }
 0x1d5   : > { %v4218_v27 = vld [vmem:[%s4690_s17 + $0x1c8] ss:$16 sps:$4 sm:$0xff]   ;;  %v4226_v36 = vld [vmem:[%s4690_s17 + $0x1ec] ss:$16 sps:$4 sm:$0xff]  }
 0x1d6   : > { %v4221_v30 = vld [vmem:[%s4690_s17 + $0x3c8] ss:$16 sps:$4 sm:$0xff]   ;;  %v4229_v45 = vld [vmem:[%s4690_s17 + $0x3ec] ss:$16 sps:$4 sm:$0xff]  }
 0x1d7   : > { %v4224_v7 = vld [vmem:[%s4690_s17 + $0x1e8] ss:$16 sps:$4 sm:$0xff]  }
 0x1d8   : > { %2287 = vmatpush1.bf16.xpose.msra.mxu0 %v4188_v17  ;;  %v4227_v20 = vld [vmem:[%s4690_s17 + $0x3e8] ss:$16 sps:$4 sm:$0xff]   ;;  %s3656_s17 = sshll.u32 %s4608_s22, 2 }
 0x1d9   : > { %2609 = vmatpush1.bf16.xpose.msra.mxu1 %v4191_v53  ;;  %2288 = vmatprep.subr.bf16.mxu0 %v4196_v8  ;;  %p256_p7 = scmp.lt.s32.totalorder %s3656_s17, 15 }
 0x1da   : > { %2610 = vmatprep.subr.bf16.mxu1 %v4199_v10 }
 0x1db   : > { %s8041_s17 = smov (!%p256_p7, %s3656_s17), 15 }
 0x1dc   : > { %s258_s18 = scalar_lea.vmem %s7644_s4, %s8041_s17 }
 0x1e0   : > { %2289 = vmatpush1.bf16.xpose.msra.mxu0 %v4194_v19 }
 0x1e1   : > { %2611 = vmatpush1.bf16.xpose.msra.mxu1 %v4197_v9  ;;  %2290 = vmatprep.subr.bf16.mxu0 %v4202_v46 }
 0x1e2   : > { %2612 = vmatprep.subr.bf16.mxu1 %v4205_v54  ;;  %v8001_v54 = vld [vmem:[#allocation28_spill] sm:$0xff] }
 0x1e8   : > { %2291 = vmatpush1.bf16.xpose.msra.mxu0 %v4200_v55 }
 0x1e9   : > { %2613 = vmatpush1.bf16.xpose.msra.mxu1 %v4203_v5  ;;  %2292 = vmatprep.subr.bf16.mxu0 %v4208_v33  ;;  %v8002_v5 = vld [vmem:[#allocation27_spill] sm:$0xff] }
 0x1ea   : > { %2614 = vmatprep.subr.bf16.mxu1 %v4211_v57  ;;  %v8003_v57 = vld [vmem:[#allocation82_spill] sm:$0xff] }
 0x1f0   : > { %2293 = vmatpush1.bf16.xpose.msra.mxu0 %v4206_v51 }
 0x1f1   : > { %2615 = vmatpush1.bf16.xpose.msra.mxu1 %v4209_v58  ;;  %2294 = vmatprep.subr.bf16.mxu0 %v4214_v48  ;;  %v8004_v58 = vld [vmem:[#allocation39_spill] sm:$0xff] }
 0x1f2   : > { %2616 = vmatprep.subr.bf16.mxu1 %v4217_v47 }
 0x1f8   : > { %2295 = vmatpush1.bf16.xpose.msra.mxu0 %v4212_v60 }
 0x1f9   : > { %2617 = vmatpush1.bf16.xpose.msra.mxu1 %v4215_v25  ;;  %2296 = vmatprep.subr.bf16.mxu0 %v4220_v35 }
 0x1fa   : > { %2618 = vmatprep.subr.bf16.mxu1 %v4223_v18 }
 0x200   : > { %2297 = vmatpush1.bf16.xpose.msra.mxu0 %v4218_v27 }
 0x201   : > { %2619 = vmatpush1.bf16.xpose.msra.mxu1 %v4221_v30  ;;  %2298 = vmatprep.subr.bf16.mxu0 %v4226_v36  ;;  %v8005_v30 = vld [vmem:[#allocation32_spill] sm:$0xff] }
 0x202   : > { %2620 = vmatprep.subr.bf16.mxu1 %v4229_v45 }
 0x203   : > { %v801_v37 = vpop.xlane.xlu1 %800 }
 0x204   : > { %v862_v4 = vmul.f32 0.001953125, %v801_v37  ;;  %v8006_v37 = vld [vmem:[#allocation31_spill] sm:$0xff] }
 0x206   : > { %v887_v50 = vadd.f32 1e-06, %v862_v4 }
 0x207   : > { %v806_v0 = vpop.xlane.xlu0 %805 }
 0x208   : > { %2299 = vmatpush1.bf16.xpose.msra.mxu0 %v4224_v7  ;;  %4262 = vrsqrt.f32 %v887_v50  ;;  %v863_v34 = vmul.f32 0.001953125, %v806_v0 }
 0x209   : > { %2621 = vmatpush1.bf16.xpose.msra.mxu1 %v4227_v20 }
 0x20a   : > { %v811_v26 = vpop.xlane.xlu1 %810  ;;  %v888_v43 = vadd.f32 1e-06, %v863_v34  ;;  %v8007_v34 = vld [vmem:[#allocation83_spill] sm:$0xff] }
 0x20b   : > { %v864_v39 = vmul.f32 0.001953125, %v811_v26 }
 0x20c   : > { %4264 = vrsqrt.f32 %v888_v43 }
 0x20d   : > { %v889_v17 = vadd.f32 1e-06, %v864_v39  ;;  %v8008_v39 = vld [vmem:[#allocation43_spill] sm:$0xff] }
 0x20e   : > { %v816_v53 = vpop.xlane.xlu0 %815 }
 0x20f   : > { %4266 = vrsqrt.f32 %v889_v17  ;;  %v865_v8 = vmul.f32 0.001953125, %v816_v53 }
 0x211   : > { %v890_v10 = vadd.f32 1e-06, %v865_v8  ;;  %v8009_v8 = vld [vmem:[#allocation30_spill] sm:$0xff] }
 0x212   : > { %v821_v19 = vpop.xlane.xlu1 %820  ;;  %v4263_v9 = vpop.eup %4262 }
 0x213   : > { %v866_v46 = vmul.f32 0.001953125, %v821_v19  ;;  %4268 = vrsqrt.f32 %v890_v10  ;;  %v986_v55 = vmul.f32 %v4263_v9, %v8001_v54  ;;  %v985_v33 = vmul.f32 %v4263_v9, %v8002_v5  ;;  %v8010_v19 = vld [vmem:[#allocation29_spill] sm:$0xff] }
 0x214   : > { %v988_v51 = vmul.f32 %v4263_v9, %v8003_v57  ;;  %v987_v48 = vmul.f32 %v4263_v9, %v8004_v58 }
 0x215   : > { %v891_v47 = vadd.f32 1e-06, %v866_v46  ;;  %v1108_v60 = vmul.f32 %v5793_v1, %v986_v55  ;;  %v1107_v25 = vmul.f32 %v5821_v21, %v985_v33 }
 0x216   : > { %v4265_v35 = vpop.eup %4264  ;;  %v1110_v18 = vmul.f32 %v6053_v2, %v988_v51  ;;  %v1109_v4 = vmul.f32 %v7971_v52, %v987_v48 }
 0x217   : > { %4270 = vrsqrt.f32 %v891_v47  ;;  %v990_v36 = vmul.f32 %v4265_v35, %v8005_v30  ;;  %v1230_v45 = vadd.f32 %v5801_v11, %v1108_v60  ;;  %v989_v7 = vmul.f32 %v4265_v35, %v8006_v37  ;;  %v8011_v30 = vld [vmem:[#allocation36_spill] sm:$0xff] }
 0x218   : > { %v826_v27 = vpop.xlane.xlu0 %825  ;;  %v1229_v0 = vadd.f32 %v5825_v61, %v1107_v25  ;;  %v992_v26 = vmul.f32 %v4265_v35, %v8007_v34  ;;  %v991_v43 = vmul.f32 %v4265_v35, %v8008_v39  ;;  %v1232_v55 = vadd.f32 %v6070_v15, %v1110_v18  ;;  %v8012_v34 = vld [vmem:[#allocation35_spill] sm:$0xff] }
 0x219   : > { %v4267_v20 = vpop.eup %4266  ;;  %v867_v50 = vmul.f32 0.001953125, %v826_v27  ;;  %v1112_v17 = vmul.f32 %v5793_v1, %v990_v36  ;;  %v1111_v53 = vmul.f32 %v5821_v21, %v989_v7  ;;  %v1231_v48 = vadd.f32 %v7975_v29, %v1109_v4 }
 0x21a   : > { %v994_v10 = vmul.f32 %v4267_v20, %v8009_v8  ;;  %v993_v9 = vmul.f32 %v4267_v20, %v8010_v19  ;;  %v1114_v54 = vmul.f32 %v6053_v2, %v992_v26  ;;  %v1113_v5 = vmul.f32 %v7971_v52, %v991_v43  ;;  %v8014_v19 = vld [vmem:[#allocation85_spill] sm:$0xff] }
 0x21b   : > { %v892_v46 = vadd.f32 1e-06, %v867_v50  ;;  %v1234_v57 = vadd.f32 %v5801_v11, %v1112_v17  ;;  %v1233_v51 = vadd.f32 %v5825_v61, %v1111_v53 }
 0x21c   : > { %v831_v33 = vpop.xlane.xlu1 %830  ;;  %v1116_v58 = vmul.f32 %v5793_v1, %v994_v10  ;;  %v1236_v25 = vadd.f32 %v6070_v15, %v1114_v54  ;;  %v1235_v35 = vadd.f32 %v7975_v29, %v1113_v5  ;;  %v1115_v37 = vmul.f32 %v5821_v21, %v993_v9  ;;  %v8015_v54 = vld [vmem:[#allocation34_spill] sm:$0xff]  ;;  %v8016_v5 = vld [vmem:[#allocation33_spill] sm:$0xff] }
 0x21d   : > { %v4269_v47 = vpop.eup %4268  ;;  %v868_v60 = vmul.f32 0.001953125, %v831_v33  ;;  %4272 = vrsqrt.f32 %v892_v46  ;;  %v1298_v27 = vpack.c.bf16 %v1234_v57, %v1230_v45  ;;  %v1297_v18 = vpack.c.bf16 %v1233_v51, %v1229_v0  ;;  %v8013_v45 = vld [vmem:[#allocation84_spill] sm:$0xff] }
 0x21e   : > { %v998_v36 = vmul.f32 %v4269_v47, %v8011_v30  ;;  %v1238_v50 = vadd.f32 %v5801_v11, %v1116_v58  ;;  %v997_v26 = vmul.f32 %v4269_v47, %v8012_v34  ;;  %v6468_v39 = vpack.c.bf16 %v1236_v25, %v1232_v55 }
 0x21f   : > { %v893_v7 = vadd.f32 1e-06, %v868_v60  ;;  %2219 = vmatprep.mubr.bf16.mxu0 %v1298_v27  ;;  %2541 = vmatprep.mubr.bf16.mxu1 %v1298_v27  ;;  %v6471_v17 = vpack.c.bf16 %v1235_v35, %v1231_v48  ;;  %v996_v0 = vmul.f32 %v4267_v20, %v8013_v45  ;;  %v1000_v9 = vmul.f32 %v4269_v47, %v8014_v19  ;;  %v8017_v60 = vld [vmem:[#allocation40_spill] sm:$0xff] }
 0x220   : > { %v836_v4 = vpop.xlane.xlu0 %835  ;;  %v1120_v43 = vmul.f32 %v5793_v1, %v998_v36  ;;  %2220 = vmatmul.mubr.bf16.gmra.mrb[32].mxu0 %v1297_v18  ;;  %2542 = vmatmul.mubr.bf16.gmra.mrb[32].mxu1 %v1297_v18  ;;  %v1119_v10 = vmul.f32 %v5821_v21, %v997_v26  ;;  %v995_v25 = vmul.f32 %v4267_v20, %v8017_v60  ;;  %v8018_v26 = vld [vmem:[#allocation49_spill] sm:$0xff] }
 0x221   : > { %v4271_v53 = vpop.eup %4270  ;;  %4274 = vrsqrt.f32 %v893_v7  ;;  %v869_v8 = vmul.f32 0.001953125, %v836_v4  ;;  %v1118_v57 = vmul.f32 %v6053_v2, %v996_v0  ;;  %v1122_v48 = vmul.f32 %v6053_v2, %v1000_v9  ;;  %v8020_v9 = vld [vmem:[#allocation37_spill] sm:$0xff] }
 0x222   : > { %v1242_v46 = vadd.f32 %v5801_v11, %v1120_v43  ;;  %v1002_v55 = vmul.f32 %v4271_v53, %v8015_v54  ;;  %v1001_v33 = vmul.f32 %v4271_v53, %v8016_v5  ;;  %v1241_v58 = vadd.f32 %v5825_v61, %v1119_v10  ;;  %v8019_v10 = vld [vmem:[#allocation38_spill] sm:$0xff]  ;;  %v8022_v60 = vld [vmem:[#allocation45_spill] sm:$0xff] }
 0x223   : > { %v894_v51 = vadd.f32 1e-06, %v869_v8  ;;  %v1237_v27 = vadd.f32 %v5825_v61, %v1115_v37  ;;  %v1240_v7 = vadd.f32 %v6070_v15, %v1118_v57  ;;  %v1244_v34 = vadd.f32 %v6070_v15, %v1122_v48  ;;  %v8021_v57 = vld [vmem:[#allocation59_spill] sm:$0xff] }
 0x224   : > { %v1302_v35 = vpack.c.bf16 %v1242_v46, %v1238_v50  ;;  %v1124_v18 = vmul.f32 %v5793_v1, %v1002_v55  ;;  %v1123_v30 = vmul.f32 %v5821_v21, %v1001_v33  ;;  %v999_v4 = vmul.f32 %v4269_v47, %v8018_v26 }
 0x225   : > { %4276 = vrsqrt.f32 %v894_v51  ;;  %v845_v36 = vpop.xlane.xlu1 %844  ;;  %v1301_v45 = vpack.c.bf16 %v1241_v58, %v1237_v27  ;;  %v1117_v37 = vmul.f32 %v7971_v52, %v995_v25  ;;  %v6491_v0 = vpack.c.bf16 %v1244_v34, %v1240_v7  ;;  %v8023_v34 = vld [vmem:[#allocation42_spill] sm:$0xff] }
 0x226   : > { %v870_v43 = vmul.f32 0.001953125, %v845_v36  ;;  %2229 = vmatprep.mubr.bf16.mxu0 %v1302_v35  ;;  %2551 = vmatprep.mubr.bf16.mxu1 %v1302_v35  ;;  %v1246_v20 = vadd.f32 %v5801_v11, %v1124_v18  ;;  %v1121_v8 = vmul.f32 %v7971_v52, %v999_v4  ;;  %v1004_v19 = vmul.f32 %v4271_v53, %v8019_v10  ;;  %v8024_v4 = vld [vmem:[#allocation41_spill] sm:$0xff] }
 0x227   : > { %v4273_v50 = vpop.eup %4272  ;;  %v1003_v46 = vmul.f32 %v4271_v53, %v8020_v9  ;;  %v1239_v5 = vadd.f32 %v7975_v29, %v1117_v37 }
 0x228   : > { %v895_v54 = vadd.f32 1e-06, %v870_v43  ;;  %v1006_v47 = vmul.f32 %v4273_v50, %v5903_v3  ;;  %v1005_v55 = vmul.f32 %v4273_v50, %v5900_v40  ;;  %2230 = vmatmul.mubr.bf16.gmra.mrb[36].mxu0 %v1301_v45  ;;  %2552 = vmatmul.mubr.bf16.gmra.mrb[36].mxu1 %v1301_v45  ;;  %v1243_v33 = vadd.f32 %v7975_v29, %v1121_v8 }
 0x229   : > { %v1008_v51 = vmul.f32 %v4273_v50, %v8021_v57  ;;  %v1126_v58 = vmul.f32 %v6053_v2, %v1004_v19  ;;  %v1007_v25 = vmul.f32 %v4273_v50, %v8022_v60  ;;  %v1245_v40 = vadd.f32 %v5825_v61, %v1123_v30  ;;  %v8025_v50 = vld [vmem:[#allocation47_spill] sm:$0xff]  ;;  %v8027_v57 = vld [vmem:[#allocation44_spill] sm:$0xff] }
 0x22a   : > { %4278 = vrsqrt.f32 %v895_v54  ;;  %v1128_v48 = vmul.f32 %v5793_v1, %v1006_v47  ;;  %v1127_v53 = vmul.f32 %v5821_v21, %v1005_v55  ;;  %v6506_v35 = vpack.c.bf16 %v1243_v33, %v1239_v5  ;;  %v8026_v5 = vld [vmem:[#allocation51_spill] sm:$0xff] }
 0x22b   : > { %v4275_v3 = vpop.eup %4274  ;;  %v1130_v27 = vmul.f32 %v6053_v2, %v1008_v51  ;;  %v1125_v18 = vmul.f32 %v7971_v52, %v1003_v46  ;;  %v1248_v45 = vadd.f32 %v6070_v15, %v1126_v58  ;;  %v1129_v30 = vmul.f32 %v7971_v52, %v1007_v25  ;;  %v8028_v58 = vld [vmem:[#allocation46_spill] sm:$0xff] }
 0x22c   : > { %v1250_v36 = vadd.f32 %v5801_v11, %v1128_v48  ;;  %v1249_v7 = vadd.f32 %v5825_v61, %v1127_v53  ;;  %v1010_v26 = vmul.f32 %v4275_v3, %v8023_v34  ;;  %v1009_v43 = vmul.f32 %v4275_v3, %v8024_v4 }
 0x22d   : > { %v1252_v37 = vadd.f32 %v6070_v15, %v1130_v27  ;;  %v1012_v8 = vmul.f32 %v4275_v3, %v8025_v50  ;;  %v1247_v9 = vadd.f32 %v7975_v29, %v1125_v18  ;;  %v1251_v55 = vadd.f32 %v7975_v29, %v1129_v30  ;;  %v8029_v27 = vld [vmem:[#allocation48_spill] sm:$0xff] }
 0x22e   : > { %v1306_v10 = vpack.c.bf16 %v1250_v36, %v1246_v20  ;;  %v1305_v19 = vpack.c.bf16 %v1249_v7, %v1245_v40  ;;  %v1132_v54 = vmul.f32 %v5793_v1, %v1010_v26  ;;  %v1011_v33 = vmul.f32 %v4275_v3, %v8026_v5 }
 0x22f   : > { %v4277_v46 = vpop.eup %4276  ;;  %v6520_v47 = vpack.c.bf16 %v1252_v37, %v1248_v45  ;;  %v1131_v20 = vmul.f32 %v5821_v21, %v1009_v43  ;;  %v6527_v53 = vpack.c.bf16 %v1251_v55, %v1247_v9  ;;  %v1134_v25 = vmul.f32 %v6053_v2, %v1012_v8 }
 0x230   : > { %2239 = vmatprep.mubr.bf16.mxu0 %v1306_v10  ;;  %2561 = vmatprep.mubr.bf16.mxu1 %v1306_v10  ;;  %v1014_v51 = vmul.f32 %v4277_v46, %v8027_v57  ;;  %v1013_v48 = vmul.f32 %v4277_v46, %v8028_v58  ;;  %v1016_v60 = vmul.f32 %v4277_v46, %v6011_v63 }
 0x231   : > { %2240 = vmatmul.mubr.bf16.gmra.mrb[40].mxu0 %v1305_v19  ;;  %2562 = vmatmul.mubr.bf16.gmra.mrb[40].mxu1 %v1305_v19  ;;  %v1015_v18 = vmul.f32 %v4277_v46, %v8029_v27  ;;  %v1254_v36 = vadd.f32 %v5801_v11, %v1132_v54  ;;  %v1133_v34 = vmul.f32 %v7971_v52, %v1011_v33 }
 0x232   : > { %v1136_v40 = vmul.f32 %v5793_v1, %v1014_v51  ;;  %v1135_v3 = vmul.f32 %v5821_v21, %v1013_v48  ;;  %v1138_v7 = vmul.f32 %v6053_v2, %v1016_v60  ;;  %v1253_v63 = vadd.f32 %v5825_v61, %v1131_v20 }
 0x233   : > { %v1137_v45 = vmul.f32 %v7971_v52, %v1015_v18  ;;  %v1256_v50 = vadd.f32 %v6070_v15, %v1134_v25  ;;  %v1255_v19 = vadd.f32 %v7975_v29, %v1133_v34 }
 0x234   : > { %v6537_v26 = vpop.eup %4278  ;;  %v1258_v4 = vadd.f32 %v5801_v11, %v1136_v40  ;;  %v1257_v43 = vadd.f32 %v5825_v61, %v1135_v3  ;;  %v1260_v8 = vadd.f32 %v6070_v15, %v1138_v7 }
 0x235   : > { %v1018_v37 = vmul.f32 %v6537_v26, %v5962_v24  ;;  %v1017_v30 = vmul.f32 %v6537_v26, %v5958_v42  ;;  %v1259_v9 = vadd.f32 %v7975_v29, %v1137_v45 }
 0x236   : > { %v1310_v10 = vpack.c.bf16 %v1258_v4, %v1254_v36  ;;  %v1309_v46 = vpack.c.bf16 %v1257_v43, %v1253_v63  ;;  %v1312_v5 = vpack.c.bf16 %v1260_v8, %v1256_v50 }
 0x237   : > { %v1140_v54 = vmul.f32 %v5793_v1, %v1018_v37  ;;  %v1139_v55 = vmul.f32 %v5821_v21, %v1017_v30  ;;  %v6553_v24 = vpack.c.bf16 %v1259_v9, %v1255_v19  ;;  %v8030_v21 = vld [vmem:[#allocation58_spill] sm:$0xff] }
 0x238   : > { %2249 = vmatprep.mubr.bf16.mxu0 %v1310_v10  ;;  %2571 = vmatprep.mubr.bf16.mxu1 %v1310_v10  ;;  %v1020_v1 = vmul.f32 %v6537_v26, %v8030_v21 }
 0x239   : > { %2250 = vmatmul.mubr.bf16.gmra.mrb[44].mxu0 %v1309_v46  ;;  %2572 = vmatmul.mubr.bf16.gmra.mrb[44].mxu1 %v1309_v46  ;;  %v1262_v42 = vadd.f32 %v5801_v11, %v1140_v54  ;;  %v1261_v57 = vadd.f32 %v5825_v61, %v1139_v55  ;;  %v8031_v61 = vld [vmem:[#allocation55_spill] sm:$0xff] }
 0x23a   : > { %v1142_v11 = vmul.f32 %v6053_v2, %v1020_v1 }
 0x23b   : > { %v1314_v33 = vpack.c.bf16 %v1262_v42, %v1262_v42  ;;  %v1313_v51 = vpack.c.bf16 %v1261_v57, %v1261_v57 }
 0x23d   : > { %2259 = vmatprep.mubr.bf16.mxu0 %v1314_v33  ;;  %2581 = vmatprep.mubr.bf16.mxu1 %v1314_v33 }
 0x241   : > { %2260 = vmatmul.mubr.bf16.gmra.mrb[48].mxu0 %v1313_v51  ;;  %2582 = vmatmul.mubr.bf16.gmra.mrb[48].mxu1 %v1313_v51 }
 0x242   : > { %2300 = vmatprep.mubr.bf16.mxu0 %v6251_v13  ;;  %2622 = vmatprep.mubr.bf16.mxu1 %v6251_v13  ;;  %v1019_v13 = vmul.f32 %v6537_v26, %v8031_v61 }
 0x249   : > { %2301 = vmatmul.mubr.bf16.vlgmr.msra.gmra.mrb[0].mxu0 %v6258_v31  ;;  %2623 = vmatmul.mubr.bf16.vlgmr.msra.gmra.mrb[0].mxu1 %v6258_v31  ;;  %v1264_v31 = vadd.f32 %v6070_v15, %v1142_v11  ;;  %v1445_v15 = vld [vmem:[%s258_s18] sm:$0xf] }
 0x24a   : > { %2310 = vmatprep.mubr.bf16.mxu0 %v6268_v38  ;;  %2632 = vmatprep.mubr.bf16.mxu1 %v6268_v38  ;;  %v1141_v38 = vmul.f32 %v7971_v52, %v1019_v13  ;;  %v8032_v52 = vld [vmem:[#allocation79_spill] sm:$0xff] }
 0x24c   : > { %v1263_v2 = vadd.f32 %v7975_v29, %v1141_v38  ;;  %v6625_v29 = vrot.slane %v1445_v15, %v5827_v22 }
 0x251   : > { %2311 = vmatmul.mubr.bf16.gmra.mrb[4].mxu0 %v6286_v41  ;;  %2633 = vmatmul.mubr.bf16.gmra.mrb[4].mxu1 %v6286_v41  ;;  %v1316_v41 = vpack.c.bf16 %v1264_v31, %v1264_v31 }
 0x252   : > { %2320 = vmatprep.mubr.bf16.mxu0 %v6301_v44  ;;  %2642 = vmatprep.mubr.bf16.mxu1 %v6301_v44  ;;  %v1315_v44 = vpack.c.bf16 %v1263_v2, %v1263_v2 }
 0x259   : > { %2321 = vmatmul.mubr.bf16.gmra.mrb[8].mxu0 %v6307_v59  ;;  %2643 = vmatmul.mubr.bf16.gmra.mrb[8].mxu1 %v6307_v59  ;;  %v6616_v59 = vrot.slane %v1445_v15, %v8032_v52 }
 0x25a   : > { %2330 = vmatprep.mubr.bf16.mxu0 %v6318_v49  ;;  %2652 = vmatprep.mubr.bf16.mxu1 %v6318_v49  ;;  %v8033_v49 = vld [vmem:[#allocation78_spill] sm:$0xff] }
 0x261   : > { %2331 = vmatmul.mubr.bf16.gmra.mrb[12].mxu0 %v6328_v28  ;;  %2653 = vmatmul.mubr.bf16.gmra.mrb[12].mxu1 %v6328_v28  ;;  %v6619_v28 = vrot.slane %v1445_v15, %v8033_v49 }
 0x262   : > { %2340 = vmatprep.mubr.bf16.mxu0 %v6350_v56  ;;  %2662 = vmatprep.mubr.bf16.mxu1 %v6350_v56  ;;  %v8034_v56 = vld [vmem:[#allocation77_spill] sm:$0xff] }
 0x269   : > { %2341 = vmatmul.mubr.bf16.gmra.mrb[16].mxu0 %v6357_v32  ;;  %2663 = vmatmul.mubr.bf16.gmra.mrb[16].mxu1 %v6357_v32  ;;  %v6622_v32 = vrot.slane %v1445_v15, %v8034_v56 }
 0x26a   : > { %2350 = vmatprep.mubr.bf16.mxu0 %v6367_v6  ;;  %2672 = vmatprep.mubr.bf16.mxu1 %v6367_v6 }
 0x271   : > { %2351 = vmatmul.mubr.bf16.gmra.mrb[20].mxu0 %v6377_v14  ;;  %2673 = vmatmul.mubr.bf16.gmra.mrb[20].mxu1 %v6377_v14 }
 0x272   : > { %2360 = vmatprep.mubr.bf16.mxu0 %v6398_v16  ;;  %2682 = vmatprep.mubr.bf16.mxu1 %v6398_v16 }
 0x279   : > { %2361 = vmatmul.mubr.bf16.gmra.mrb[24].mxu0 %v6402_v23  ;;  %2683 = vmatmul.mubr.bf16.gmra.mrb[24].mxu1 %v6402_v23 }
 0x27a   : > { %2370 = vmatprep.mubr.bf16.mxu0 %v6407_v62  ;;  %2692 = vmatprep.mubr.bf16.mxu1 %v6407_v62 }
 0x281   : > { %2371 = vmatmul.mubr.bf16.gmra.mrb[28].mxu0 %v6409_v12  ;;  %2693 = vmatmul.mubr.bf16.gmra.mrb[28].mxu1 %v6409_v12 }
 0x282   : > { %2380 = vmatprep.mubr.bf16.mxu0 %v6468_v39  ;;  %2702 = vmatprep.mubr.bf16.mxu1 %v6468_v39 }
 0x289   : > { %2381 = vmatmul.mubr.bf16.gmra.mrb[32].mxu0 %v6471_v17  ;;  %2703 = vmatmul.mubr.bf16.gmra.mrb[32].mxu1 %v6471_v17 }
 0x28a   : > { %2390 = vmatprep.mubr.bf16.mxu0 %v6491_v0  ;;  %2712 = vmatprep.mubr.bf16.mxu1 %v6491_v0 }
 0x291   : > { %2391 = vmatmul.mubr.bf16.gmra.mrb[36].mxu0 %v6506_v35  ;;  %2713 = vmatmul.mubr.bf16.gmra.mrb[36].mxu1 %v6506_v35 }
 0x292   : > { %2400 = vmatprep.mubr.bf16.mxu0 %v6520_v47  ;;  %2722 = vmatprep.mubr.bf16.mxu1 %v6520_v47 }
 0x299   : > { %2401 = vmatmul.mubr.bf16.gmra.mrb[40].mxu0 %v6527_v53  ;;  %2723 = vmatmul.mubr.bf16.gmra.mrb[40].mxu1 %v6527_v53 }
 0x29a   : > { %2410 = vmatprep.mubr.bf16.mxu0 %v1312_v5  ;;  %2732 = vmatprep.mubr.bf16.mxu1 %v1312_v5 }
 0x2a1   : > { %2411 = vmatmul.mubr.bf16.gmra.mrb[44].mxu0 %v6553_v24  ;;  %2733 = vmatmul.mubr.bf16.gmra.mrb[44].mxu1 %v6553_v24 }
 0x2a2   : > { %2420 = vmatprep.mubr.bf16.mxu0 %v1316_v41  ;;  %2742 = vmatprep.mubr.bf16.mxu1 %v1316_v41 }
 0x2a9   : > { %2421 = vmatmul.mubr.bf16.gmra.mrb[48].mxu0 %v1315_v44  ;;  %2743 = vmatmul.mubr.bf16.gmra.mrb[48].mxu1 %v1315_v44 }
 0x31c   : > { %v2302_v6 = vpop.f32.mrb[0].mxu0  ;;  %v2624_v14 = vpop.f32.mrb[0].mxu1 }
 0x31d   : > { %v3792_v16 = vadd.f32 %v2302_v6, %v6616_v59  ;;  %v3842_v23 = vadd.f32 %v2624_v14, %v6619_v28  ;;  %v2304_v62 = vpop.f32.mrb[1].mxu0  ;;  %v2626_v12 = vpop.f32.mrb[1].mxu1 }
 0x31e   : > { %v3793_v39 = vadd.f32 %v2304_v62, %v6622_v32  ;;  %v3843_v17 = vadd.f32 %v2626_v12, %v6625_v29  ;;  %v2306_v0 = vpop.f32.mrb[2].mxu0  ;;  %v2628_v35 = vpop.f32.mrb[2].mxu1 }
 0x31f   : > { %v2851_v47 = vmul.f32 0.70710677, %v3792_v16  ;;  %v2853_v58 = vmul.f32 0.70710677, %v3842_v23  ;;  %v3794_v22 = vadd.f32 %v2306_v0, %v6616_v59  ;;  %v3844_v53 = vadd.f32 %v2628_v35, %v6619_v28  ;;  %v2308_v60 = vpop.f32.mrb[3].mxu0  ;;  %v2630_v25 = vpop.f32.mrb[3].mxu1 }
 0x320   : > { %v2852_v48 = vmul.f32 0.70710677, %v3793_v39  ;;  %v2854_v20 = vmul.f32 0.70710677, %v3843_v17  ;;  %v3795_v40 = vadd.f32 %v2308_v60, %v6622_v32  ;;  %v3845_v3 = vadd.f32 %v2630_v25, %v6625_v29 }
 0x321   : > { %4280 = verf.f32 %v2851_v47  ;;  %v2855_v27 = vmul.f32 0.70710677, %v3794_v22  ;;  %v2857_v18 = vmul.f32 0.70710677, %v3844_v53  ;;  %v2751_v9 = vmul.f32 0.5, %v3792_v16 }
 0x322   : > { %4282 = verf.f32 %v2853_v58  ;;  %v2856_v36 = vmul.f32 0.70710677, %v3795_v40  ;;  %v2858_v34 = vmul.f32 0.70710677, %v3845_v3  ;;  %v2753_v46 = vmul.f32 0.5, %v3842_v23 }
 0x323   : > { %4284 = verf.f32 %v2852_v48  ;;  %v2752_v5 = vmul.f32 0.5, %v3793_v39  ;;  %v2754_v1 = vmul.f32 0.5, %v3843_v17  ;;  %v2755_v11 = vmul.f32 0.5, %v3794_v22 }
 0x324   : > { %4286 = verf.f32 %v2854_v20  ;;  %v2312_v7 = vpop.f32.mrb[4].mxu0  ;;  %v2634_v4 = vpop.f32.mrb[4].mxu1  ;;  %v2757_v61 = vmul.f32 0.5, %v3844_v53  ;;  %v2756_v49 = vmul.f32 0.5, %v3795_v40  ;;  %v2758_v56 = vmul.f32 0.5, %v3845_v3 }
 0x325   : > { %4288 = verf.f32 %v2855_v27  ;;  %v3796_v26 = vadd.f32 %v2312_v7, %v6616_v59  ;;  %v2314_v63 = vpop.f32.mrb[5].mxu0  ;;  %v6637_v43 = vadd.f32 %v2634_v4, %v6619_v28  ;;  %v2636_v37 = vpop.f32.mrb[5].mxu1 }
 0x326   : > { %4290 = verf.f32 %v2857_v18  ;;  %v6640_v45 = vadd.f32 %v2314_v63, %v6622_v32  ;;  %v2316_v30 = vpop.f32.mrb[6].mxu0  ;;  %v6643_v8 = vadd.f32 %v2636_v37, %v6625_v29  ;;  %v2638_v10 = vpop.f32.mrb[6].mxu1 }
 0x327   : > { %4292 = verf.f32 %v2856_v36  ;;  %v2859_v50 = vmul.f32 0.70710677, %v3796_v26  ;;  %v2318_v19 = vpop.f32.mrb[7].mxu0  ;;  %v2861_v54 = vmul.f32 0.70710677, %v6637_v43  ;;  %v2640_v55 = vpop.f32.mrb[7].mxu1  ;;  %v6650_v33 = vadd.f32 %v2316_v30, %v6616_v59 }
 0x328   : > { %4294 = verf.f32 %v2858_v34  ;;  %v2860_v24 = vmul.f32 0.70710677, %v6640_v45  ;;  %v2862_v42 = vmul.f32 0.70710677, %v6643_v8  ;;  %v6653_v57 = vadd.f32 %v2638_v10, %v6619_v28 }
 0x329   : > { %4296 = verf.f32 %v2859_v50  ;;  %v6656_v51 = vadd.f32 %v2318_v19, %v6622_v32  ;;  %v2863_v38 = vmul.f32 0.70710677, %v6650_v33  ;;  %v6660_v41 = vadd.f32 %v2640_v55, %v6625_v29 }
 0x32a   : > { %4298 = verf.f32 %v2861_v54  ;;  %v2865_v6 = vmul.f32 0.70710677, %v6653_v57  ;;  %v2759_v58 = vmul.f32 0.5, %v3796_v26  ;;  %v2761_v10 = vmul.f32 0.5, %v6637_v43 }
 0x32b   : > { %v4281_v21 = vpop.eup %4280  ;;  %4300 = verf.f32 %v2860_v24  ;;  %v2864_v12 = vmul.f32 0.70710677, %v6656_v51  ;;  %v2866_v25 = vmul.f32 0.70710677, %v6660_v41  ;;  %v2760_v55 = vmul.f32 0.5, %v6640_v45 }
 0x32c   : > { %v4283_v13 = vpop.eup %4282  ;;  %v3051_v31 = vadd.f32 1.0, %v4281_v21  ;;  %4302 = verf.f32 %v2862_v42  ;;  %v2322_v2 = vpop.f32.mrb[8].mxu0 }
 0x32d   : > { %v2644_v44 = vpop.f32.mrb[8].mxu1  ;;  %v4285_v15 = vpop.eup %4284  ;;  %v3053_v52 = vadd.f32 1.0, %v4283_v13  ;;  %4304 = verf.f32 %v2863_v38  ;;  %v6678_v36 = vadd.f32 %v2322_v2, %v6616_v59 }
 0x32e   : > { %v2324_v14 = vpop.f32.mrb[9].mxu0  ;;  %v4287_v16 = vpop.eup %4286  ;;  %v3151_v23 = vmul.f32 %v3051_v31, %v2751_v9  ;;  %v3052_v62 = vadd.f32 1.0, %v4285_v15  ;;  %4306 = verf.f32 %v2865_v6  ;;  %v6681_v7 = vadd.f32 %v2644_v44, %v6619_v28 }
 0x32f   : > { %v2646_v39 = vpop.f32.mrb[9].mxu1  ;;  %v2326_v17 = vpop.f32.mrb[10].mxu0  ;;  %v3153_v35 = vmul.f32 %v3053_v52, %v2753_v46  ;;  %v3054_v47 = vadd.f32 1.0, %v4287_v16  ;;  %4308 = verf.f32 %v2864_v12  ;;  %v6685_v63 = vadd.f32 %v2324_v14, %v6622_v32 }
 0x330   : > { %v4289_v0 = vpop.eup %4288  ;;  %v6664_v48 = vpop.f32.mrb[10].mxu1  ;;  %3251 = vst [vmem:[%s6670_s24] sm:$0xff] %v3151_v23  ;;  %v3152_v53 = vmul.f32 %v3052_v62, %v2752_v5  ;;  %4310 = verf.f32 %v2866_v25  ;;  %v2867_v19 = vmul.f32 0.70710677, %v6678_v36  ;;  %v2869_v5 = vmul.f32 0.70710677, %v6681_v7 }
 0x331   : > { %v6666_v20 = vpop.f32.mrb[11].mxu0  ;;  %v4291_v22 = vpop.eup %4290  ;;  %v3055_v60 = vadd.f32 1.0, %v4289_v0  ;;  %3253 = vst [vmem:[%s6670_s24 + $0x10] sm:$0xff] %v3153_v35  ;;  %v3154_v27 = vmul.f32 %v3054_v47, %v2754_v1  ;;  %v2868_v2 = vmul.f32 0.70710677, %v6685_v63  ;;  %v6721_v62 = vadd.f32 %v6664_v48, %v6619_v28 }
 0x332   : > { %v6674_v40 = vpop.f32.mrb[11].mxu1  ;;  %v4293_v3 = vpop.eup %4292  ;;  %v3057_v18 = vadd.f32 1.0, %v4291_v22  ;;  %3252 = vst [vmem:[%s6670_s24 + $0x8] sm:$0xff] %v3152_v53  ;;  %4312 = verf.f32 %v2867_v19  ;;  %v6725_v12 = vadd.f32 %v6666_v20, %v6622_v32  ;;  %v2763_v0 = vmul.f32 0.5, %v6650_v33 }
 0x333   : > { %v4295_v34 = vpop.eup %4294  ;;  %v3155_v26 = vmul.f32 %v3055_v60, %v2755_v11  ;;  %v3056_v4 = vadd.f32 1.0, %v4293_v3  ;;  %3254 = vst [vmem:[%s6670_s24 + $0x18] sm:$0xff] %v3154_v27  ;;  %v2762_v11 = vmul.f32 0.5, %v6643_v8  ;;  %4314 = verf.f32 %v2869_v5 }
 0x334   : > { %v4297_v37 = vpop.eup %4296  ;;  %v3157_v30 = vmul.f32 %v3057_v18, %v2757_v61  ;;  %v3058_v50 = vadd.f32 1.0, %v4295_v34  ;;  %v6693_v24 = vpop.f32.mrb[12].mxu0  ;;  %4316 = verf.f32 %v2868_v2  ;;  %v2765_v22 = vmul.f32 0.5, %v6653_v57 }
 0x335   : > { %v4299_v9 = vpop.eup %4298  ;;  %3255 = vst [vmem:[%s6670_s24 + $0x20] sm:$0xff] %v3155_v26  ;;  %v3156_v46 = vmul.f32 %v3056_v4, %v2756_v49  ;;  %v3059_v54 = vadd.f32 1.0, %v4297_v37  ;;  %v6695_v42 = vpop.f32.mrb[12].mxu1  ;;  %v6709_v49 = vadd.f32 %v2646_v39, %v6625_v29  ;;  %v2764_v48 = vmul.f32 0.5, %v6656_v51 }
 0x336   : > { %v4301_v21 = vpop.eup %4300  ;;  %3257 = vst [vmem:[%s6670_s24 + $0x30] sm:$0xff] %v3157_v30  ;;  %v3158_v1 = vmul.f32 %v3058_v50, %v2758_v56  ;;  %v3061_v43 = vadd.f32 1.0, %v4299_v9  ;;  %v2334_v61 = vpop.f32.mrb[13].mxu0  ;;  %v6712_v56 = vadd.f32 %v2326_v17, %v6616_v59  ;;  %v2873_v33 = vmul.f32 0.70710677, %v6721_v62 }
 0x337   : > { %v6699_v13 = vpop.f32.mrb[13].mxu1  ;;  %v4303_v31 = vpop.eup %4302  ;;  %3256 = vst [vmem:[%s6670_s24 + $0x28] sm:$0xff] %v3156_v46  ;;  %v3159_v45 = vmul.f32 %v3059_v54, %v2759_v58  ;;  %v3060_v38 = vadd.f32 1.0, %v4301_v21  ;;  %v2870_v47 = vmul.f32 0.70710677, %v6709_v49  ;;  %v2766_v18 = vmul.f32 0.5, %v6660_v41 }
 0x338   : > { %v6703_v44 = vpop.f32.mrb[14].mxu0  ;;  %v6705_v15 = vpop.f32.mrb[14].mxu1  ;;  %3258 = vst [vmem:[%s6670_s24 + $0x38] sm:$0xff] %v3158_v1  ;;  %v3161_v52 = vmul.f32 %v3061_v43, %v2761_v10  ;;  %v3062_v8 = vadd.f32 1.0, %v4303_v31  ;;  %v2871_v60 = vmul.f32 0.70710677, %v6712_v56  ;;  %v6743_v37 = vadd.f32 %v6674_v40, %v6625_v29 }
 0x339   : > { %v6714_v6 = vpop.f32.mrb[15].mxu0  ;;  %v6716_v14 = vpop.f32.mrb[15].mxu1  ;;  %3259 = vst [vmem:[%s6670_s24 + $0x40] sm:$0xff] %v3159_v45  ;;  %v3160_v23 = vmul.f32 %v3060_v38, %v2760_v55  ;;  %4318 = verf.f32 %v2870_v47  ;;  %v2872_v57 = vmul.f32 0.70710677, %v6725_v12  ;;  %v6752_v41 = vadd.f32 %v6693_v24, %v6616_v59 }
 0x33a   : > { %v4305_v16 = vpop.eup %4304  ;;  %3261 = vst [vmem:[%s6670_s24 + $0x50] sm:$0xff] %v3161_v52  ;;  %v3162_v17 = vmul.f32 %v3062_v8, %v2762_v11  ;;  %4320 = verf.f32 %v2871_v60  ;;  %v6756_v10 = vadd.f32 %v6695_v42, %v6619_v28  ;;  %v6759_v19 = vadd.f32 %v2334_v61, %v6622_v32 }
 0x33b   : > { %v4307_v39 = vpop.eup %4306  ;;  %v3063_v35 = vadd.f32 1.0, %v4305_v16  ;;  %3260 = vst [vmem:[%s6670_s24 + $0x48] sm:$0xff] %v3160_v23  ;;  %4322 = verf.f32 %v2873_v33  ;;  %v2874_v55 = vmul.f32 0.70710677, %v6743_v37  ;;  %v6769_v5 = vadd.f32 %v6699_v13, %v6625_v29 }
 0x33c   : > { %v4309_v58 = vpop.eup %4308  ;;  %v3065_v53 = vadd.f32 1.0, %v4307_v39  ;;  %3262 = vst [vmem:[%s6670_s24 + $0x58] sm:$0xff] %v3162_v17  ;;  %v2342_v34 = vpop.f32.mrb[16].mxu0  ;;  %4324 = verf.f32 %v2872_v57  ;;  %v2767_v1 = vmul.f32 0.5, %v6678_v36  ;;  %v2769_v11 = vmul.f32 0.5, %v6681_v7 }
 0x33d   : > { %v3163_v20 = vmul.f32 %v3063_v35, %v2763_v0  ;;  %v3064_v25 = vadd.f32 1.0, %v4309_v58  ;;  %v4311_v3 = vpop.eup %4310  ;;  %v6738_v26 = vpop.f32.mrb[16].mxu1  ;;  %v2875_v61 = vmul.f32 0.70710677, %v6752_v41  ;;  %v2768_v45 = vmul.f32 0.5, %v6685_v63 }
 0x33e   : > { %v3165_v27 = vmul.f32 %v3065_v53, %v2765_v22  ;;  %v3066_v4 = vadd.f32 1.0, %v4311_v3  ;;  %v6745_v30 = vpop.f32.mrb[17].mxu0  ;;  %v6747_v50 = vpop.f32.mrb[17].mxu1  ;;  %4326 = verf.f32 %v2874_v55  ;;  %v2877_v13 = vmul.f32 0.70710677, %v6756_v10 }
 0x33f   : > { %3263 = vst [vmem:[%s6670_s24 + $0x60] sm:$0xff] %v3163_v20  ;;  %v3164_v51 = vmul.f32 %v3064_v25, %v2764_v48  ;;  %v6761_v40 = vpop.f32.mrb[18].mxu0  ;;  %v6763_v9 = vpop.f32.mrb[18].mxu1  ;;  %v2770_v52 = vmul.f32 0.5, %v6709_v49  ;;  %4328 = verf.f32 %v2875_v61  ;;  %v2876_v36 = vmul.f32 0.70710677, %v6759_v19 }
 0x340   : > { %3265 = vst [vmem:[%s6670_s24 + $0x70] sm:$0xff] %v3165_v27  ;;  %v4313_v46 = vpop.eup %4312  ;;  %v3166_v54 = vmul.f32 %v3066_v4, %v2766_v18  ;;  %v6771_v24 = vpop.f32.mrb[19].mxu0  ;;  %4330 = verf.f32 %v2877_v13  ;;  %v2878_v16 = vmul.f32 0.70710677, %v6769_v5  ;;  %v6787_v63 = vadd.f32 %v6703_v44, %v6616_v59 }
 0x341   : > { %3264 = vst [vmem:[%s6670_s24 + $0x68] sm:$0xff] %v3164_v51  ;;  %v6773_v42 = vpop.f32.mrb[19].mxu1  ;;  %v4315_v21 = vpop.eup %4314  ;;  %v3067_v43 = vadd.f32 1.0, %v4313_v46  ;;  %4332 = verf.f32 %v2876_v36  ;;  %v6791_v23 = vadd.f32 %v6705_v15, %v6619_v28  ;;  %v6795_v49 = vadd.f32 %v6714_v6, %v6622_v32 }
 0x342   : > { %3266 = vst [vmem:[%s6670_s24 + $0x78] sm:$0xff] %v3166_v54  ;;  %v3069_v31 = vadd.f32 1.0, %v4315_v21  ;;  %v4317_v38 = vpop.eup %4316  ;;  %v2771_v47 = vmul.f32 0.5, %v6712_v56  ;;  %4334 = verf.f32 %v2878_v16  ;;  %v6805_v44 = vadd.f32 %v6716_v14, %v6625_v29 }
 0x343   : > { %v3167_v2 = vmul.f32 %v3067_v43, %v2767_v1  ;;  %v3068_v7 = vadd.f32 1.0, %v4317_v38  ;;  %v4319_v0 = vpop.eup %4318  ;;  %v2773_v53 = vmul.f32 0.5, %v6721_v62  ;;  %v2879_v48 = vmul.f32 0.70710677, %v6787_v63 }
 0x344   : > { %v3169_v8 = vmul.f32 %v3069_v31, %v2769_v11  ;;  %v6797_v39 = vpop.f32.mrb[20].mxu0  ;;  %v6799_v17 = vpop.f32.mrb[20].mxu1  ;;  %v3070_v22 = vadd.f32 1.0, %v4319_v0  ;;  %v6814_v60 = vadd.f32 %v2342_v34, %v6616_v59  ;;  %v2772_v14 = vmul.f32 0.5, %v6725_v12 }
 0x345   : > { %3267 = vst [vmem:[%s6670_s24 + $0x80] sm:$0xff] %v3167_v2  ;;  %v3168_v35 = vmul.f32 %v3068_v7, %v2768_v45  ;;  %v6807_v15 = vpop.f32.mrb[21].mxu0  ;;  %v6809_v58 = vpop.f32.mrb[21].mxu1  ;;  %v2881_v33 = vmul.f32 0.70710677, %v6791_v23  ;;  %v2774_v57 = vmul.f32 0.5, %v6743_v37  ;;  %4336 = verf.f32 %v2879_v48 }
 0x346   : > { %3269 = vst [vmem:[%s6670_s24 + $0x90] sm:$0xff] %v3169_v8  ;;  %v4321_v6 = vpop.eup %4320  ;;  %v6816_v20 = vpop.f32.mrb[22].mxu0  ;;  %v2880_v3 = vmul.f32 0.70710677, %v6795_v49  ;;  %v3170_v18 = vmul.f32 %v3070_v22, %v2770_v52  ;;  %v2882_v12 = vmul.f32 0.70710677, %v6805_v44  ;;  %v6836_v11 = vadd.f32 %v6738_v26, %v6619_v28 }
 0x347   : > { %v4323_v56 = vpop.eup %4322  ;;  %3268 = vst [vmem:[%s6670_s24 + $0x88] sm:$0xff] %v3168_v35  ;;  %v3071_v25 = vadd.f32 1.0, %v4321_v6  ;;  %v6823_v34 = vpop.f32.mrb[22].mxu1  ;;  %4338 = verf.f32 %v2881_v33  ;;  %v2775_v21 = vmul.f32 0.5, %v6752_v41  ;;  %v2883_v37 = vmul.f32 0.70710677, %v6814_v60 }
 0x348   : > { %v4325_v27 = vpop.eup %4324  ;;  %v3073_v62 = vadd.f32 1.0, %v4323_v56  ;;  %v6825_v51 = vpop.f32.mrb[23].mxu0  ;;  %3270 = vst [vmem:[%s6670_s24 + $0x98] sm:$0xff] %v3170_v18  ;;  %4340 = verf.f32 %v2880_v3  ;;  %v6840_v61 = vadd.f32 %v6745_v30, %v6622_v32  ;;  %v2777_v41 = vmul.f32 0.5, %v6756_v10 }
 0x349   : > { %v3171_v4 = vmul.f32 %v3071_v25, %v2771_v47  ;;  %v3072_v46 = vadd.f32 1.0, %v4325_v27  ;;  %v6828_v54 = vpop.f32.mrb[23].mxu1  ;;  %v4327_v1 = vpop.eup %4326  ;;  %4342 = verf.f32 %v2882_v12  ;;  %v6846_v13 = vadd.f32 %v6747_v50, %v6625_v29 }
 0x34a   : > { %v3173_v55 = vmul.f32 %v3073_v62, %v2773_v53  ;;  %v4329_v31 = vpop.eup %4328  ;;  %v3074_v45 = vadd.f32 1.0, %v4327_v1  ;;  %4344 = verf.f32 %v2883_v37  ;;  %v2776_v30 = vmul.f32 0.5, %v6759_v19 }
 0x34b   : > { %3271 = vst [vmem:[%s6670_s24 + $0xa0] sm:$0xff] %v3171_v4  ;;  %v3172_v43 = vmul.f32 %v3072_v46, %v2772_v14  ;;  %v4331_v26 = vpop.eup %4330  ;;  %v3075_v52 = vadd.f32 1.0, %v4329_v31  ;;  %v2885_v36 = vmul.f32 0.70710677, %v6836_v11  ;;  %v6857_v8 = vadd.f32 %v6761_v40, %v6616_v59 }
 0x34c   : > { %3273 = vst [vmem:[%s6670_s24 + $0xb0] sm:$0xff] %v3173_v55  ;;  %v6848_v38 = vpop.f32.mrb[24].mxu0  ;;  %v6850_v2 = vpop.f32.mrb[24].mxu1  ;;  %v3174_v7 = vmul.f32 %v3074_v45, %v2774_v57  ;;  %v3077_v16 = vadd.f32 1.0, %v4331_v26  ;;  %v2778_v0 = vmul.f32 0.5, %v6769_v5  ;;  %v2779_v14 = vmul.f32 0.5, %v6787_v63 }
 0x34d   : > { %3272 = vst [vmem:[%s6670_s24 + $0xa8] sm:$0xff] %v3172_v43  ;;  %v6859_v10 = vpop.f32.mrb[25].mxu0  ;;  %v4333_v50 = vpop.eup %4332  ;;  %v2884_v35 = vmul.f32 0.70710677, %v6840_v61  ;;  %v3175_v22 = vmul.f32 %v3075_v52, %v2775_v21  ;;  %4346 = verf.f32 %v2885_v36  ;;  %v2886_v40 = vmul.f32 0.70710677, %v6846_v13 }
 0x34e   : > { %v6863_v47 = vpop.f32.mrb[25].mxu1  ;;  %v6865_v19 = vpop.f32.mrb[26].mxu0  ;;  %v3076_v53 = vadd.f32 1.0, %v4333_v50  ;;  %3274 = vst [vmem:[%s6670_s24 + $0xb8] sm:$0xff] %v3174_v7  ;;  %v3177_v5 = vmul.f32 %v3077_v16, %v2777_v41  ;;  %v2887_v27 = vmul.f32 0.70710677, %v6857_v8  ;;  %v6880_v18 = vadd.f32 %v6763_v9, %v6619_v28 }
 0x34f   : > { %v4335_v6 = vpop.eup %4334  ;;  %v6868_v48 = vpop.f32.mrb[26].mxu1  ;;  %4348 = verf.f32 %v2884_v35  ;;  %3275 = vst [vmem:[%s6670_s24 + $0xc0] sm:$0xff] %v3175_v22  ;;  %v2781_v4 = vmul.f32 0.5, %v6791_v23  ;;  %v6886_v63 = vadd.f32 %v6771_v24, %v6622_v32  ;;  %v6890_v46 = vadd.f32 %v6773_v42, %v6625_v29 }
 0x350   : > { %v6870_v56 = vpop.f32.mrb[27].mxu0  ;;  %v3078_v25 = vadd.f32 1.0, %v4335_v6  ;;  %v6874_v33 = vpop.f32.mrb[27].mxu1  ;;  %v3176_v3 = vmul.f32 %v3076_v53, %v2776_v30  ;;  %4350 = verf.f32 %v2886_v40  ;;  %3277 = vst [vmem:[%s6670_s24 + $0xd0] sm:$0xff] %v3177_v5  ;;  %v2889_v9 = vmul.f32 0.70710677, %v6880_v18 }
 0x351   : > { %v4337_v62 = vpop.eup %4336  ;;  %4352 = verf.f32 %v2887_v27  ;;  %v6896_v21 = vadd.f32 %v6797_v39, %v6616_v59  ;;  %v2780_v24 = vmul.f32 0.5, %v6795_v49  ;;  %v2782_v1 = vmul.f32 0.5, %v6805_v44 }
 0x352   : > { %v3178_v57 = vmul.f32 %v3078_v25, %v2778_v0  ;;  %v4339_v12 = vpop.eup %4338  ;;  %3276 = vst [vmem:[%s6670_s24 + $0xc8] sm:$0xff] %v3176_v3  ;;  %v3079_v55 = vadd.f32 1.0, %v4337_v62  ;;  %v2888_v42 = vmul.f32 0.70710677, %v6886_v63  ;;  %4354 = verf.f32 %v2889_v9 }
 0x353   : > { %v4341_v37 = vpop.eup %4340  ;;  %v3081_v23 = vadd.f32 1.0, %v4339_v12  ;;  %v2890_v26 = vmul.f32 0.70710677, %v6890_v46  ;;  %v2783_v44 = vmul.f32 0.5, %v6814_v60  ;;  %v2891_v35 = vmul.f32 0.70710677, %v6896_v21 }
 0x354   : > { %3278 = vst [vmem:[%s6670_s24 + $0xd8] sm:$0xff] %v3178_v57  ;;  %v6902_v43 = vpop.f32.mrb[28].mxu0  ;;  %v4343_v31 = vpop.eup %4342  ;;  %v3179_v45 = vmul.f32 %v3079_v55, %v2779_v14  ;;  %v3080_v41 = vadd.f32 1.0, %v4341_v37  ;;  %4356 = verf.f32 %v2888_v42  ;;  %v6923_v60 = vadd.f32 %v6799_v17, %v6619_v28 }
 0x355   : > { %v6905_v39 = vpop.f32.mrb[28].mxu1  ;;  %v6907_v52 = vpop.f32.mrb[29].mxu0  ;;  %v3181_v49 = vmul.f32 %v3081_v23, %v2781_v4  ;;  %v3082_v36 = vadd.f32 1.0, %v4343_v31  ;;  %4358 = verf.f32 %v2890_v26  ;;  %v6927_v40 = vadd.f32 %v6807_v15, %v6622_v32 }
 0x356   : > { %v4345_v30 = vpop.eup %4344  ;;  %v6910_v50 = vpop.f32.mrb[29].mxu1  ;;  %3279 = vst [vmem:[%s6670_s24 + $0xe0] sm:$0xff] %v3179_v45  ;;  %v3180_v16 = vmul.f32 %v3080_v41, %v2780_v24  ;;  %v6931_v5 = vadd.f32 %v6809_v58, %v6625_v29  ;;  %v2785_v27 = vmul.f32 0.5, %v6836_v11  ;;  %4360 = verf.f32 %v2891_v35 }
 0x357   : > { %v6912_v7 = vpop.f32.mrb[30].mxu0  ;;  %v3083_v0 = vadd.f32 1.0, %v4345_v30  ;;  %v6916_v6 = vpop.f32.mrb[30].mxu1  ;;  %3281 = vst [vmem:[%s6670_s24 + $0xf0] sm:$0xff] %v3181_v49  ;;  %v3182_v53 = vmul.f32 %v3082_v36, %v2782_v1  ;;  %v6939_v17 = vadd.f32 %v6816_v20, %v6616_v59  ;;  %v2784_v57 = vmul.f32 0.5, %v6840_v61 }
 0x358   : > { %v6918_v22 = vpop.f32.mrb[31].mxu0  ;;  %v6933_v25 = vpop.f32.mrb[31].mxu1  ;;  %3280 = vst [vmem:[%s6670_s24 + $0xe8] sm:$0xff] %v3180_v16  ;;  %v2893_v58 = vmul.f32 0.70710677, %v6923_v60  ;;  %v6946_v4 = vadd.f32 %v6823_v34, %v6619_v28  ;;  %v2786_v11 = vmul.f32 0.5, %v6846_v13  ;;  %v6976_v16 = vadd.f32 %v6828_v54, %v6625_v29 }
 0x359   : > { %v4347_v14 = vpop.eup %4346  ;;  %v3183_v3 = vmul.f32 %v3083_v0, %v2783_v44  ;;  %3282 = vst [vmem:[%s6670_s24 + $0xf8] sm:$0xff] %v3182_v53  ;;  %v2892_v20 = vmul.f32 0.70710677, %v6927_v40  ;;  %v2894_v9 = vmul.f32 0.70710677, %v6931_v5  ;;  %v2787_v61 = vmul.f32 0.5, %v6857_v8 }
 0x35a   : > { %v4349_v62 = vpop.eup %4348  ;;  %v3085_v15 = vadd.f32 1.0, %v4347_v14  ;;  %4362 = verf.f32 %v2893_v58  ;;  %v2789_v31 = vmul.f32 0.5, %v6880_v18  ;;  %v2895_v13 = vmul.f32 0.70710677, %v6939_v17 }
 0x35b   : > { %v4351_v12 = vpop.eup %4350  ;;  %3283 = vst [vmem:[%s6670_s24 + $0x100] sm:$0xff] %v3183_v3  ;;  %v3084_v55 = vadd.f32 1.0, %v4349_v62  ;;  %4364 = verf.f32 %v2892_v20  ;;  %v2897_v30 = vmul.f32 0.70710677, %v6946_v4  ;;  %v6972_v18 = vadd.f32 %v6825_v51, %v6622_v32 }
 0x35c   : > { %v3185_v37 = vmul.f32 %v3085_v15, %v2785_v27  ;;  %v3086_v23 = vadd.f32 1.0, %v4351_v12  ;;  %v6953_v24 = vpop.f32.mrb[32].mxu0  ;;  %v6955_v1 = vpop.f32.mrb[32].mxu1  ;;  %4366 = verf.f32 %v2894_v9  ;;  %v6980_v0 = vadd.f32 %v6848_v38, %v6616_v59 }
 0x35d   : > { %v4353_v34 = vpop.eup %4352  ;;  %v3184_v42 = vmul.f32 %v3084_v55, %v2784_v57  ;;  %v6959_v45 = vpop.f32.mrb[33].mxu0  ;;  %4368 = verf.f32 %v2895_v13  ;;  %v6989_v51 = vadd.f32 %v6850_v2, %v6619_v28  ;;  %v2788_v62 = vmul.f32 0.5, %v6886_v63 }
 0x35e   : > { %v6961_v41 = vpop.f32.mrb[33].mxu1  ;;  %3285 = vst [vmem:[%s6670_s24 + $0x110] sm:$0xff] %v3185_v37  ;;  %v3186_v8 = vmul.f32 %v3086_v23, %v2786_v11  ;;  %v3087_v26 = vadd.f32 1.0, %v4353_v34  ;;  %v6965_v49 = vpop.f32.mrb[34].mxu0  ;;  %4370 = verf.f32 %v2897_v30  ;;  %v2790_v38 = vmul.f32 0.5, %v6890_v46 }
 0x35f   : > { %v6967_v36 = vpop.f32.mrb[34].mxu1  ;;  %v4355_v44 = vpop.eup %4354  ;;  %3284 = vst [vmem:[%s6670_s24 + $0x108] sm:$0xff] %v3184_v42  ;;  %v2896_v57 = vmul.f32 0.70710677, %v6972_v18  ;;  %v2791_v55 = vmul.f32 0.5, %v6896_v21  ;;  %v2793_v9 = vmul.f32 0.5, %v6923_v60  ;;  %v7008_v21 = vadd.f32 %v6859_v10, %v6622_v32 }
 0x360   : > { %v6982_v35 = vpop.f32.mrb[35].mxu0  ;;  %v6984_v53 = vpop.f32.mrb[35].mxu1  ;;  %3286 = vst [vmem:[%s6670_s24 + $0x118] sm:$0xff] %v3186_v8  ;;  %v3187_v3 = vmul.f32 %v3087_v26, %v2787_v61  ;;  %v3089_v27 = vadd.f32 1.0, %v4355_v44  ;;  %v2898_v11 = vmul.f32 0.70710677, %v6976_v16  ;;  %v7012_v60 = vadd.f32 %v6863_v47, %v6625_v29 }
 0x361   : > { %v4357_v14 = vpop.eup %4356  ;;  %4372 = verf.f32 %v2896_v57  ;;  %v2899_v63 = vmul.f32 0.70710677, %v6980_v0  ;;  %v2901_v23 = vmul.f32 0.70710677, %v6989_v51  ;;  %v7016_v42 = vadd.f32 %v6865_v19, %v6616_v59 }
 0x362   : > { %v4359_v54 = vpop.eup %4358  ;;  %v3088_v15 = vadd.f32 1.0, %v4357_v14  ;;  %3287 = vst [vmem:[%s6670_s24 + $0x120] sm:$0xff] %v3187_v3  ;;  %v3189_v58 = vmul.f32 %v3089_v27, %v2789_v31  ;;  %4374 = verf.f32 %v2898_v11  ;;  %v2792_v30 = vmul.f32 0.5, %v6927_v40 }
 0x363   : > { %v3090_v12 = vadd.f32 1.0, %v4359_v54  ;;  %v4361_v20 = vpop.eup %4360  ;;  %4376 = verf.f32 %v2899_v63  ;;  %v7026_v10 = vadd.f32 %v6868_v48, %v6619_v28  ;;  %v2794_v3 = vmul.f32 0.5, %v6931_v5 }
 0x364   : > { %v3188_v2 = vmul.f32 %v3088_v15, %v2788_v62  ;;  %3289 = vst [vmem:[%s6670_s24 + $0x130] sm:$0xff] %v3189_v58  ;;  %v3091_v37 = vadd.f32 1.0, %v4361_v20  ;;  %v7001_v61 = vpop.f32.mrb[36].mxu0  ;;  %v7003_v34 = vpop.f32.mrb[36].mxu1  ;;  %4378 = verf.f32 %v2901_v23  ;;  %v2795_v27 = vmul.f32 0.5, %v6939_v17 }
 0x365   : > { %v3190_v46 = vmul.f32 %v3090_v12, %v2790_v38  ;;  %v7018_v31 = vpop.f32.mrb[37].mxu0  ;;  %v7020_v13 = vpop.f32.mrb[37].mxu1  ;;  %v2900_v54 = vmul.f32 0.70710677, %v7008_v21  ;;  %v2902_v48 = vmul.f32 0.70710677, %v7012_v60  ;;  %v7042_v57 = vadd.f32 %v6870_v56, %v6622_v32 }
 0x366   : > { %3288 = vst [vmem:[%s6670_s24 + $0x128] sm:$0xff] %v3188_v2  ;;  %v4363_v8 = vpop.eup %4362  ;;  %v3191_v26 = vmul.f32 %v3091_v37, %v2791_v55  ;;  %v7028_v47 = vpop.f32.mrb[38].mxu0  ;;  %v2903_v38 = vmul.f32 0.70710677, %v7016_v42  ;;  %v2797_v12 = vmul.f32 0.5, %v6946_v4  ;;  %v2796_v37 = vmul.f32 0.5, %v6972_v18 }
 0x367   : > { %3290 = vst [vmem:[%s6670_s24 + $0x138] sm:$0xff] %v3190_v46  ;;  %v7030_v44 = vpop.f32.mrb[38].mxu1  ;;  %v4365_v19 = vpop.eup %4364  ;;  %v3093_v14 = vadd.f32 1.0, %v4363_v8  ;;  %4380 = verf.f32 %v2900_v54  ;;  %v2905_v63 = vmul.f32 0.70710677, %v7026_v10  ;;  %v7054_v23 = vadd.f32 %v6874_v33, %v6625_v29 }
 0x368   : > { %v7035_v62 = vpop.f32.mrb[39].mxu0  ;;  %v4367_v40 = vpop.eup %4366  ;;  %3291 = vst [vmem:[%s6670_s24 + $0x140] sm:$0xff] %v3191_v26  ;;  %v3092_v15 = vadd.f32 1.0, %v4365_v19  ;;  %4382 = verf.f32 %v2902_v48  ;;  %v2904_v4 = vmul.f32 0.70710677, %v7042_v57  ;;  %v2798_v18 = vmul.f32 0.5, %v6976_v16 }
 0x369   : > { %v4369_v58 = vpop.eup %4368  ;;  %v3193_v5 = vmul.f32 %v3093_v14, %v2793_v9  ;;  %v3094_v17 = vadd.f32 1.0, %v4367_v40  ;;  %v7045_v55 = vpop.f32.mrb[39].mxu1  ;;  %4384 = verf.f32 %v2903_v38  ;;  %v7064_v14 = vadd.f32 %v6902_v43, %v6616_v59 }
 0x36a   : > { %v4371_v11 = vpop.eup %4370  ;;  %v3192_v20 = vmul.f32 %v3092_v15, %v2792_v30  ;;  %v3095_v2 = vadd.f32 1.0, %v4369_v58  ;;  %4386 = verf.f32 %v2905_v63  ;;  %v2906_v15 = vmul.f32 0.70710677, %v7054_v23 }
 0x36b   : > { %3293 = vst [vmem:[%s6670_s24 + $0x150] sm:$0xff] %v3193_v5  ;;  %v3194_v46 = vmul.f32 %v3094_v17, %v2794_v3  ;;  %v3097_v56 = vadd.f32 1.0, %v4371_v11  ;;  %v4373_v30 = vpop.eup %4372  ;;  %v7068_v3 = vadd.f32 %v6905_v39, %v6619_v28  ;;  %4388 = verf.f32 %v2904_v4 }
 0x36c   : > { %3292 = vst [vmem:[%s6670_s24 + $0x148] sm:$0xff] %v3192_v20  ;;  %v3195_v9 = vmul.f32 %v3095_v2, %v2795_v27  ;;  %v7056_v8 = vpop.f32.mrb[40].mxu0  ;;  %v7058_v26 = vpop.f32.mrb[40].mxu1  ;;  %v3096_v40 = vadd.f32 1.0, %v4373_v30  ;;  %v7078_v16 = vadd.f32 %v6907_v52, %v6622_v32  ;;  %v2799_v58 = vmul.f32 0.5, %v6980_v0 }
 0x36d   : > { %3294 = vst [vmem:[%s6670_s24 + $0x158] sm:$0xff] %v3194_v46  ;;  %v3197_v19 = vmul.f32 %v3097_v56, %v2797_v12  ;;  %v7070_v33 = vpop.f32.mrb[41].mxu0  ;;  %v7072_v27 = vpop.f32.mrb[41].mxu1  ;;  %v2801_v5 = vmul.f32 0.5, %v6989_v51  ;;  %v2907_v17 = vmul.f32 0.70710677, %v7064_v14  ;;  %4390 = verf.f32 %v2906_v15 }
 0x36e   : > { %v4375_v54 = vpop.eup %4374  ;;  %3295 = vst [vmem:[%s6670_s24 + $0x160] sm:$0xff] %v3195_v9  ;;  %v7080_v43 = vpop.f32.mrb[42].mxu0  ;;  %v3196_v52 = vmul.f32 %v3096_v40, %v2796_v37  ;;  %v2909_v2 = vmul.f32 0.70710677, %v7068_v3  ;;  %v2800_v0 = vmul.f32 0.5, %v7008_v21  ;;  %v7098_v37 = vadd.f32 %v6910_v50, %v6625_v29 }
 0x36f   : > { %v7082_v48 = vpop.f32.mrb[42].mxu1  ;;  %v4377_v39 = vpop.eup %4376  ;;  %3297 = vst [vmem:[%s6670_s24 + $0x170] sm:$0xff] %v3197_v19  ;;  %v3098_v38 = vadd.f32 1.0, %v4375_v54  ;;  %4392 = verf.f32 %v2907_v17  ;;  %v2908_v9 = vmul.f32 0.70710677, %v7078_v16  ;;  %v2802_v19 = vmul.f32 0.5, %v7012_v60 }
 0x370   : > { %v7088_v12 = vpop.f32.mrb[43].mxu0  ;;  %v4379_v11 = vpop.eup %4378  ;;  %v3099_v20 = vadd.f32 1.0, %v4377_v39  ;;  %3296 = vst [vmem:[%s6670_s24 + $0x168] sm:$0xff] %v3196_v52  ;;  %4394 = verf.f32 %v2909_v2  ;;  %v7108_v21 = vadd.f32 %v6916_v6, %v6619_v28  ;;  %v2910_v50 = vmul.f32 0.70710677, %v7098_v37 }
 0x371   : > { %v7091_v63 = vpop.f32.mrb[43].mxu1  ;;  %v3198_v46 = vmul.f32 %v3098_v38, %v2798_v18  ;;  %v3101_v56 = vadd.f32 1.0, %v4379_v11  ;;  %v4381_v4 = vpop.eup %4380  ;;  %v7104_v18 = vadd.f32 %v6912_v7, %v6616_v59  ;;  %4396 = verf.f32 %v2908_v9 }
 0x372   : > { %v3199_v51 = vmul.f32 %v3099_v20, %v2799_v58  ;;  %v4383_v54 = vpop.eup %4382  ;;  %v3100_v40 = vadd.f32 1.0, %v4381_v4  ;;  %v7114_v15 = vadd.f32 %v6918_v22, %v6622_v32  ;;  %v2803_v6 = vmul.f32 0.5, %v7016_v42 }
 0x373   : > { %3298 = vst [vmem:[%s6670_s24 + $0x178] sm:$0xff] %v3198_v46  ;;  %v3201_v30 = vmul.f32 %v3101_v56, %v2801_v5  ;;  %v4385_v7 = vpop.eup %4384  ;;  %v3102_v38 = vadd.f32 1.0, %v4383_v54  ;;  %v2805_v58 = vmul.f32 0.5, %v7026_v10  ;;  %v2911_v5 = vmul.f32 0.70710677, %v7104_v18 }
 0x374   : > { %3299 = vst [vmem:[%s6670_s24 + $0x180] sm:$0xff] %v3199_v51  ;;  %v7116_v39 = vpop.f32.mrb[44].mxu0  ;;  %v7118_v60 = vpop.f32.mrb[44].mxu1  ;;  %v3200_v52 = vmul.f32 %v3100_v40, %v2800_v0  ;;  %v3103_v22 = vadd.f32 1.0, %v4385_v7  ;;  %4398 = verf.f32 %v2910_v50  ;;  %v2913_v20 = vmul.f32 0.70710677, %v7108_v21 }
 0x375   : > { %3301 = vst [vmem:[%s6670_s24 + $0x190] sm:$0xff] %v3201_v30  ;;  %v7124_v17 = vpop.f32.mrb[45].mxu0  ;;  %v4387_v11 = vpop.eup %4386  ;;  %v3202_v56 = vmul.f32 %v3102_v38, %v2802_v19  ;;  %v2804_v10 = vmul.f32 0.5, %v7042_v57  ;;  %4400 = verf.f32 %v2911_v5  ;;  %v2912_v30 = vmul.f32 0.70710677, %v7114_v15 }
 0x376   : > { %v7127_v2 = vpop.f32.mrb[45].mxu1  ;;  %v7129_v46 = vpop.f32.mrb[46].mxu0  ;;  %v3105_v42 = vadd.f32 1.0, %v4387_v11  ;;  %3300 = vst [vmem:[%s6670_s24 + $0x188] sm:$0xff] %v3200_v52  ;;  %v3203_v4 = vmul.f32 %v3103_v22, %v2803_v6  ;;  %4402 = verf.f32 %v2913_v20  ;;  %v7140_v54 = vadd.f32 %v6933_v25, %v6625_v29 }
 0x377   : > { %v7132_v51 = vpop.f32.mrb[46].mxu1  ;;  %v7134_v9 = vpop.f32.mrb[47].mxu0  ;;  %3302 = vst [vmem:[%s6670_s24 + $0x198] sm:$0xff] %v3202_v56  ;;  %v7147_v50 = vadd.f32 %v6953_v24, %v6616_v59  ;;  %v7151_v7 = vadd.f32 %v6955_v1, %v6619_v28  ;;  %v2806_v6 = vmul.f32 0.5, %v7054_v23  ;;  %4404 = verf.f32 %v2912_v30 }
 0x378   : > { %v4389_v0 = vpop.eup %4388  ;;  %v7142_v19 = vpop.f32.mrb[47].mxu1  ;;  %v3205_v57 = vmul.f32 %v3105_v42, %v2805_v58  ;;  %3303 = vst [vmem:[%s6670_s24 + $0x1a0] sm:$0xff] %v3203_v4  ;;  %v2914_v25 = vmul.f32 0.70710677, %v7140_v54  ;;  %v7158_v58 = vadd.f32 %v6959_v45, %v6622_v32  ;;  %v2807_v52 = vmul.f32 0.5, %v7064_v14 }
 0x379   : > { %v3104_v40 = vadd.f32 1.0, %v4389_v0  ;;  %v4391_v38 = vpop.eup %4390  ;;  %v2915_v1 = vmul.f32 0.70710677, %v7147_v50  ;;  %v2809_v23 = vmul.f32 0.5, %v7068_v3  ;;  %v2917_v56 = vmul.f32 0.70710677, %v7151_v7 }
 0x37a   : > { %v4393_v5 = vpop.eup %4392  ;;  %3305 = vst [vmem:[%s6670_s24 + $0x1b0] sm:$0xff] %v3205_v57  ;;  %v3106_v11 = vadd.f32 1.0, %v4391_v38  ;;  %4406 = verf.f32 %v2914_v25  ;;  %v2808_v4 = vmul.f32 0.5, %v7078_v16  ;;  %v7178_v38 = vadd.f32 %v6961_v41, %v6625_v29 }
 0x37b   : > { %v3204_v24 = vmul.f32 %v3104_v40, %v2804_v10  ;;  %v4395_v22 = vpop.eup %4394  ;;  %v3107_v20 = vadd.f32 1.0, %v4393_v5  ;;  %4408 = verf.f32 %v2915_v1  ;;  %v2916_v40 = vmul.f32 0.70710677, %v7158_v58 }
 0x37c   : > { %v7165_v42 = vpop.f32.mrb[48].mxu0  ;;  %v7167_v45 = vpop.f32.mrb[48].mxu1  ;;  %v3206_v0 = vmul.f32 %v3106_v11, %v2806_v6  ;;  %v3109_v10 = vadd.f32 1.0, %v4395_v22  ;;  %4410 = verf.f32 %v2917_v56  ;;  %v7187_v11 = vadd.f32 %v6967_v36, %v6619_v28 }
 0x37d   : > { %3304 = vst [vmem:[%s6670_s24 + $0x1a8] sm:$0xff] %v3204_v24  ;;  %v7171_v14 = vpop.f32.mrb[49].mxu0  ;;  %v7173_v30 = vpop.f32.mrb[49].mxu1  ;;  %v3207_v57 = vmul.f32 %v3107_v20, %v2807_v52  ;;  %v7183_v24 = vadd.f32 %v6965_v49, %v6616_v59  ;;  %v2810_v41 = vmul.f32 0.5, %v7098_v37  ;;  %4412 = verf.f32 %v2916_v40 }
 0x37e   : > { %v4397_v3 = vpop.eup %4396  ;;  %v2426_v25 = vpop.f32.mrb[50].mxu0  ;;  %3306 = vst [vmem:[%s6670_s24 + $0x1b8] sm:$0xff] %v3206_v0  ;;  %v3209_v16 = vmul.f32 %v3109_v10, %v2809_v23  ;;  %v2918_v20 = vmul.f32 0.70710677, %v7178_v38  ;;  %v7194_v23 = vadd.f32 %v6982_v35, %v6622_v32  ;;  %v2811_v36 = vmul.f32 0.5, %v7104_v18 }
 0x37f   : > { %v2748_v6 = vpop.f32.mrb[50].mxu1  ;;  %v3108_v5 = vadd.f32 1.0, %v4397_v3  ;;  %v2427_v52 = vpop.f32.mrb[51].mxu0  ;;  %3307 = vst [vmem:[%s6670_s24 + $0x1c0] sm:$0xff] %v3207_v57  ;;  %v2919_v10 = vmul.f32 0.70710677, %v7183_v24 }
 0x380   : > { %v2749_v1 = vpop.f32.mrb[51].mxu1  ;;  %v4399_v22 = vpop.eup %4398  ;;  %3309 = vst [vmem:[%s6670_s24 + $0x1d0] sm:$0xff] %v3209_v16  ;;  %v2813_v37 = vmul.f32 0.5, %v7108_v21  ;;  %4414 = verf.f32 %v2918_v20  ;;  %v2921_v40 = vmul.f32 0.70710677, %v7187_v11  ;;  %v2812_v6 = vmul.f32 0.5, %v7114_v15 }
 0x381   : > { %v4401_v49 = vpop.eup %4400  ;;  %v3208_v56 = vmul.f32 %v3108_v5, %v2808_v4  ;;  %v3110_v0 = vadd.f32 1.0, %v4399_v22  ;;  %4416 = verf.f32 %v2919_v10  ;;  %v2920_v18 = vmul.f32 0.70710677, %v7194_v23 }
 0x382   : > { %v4403_v3 = vpop.eup %4402  ;;  %v3111_v57 = vadd.f32 1.0, %v4401_v49  ;;  %4418 = verf.f32 %v2921_v40  ;;  %v7206_v5 = vadd.f32 %v6984_v53, %v6625_v29  ;;  %v7211_v1 = vadd.f32 %v7001_v61, %v6616_v59 }
 0x383   : > { %3308 = vst [vmem:[%s6670_s24 + $0x1c8] sm:$0xff] %v3208_v56  ;;  %v3210_v35 = vmul.f32 %v3110_v0, %v2810_v41  ;;  %v3113_v25 = vadd.f32 1.0, %v4403_v3  ;;  %v4405_v4 = vpop.eup %4404  ;;  %v7215_v15 = vadd.f32 %v7003_v34, %v6619_v28  ;;  %v2814_v41 = vmul.f32 0.5, %v7140_v54 }
 0x384   : > { %v3211_v16 = vmul.f32 %v3111_v57, %v2811_v36  ;;  %v3112_v52 = vadd.f32 1.0, %v4405_v4  ;;  %v4407_v22 = vpop.eup %4406  ;;  %4420 = verf.f32 %v2920_v18  ;;  %v2922_v53 = vmul.f32 0.70710677, %v7206_v5 }
 0x385   : > { %3310 = vst [vmem:[%s6670_s24 + $0x1d8] sm:$0xff] %v3210_v35  ;;  %v3213_v21 = vmul.f32 %v3113_v25, %v2813_v37  ;;  %v7222_v20 = vadd.f32 %v7018_v31, %v6622_v32  ;;  %v4409_v49 = vpop.eup %4408  ;;  %v3114_v56 = vadd.f32 1.0, %v4407_v22  ;;  %v2815_v0 = vmul.f32 0.5, %v7147_v50 }
 0x386   : > { %3311 = vst [vmem:[%s6670_s24 + $0x1e0] sm:$0xff] %v3211_v16  ;;  %v3212_v61 = vmul.f32 %v3112_v52, %v2812_v6  ;;  %v2923_v34 = vmul.f32 0.70710677, %v7211_v1  ;;  %v4411_v36 = vpop.eup %4410  ;;  %v3115_v10 = vadd.f32 1.0, %v4409_v49  ;;  %v2817_v54 = vmul.f32 0.5, %v7151_v7 }
 0x387   : > { %3313 = vst [vmem:[%s6670_s24 + $0x1f0] sm:$0xff] %v3213_v21  ;;  %4422 = verf.f32 %v2922_v53  ;;  %v2925_v3 = vmul.f32 0.70710677, %v7215_v15  ;;  %v3214_v31 = vmul.f32 %v3114_v56, %v2814_v41  ;;  %v3117_v57 = vadd.f32 1.0, %v4411_v36  ;;  %v4413_v40 = vpop.eup %4412 }
 0x388   : > { %3312 = vst [vmem:[%s6670_s24 + $0x1e8] sm:$0xff] %v3212_v61  ;;  %v2816_v37 = vmul.f32 0.5, %v7158_v58  ;;  %4424 = verf.f32 %v2923_v34  ;;  %v3215_v35 = vmul.f32 %v3115_v10, %v2815_v0  ;;  %v2924_v50 = vmul.f32 0.70710677, %v7222_v20 }
 0x389   : > { %4426 = verf.f32 %v2925_v3  ;;  %v7234_v25 = vadd.f32 %v7020_v13, %v6625_v29  ;;  %3314 = vst [vmem:[%s6670_s24 + $0x1f8] sm:$0xff] %v3214_v31  ;;  %v3217_v7 = vmul.f32 %v3117_v57, %v2817_v54  ;;  %v3116_v6 = vadd.f32 1.0, %v4413_v40 }
 0x38a   : > { %v7239_v4 = vadd.f32 %v7028_v47, %v6616_v59  ;;  %v7243_v58 = vadd.f32 %v7030_v44, %v6619_v28  ;;  %v4415_v16 = vpop.eup %4414  ;;  %3315 = vst [vmem:[%s6670_s24 + $0x200] sm:$0xff] %v3215_v35  ;;  %v2818_v18 = vmul.f32 0.5, %v7178_v38  ;;  %4428 = verf.f32 %v2924_v50 }
 0x38b   : > { %v2926_v13 = vmul.f32 0.70710677, %v7234_v25  ;;  %v7250_v21 = vadd.f32 %v7035_v62, %v6622_v32  ;;  %v4417_v52 = vpop.eup %4416  ;;  %3317 = vst [vmem:[%s6670_s24 + $0x210] sm:$0xff] %v3217_v7  ;;  %v3216_v47 = vmul.f32 %v3116_v6, %v2816_v37  ;;  %v3118_v22 = vadd.f32 1.0, %v4415_v16 }
 0x38c   : > { %v2819_v41 = vmul.f32 0.5, %v7183_v24  ;;  %v2927_v44 = vmul.f32 0.70710677, %v7239_v4  ;;  %v4419_v53 = vpop.eup %4418  ;;  %v3119_v49 = vadd.f32 1.0, %v4417_v52  ;;  %v2821_v38 = vmul.f32 0.5, %v7187_v11 }
 0x38d   : > { %4430 = verf.f32 %v2926_v13  ;;  %v2929_v61 = vmul.f32 0.70710677, %v7243_v58  ;;  %3316 = vst [vmem:[%s6670_s24 + $0x208] sm:$0xff] %v3216_v47  ;;  %v3218_v62 = vmul.f32 %v3118_v22, %v2818_v18  ;;  %v3121_v56 = vadd.f32 1.0, %v4419_v53 }
 0x38e   : > { %v2820_v0 = vmul.f32 0.5, %v7194_v23  ;;  %4432 = verf.f32 %v2927_v44  ;;  %v4421_v34 = vpop.eup %4420  ;;  %v3219_v36 = vmul.f32 %v3119_v49, %v2819_v41  ;;  %v2928_v24 = vmul.f32 0.70710677, %v7250_v21 }
 0x38f   : > { %4434 = verf.f32 %v2929_v61  ;;  %v7262_v10 = vadd.f32 %v7045_v55, %v6625_v29  ;;  %3318 = vst [vmem:[%s6670_s24 + $0x218] sm:$0xff] %v3218_v62  ;;  %v3221_v11 = vmul.f32 %v3121_v56, %v2821_v38  ;;  %v3120_v54 = vadd.f32 1.0, %v4421_v34 }
 0x390   : > { %v7267_v3 = vadd.f32 %v7056_v8, %v6616_v59  ;;  %v7271_v23 = vadd.f32 %v7058_v26, %v6619_v28  ;;  %3319 = vst [vmem:[%s6670_s24 + $0x220] sm:$0xff] %v3219_v36  ;;  %v2822_v57 = vmul.f32 0.5, %v7206_v5  ;;  %4436 = verf.f32 %v2928_v24 }
 0x391   : > { %v4423_v31 = vpop.eup %4422  ;;  %v2930_v55 = vmul.f32 0.70710677, %v7262_v10  ;;  %v7278_v37 = vadd.f32 %v7070_v33, %v6622_v32  ;;  %3321 = vst [vmem:[%s6670_s24 + $0x230] sm:$0xff] %v3221_v11  ;;  %v3220_v8 = vmul.f32 %v3120_v54, %v2820_v0  ;;  %v2823_v50 = vmul.f32 0.5, %v7211_v1 }
 0x392   : > { %v4425_v40 = vpop.eup %4424  ;;  %v3122_v35 = vadd.f32 1.0, %v4423_v31  ;;  %v2931_v26 = vmul.f32 0.70710677, %v7267_v3  ;;  %v2825_v5 = vmul.f32 0.5, %v7215_v15  ;;  %v2933_v16 = vmul.f32 0.70710677, %v7271_v23 }
 0x393   : > { %v4427_v7 = vpop.eup %4426  ;;  %v3123_v6 = vadd.f32 1.0, %v4425_v40  ;;  %4438 = verf.f32 %v2930_v55  ;;  %3320 = vst [vmem:[%s6670_s24 + $0x228] sm:$0xff] %v3220_v8  ;;  %v2824_v13 = vmul.f32 0.5, %v7222_v20  ;;  %v2932_v1 = vmul.f32 0.70710677, %v7278_v37 }
 0x394   : > { %v3222_v33 = vmul.f32 %v3122_v35, %v2822_v57  ;;  %v3125_v18 = vadd.f32 1.0, %v4427_v7  ;;  %4440 = verf.f32 %v2931_v26  ;;  %v4429_v52 = vpop.eup %4428  ;;  %v7290_v22 = vadd.f32 %v7072_v27, %v6625_v29 }
 0x395   : > { %v3223_v47 = vmul.f32 %v3123_v6, %v2823_v50  ;;  %4442 = verf.f32 %v2933_v16  ;;  %v3124_v41 = vadd.f32 1.0, %v4429_v52  ;;  %v7295_v44 = vadd.f32 %v7080_v43, %v6616_v59 }
 0x396   : > { %3322 = vst [vmem:[%s6670_s24 + $0x238] sm:$0xff] %v3222_v33  ;;  %v3225_v15 = vmul.f32 %v3125_v18, %v2825_v5  ;;  %v7299_v20 = vadd.f32 %v7082_v48, %v6619_v28  ;;  %v2826_v49 = vmul.f32 0.5, %v7234_v25  ;;  %4444 = verf.f32 %v2932_v1 }
 0x397   : > { %v4431_v53 = vpop.eup %4430  ;;  %3323 = vst [vmem:[%s6670_s24 + $0x240] sm:$0xff] %v3223_v47  ;;  %v2934_v27 = vmul.f32 0.70710677, %v7290_v22  ;;  %v7306_v38 = vadd.f32 %v7088_v12, %v6622_v32  ;;  %v3224_v43 = vmul.f32 %v3124_v41, %v2824_v13  ;;  %v2827_v56 = vmul.f32 0.5, %v7239_v4 }
 0x398   : > { %v4433_v61 = vpop.eup %4432  ;;  %3325 = vst [vmem:[%s6670_s24 + $0x250] sm:$0xff] %v3225_v15  ;;  %v3126_v62 = vadd.f32 1.0, %v4431_v53  ;;  %v2935_v48 = vmul.f32 0.70710677, %v7295_v44  ;;  %v2829_v25 = vmul.f32 0.5, %v7243_v58  ;;  %v2828_v11 = vmul.f32 0.5, %v7250_v21 }
 0x399   : > { %v4435_v0 = vpop.eup %4434  ;;  %v3127_v34 = vadd.f32 1.0, %v4433_v61  ;;  %4446 = verf.f32 %v2934_v27  ;;  %v2937_v36 = vmul.f32 0.70710677, %v7299_v20  ;;  %3324 = vst [vmem:[%s6670_s24 + $0x248] sm:$0xff] %v3224_v43  ;;  %v2936_v4 = vmul.f32 0.70710677, %v7306_v38 }
 0x39a   : > { %v3226_v12 = vmul.f32 %v3126_v62, %v2826_v49  ;;  %v3129_v24 = vadd.f32 1.0, %v4435_v0  ;;  %4448 = verf.f32 %v2935_v48  ;;  %v4437_v54 = vpop.eup %4436  ;;  %v7318_v57 = vadd.f32 %v7091_v63, %v6625_v29 }
 0x39b   : > { %v3227_v31 = vmul.f32 %v3127_v34, %v2827_v56  ;;  %4450 = verf.f32 %v2937_v36  ;;  %v3128_v55 = vadd.f32 1.0, %v4437_v54  ;;  %v7323_v40 = vadd.f32 %v7116_v39, %v6616_v59 }
 0x39c   : > { %3326 = vst [vmem:[%s6670_s24 + $0x258] sm:$0xff] %v3226_v12  ;;  %v3229_v58 = vmul.f32 %v3129_v24, %v2829_v25  ;;  %v7327_v21 = vadd.f32 %v7118_v60, %v6619_v28  ;;  %v2830_v35 = vmul.f32 0.5, %v7262_v10  ;;  %4452 = verf.f32 %v2936_v4 }
 0x39d   : > { %v4439_v8 = vpop.eup %4438  ;;  %3327 = vst [vmem:[%s6670_s24 + $0x260] sm:$0xff] %v3227_v31  ;;  %v2938_v63 = vmul.f32 0.70710677, %v7318_v57  ;;  %v7334_v50 = vadd.f32 %v7124_v17, %v6622_v32  ;;  %v3228_v39 = vmul.f32 %v3128_v55, %v2828_v11  ;;  %v2831_v6 = vmul.f32 0.5, %v7267_v3 }
 0x39e   : > { %v4441_v26 = vpop.eup %4440  ;;  %3329 = vst [vmem:[%s6670_s24 + $0x270] sm:$0xff] %v3229_v58  ;;  %v3130_v7 = vadd.f32 1.0, %v4439_v8  ;;  %v2939_v60 = vmul.f32 0.70710677, %v7323_v40  ;;  %v2833_v10 = vmul.f32 0.5, %v7271_v23  ;;  %v2832_v13 = vmul.f32 0.5, %v7278_v37 }
 0x39f   : > { %v4443_v5 = vpop.eup %4442  ;;  %v3131_v16 = vadd.f32 1.0, %v4441_v26  ;;  %4454 = verf.f32 %v2938_v63  ;;  %v2941_v33 = vmul.f32 0.70710677, %v7327_v21  ;;  %3328 = vst [vmem:[%s6670_s24 + $0x268] sm:$0xff] %v3228_v39  ;;  %v2940_v3 = vmul.f32 0.70710677, %v7334_v50 }
 0x3a0   : > { %v3230_v17 = vmul.f32 %v3130_v7, %v2830_v35  ;;  %v3133_v18 = vadd.f32 1.0, %v4443_v5  ;;  %4456 = verf.f32 %v2939_v60  ;;  %v4445_v52 = vpop.eup %4444  ;;  %v7346_v1 = vadd.f32 %v7127_v2, %v6625_v29 }
 0x3a1   : > { %v3231_v47 = vmul.f32 %v3131_v16, %v2831_v6  ;;  %4458 = verf.f32 %v2941_v33  ;;  %v3132_v15 = vadd.f32 1.0, %v4445_v52  ;;  %v7351_v41 = vadd.f32 %v7129_v46, %v6616_v59 }
 0x3a2   : > { %3330 = vst [vmem:[%s6670_s24 + $0x278] sm:$0xff] %v3230_v17  ;;  %v3233_v23 = vmul.f32 %v3133_v18, %v2833_v10  ;;  %v7355_v37 = vadd.f32 %v7132_v51, %v6619_v28  ;;  %v2834_v49 = vmul.f32 0.5, %v7290_v22  ;;  %4460 = verf.f32 %v2940_v3 }
 0x3a3   : > { %v4447_v53 = vpop.eup %4446  ;;  %3331 = vst [vmem:[%s6670_s24 + $0x280] sm:$0xff] %v3231_v47  ;;  %v2942_v2 = vmul.f32 0.70710677, %v7346_v1  ;;  %v7362_v27 = vadd.f32 %v7134_v9, %v6622_v32  ;;  %v3232_v46 = vmul.f32 %v3132_v15, %v2832_v13  ;;  %v2835_v62 = vmul.f32 0.5, %v7295_v44 }
 0x3a4   : > { %v4449_v61 = vpop.eup %4448  ;;  %3333 = vst [vmem:[%s6670_s24 + $0x290] sm:$0xff] %v3233_v23  ;;  %v3134_v43 = vadd.f32 1.0, %v4447_v53  ;;  %v2943_v51 = vmul.f32 0.70710677, %v7351_v41  ;;  %v2837_v22 = vmul.f32 0.5, %v7299_v20  ;;  %v2836_v25 = vmul.f32 0.5, %v7306_v38 }
 0x3a5   : > { %v4451_v56 = vpop.eup %4450  ;;  %v3135_v48 = vadd.f32 1.0, %v4449_v61  ;;  %4462 = verf.f32 %v2942_v2  ;;  %v2945_v0 = vmul.f32 0.70710677, %v7355_v37  ;;  %3332 = vst [vmem:[%s6670_s24 + $0x288] sm:$0xff] %v3232_v46  ;;  %v2944_v12 = vmul.f32 0.70710677, %v7362_v27 }
 0x3a6   : > { %v3234_v9 = vmul.f32 %v3134_v43, %v2834_v49  ;;  %v3137_v34 = vadd.f32 1.0, %v4451_v56  ;;  %4464 = verf.f32 %v2943_v51  ;;  %v4453_v36 = vpop.eup %4452  ;;  %v7374_v24 = vadd.f32 %v7142_v19, %v6625_v29 }
 0x3a7   : > { %v3235_v44 = vmul.f32 %v3135_v48, %v2835_v62  ;;  %4466 = verf.f32 %v2945_v0  ;;  %v3136_v11 = vadd.f32 1.0, %v4453_v36  ;;  %v3840_v54 = vadd.f32 %v7165_v42, %v6616_v59 }
 0x3a8   : > { %3334 = vst [vmem:[%s6670_s24 + $0x298] sm:$0xff] %v3234_v9  ;;  %v3237_v20 = vmul.f32 %v3137_v34, %v2837_v22  ;;  %v7381_v38 = vadd.f32 %v7167_v45, %v6619_v28  ;;  %4468 = verf.f32 %v2944_v12  ;;  %v2946_v4 = vmul.f32 0.70710677, %v7374_v24 }
 0x3a9   : > { %v4455_v31 = vpop.eup %4454  ;;  %3335 = vst [vmem:[%s6670_s24 + $0x2a0] sm:$0xff] %v3235_v44  ;;  %v7387_v19 = vadd.f32 %v7171_v14, %v6622_v32  ;;  %v3236_v55 = vmul.f32 %v3136_v11, %v2836_v25  ;;  %v2838_v8 = vmul.f32 0.5, %v7318_v57  ;;  %v2947_v42 = vmul.f32 0.70710677, %v3840_v54  ;;  %v3375_v11 = vld [vmem:[%s6670_s24 + $0x8] sm:$0xff] (%p8035_p9) }
 0x3aa   : > { %v4457_v58 = vpop.eup %4456  ;;  %3337 = vst [vmem:[%s6670_s24 + $0x2b0] sm:$0xff] %v3237_v20  ;;  %v3138_v59 = vadd.f32 1.0, %v4455_v31  ;;  %v2839_v45 = vmul.f32 0.5, %v7323_v40  ;;  %4470 = verf.f32 %v2946_v4  ;;  %v2949_v63 = vmul.f32 0.70710677, %v7381_v38  ;;  %v3373_v20 = vld [vmem:[%s6670_s24] sm:$0xff] (%p8035_p9) }
 0x3ab   : > { %v4459_v28 = vpop.eup %4458  ;;  %v3139_v35 = vadd.f32 1.0, %v4457_v58  ;;  %3336 = vst [vmem:[%s6670_s24 + $0x2a8] sm:$0xff] %v3236_v55  ;;  %v2841_v32 = vmul.f32 0.5, %v7327_v21  ;;  %4472 = verf.f32 %v2947_v42  ;;  %v2948_v7 = vmul.f32 0.70710677, %v7387_v19  ;;  %v3381_v31 = vld [vmem:[%s6670_s24 + $0x20] sm:$0xff] (%p8035_p9)  ;;  %3374 = vst [vmem:[%s7428_s30] sm:$0xff] (%p8035_p9), %v3373_v20 }
 0x3ac   : > { %v3238_v26 = vmul.f32 %v3138_v59, %v2838_v8  ;;  %v3141_v14 = vadd.f32 1.0, %v4459_v28  ;;  %v4461_v39 = vpop.eup %4460  ;;  %4474 = verf.f32 %v2949_v63  ;;  %v3891_v40 = vadd.f32 %v7173_v30, %v6625_v29  ;;  %v3383_v4 = vld [vmem:[%s6670_s24 + $0x28] sm:$0xff] (%p8035_p9)  ;;  %3376 = vst [vmem:[%s7428_s30 + $0x8] sm:$0xff] (%p8035_p9), %v3375_v11  ;;  %3382 = vst [vmem:[%s7428_s30 + $0x80] sm:$0xff] (%p8035_p9), %v3381_v31  ;;  %v3387_v58 = vld [vmem:[%s6670_s24 + $0x38] sm:$0xff] (%p8035_p9) }
 0x3ad   : > { %v3239_v57 = vmul.f32 %v3139_v35, %v2839_v45  ;;  %v2840_v60 = vmul.f32 0.5, %v7334_v50  ;;  %v3140_v5 = vadd.f32 1.0, %v4461_v39  ;;  %4476 = verf.f32 %v2948_v7  ;;  %3384 = vst [vmem:[%s7428_s30 + $0x88] sm:$0xff] (%p8035_p9), %v3383_v4  ;;  %v3389_v55 = vld [vmem:[%s6670_s24 + $0x40] sm:$0xff] (%p8035_p9)  ;;  %3388 = vst [vmem:[%s7428_s30 + $0x98] sm:$0xff] (%p8035_p9), %v3387_v58  ;;  %v3391_v8 = vld [vmem:[%s6670_s24 + $0x48] sm:$0xff] (%p8035_p9) }
 0x3ae   : > { %3338 = vst [vmem:[%s6670_s24 + $0x2b8] sm:$0xff] %v3238_v26  ;;  %v3241_v6 = vmul.f32 %v3141_v14, %v2841_v32  ;;  %v2950_v21 = vmul.f32 0.70710677, %v3891_v40  ;;  %v2842_v17 = vmul.f32 0.5, %v7346_v1  ;;  %v2843_v29 = vmul.f32 0.5, %v7351_v41  ;;  %3390 = vst [vmem:[%s7428_s30 + $0x100] sm:$0xff] (%p8035_p9), %v3389_v55 }
 0x3af   : > { %v4463_v16 = vpop.eup %4462  ;;  %3339 = vst [vmem:[%s6670_s24 + $0x2c0] sm:$0xff] %v3239_v57  ;;  %v3240_v33 = vmul.f32 %v3140_v5, %v2840_v60  ;;  %v2845_v52 = vmul.f32 0.5, %v7355_v37  ;;  %v2844_v1 = vmul.f32 0.5, %v7362_v27  ;;  %v2846_v61 = vmul.f32 0.5, %v7374_v24  ;;  %v3393_v59 = vld [vmem:[%s6670_s24 + $0x50] sm:$0xff] (%p8035_p9)  ;;  %v3395_v42 = vld [vmem:[%s6670_s24 + $0x58] sm:$0xff] (%p8035_p9) }
 0x3b0   : > { %v4465_v10 = vpop.eup %4464  ;;  %3341 = vst [vmem:[%s6670_s24 + $0x2d0] sm:$0xff] %v3241_v6  ;;  %v3142_v18 = vadd.f32 1.0, %v4463_v16  ;;  %4478 = verf.f32 %v2950_v21  ;;  %v2847_v43 = vmul.f32 0.5, %v3840_v54  ;;  %v2849_v27 = vmul.f32 0.5, %v7381_v38  ;;  %v3377_v54 = vld [vmem:[%s6670_s24 + $0x10] sm:$0xff] (%p8035_p9)  ;;  %v3379_v38 = vld [vmem:[%s6670_s24 + $0x18] sm:$0xff] (%p8035_p9) }
 0x3b1   : > { %v4467_v13 = vpop.eup %4466  ;;  %v3143_v30 = vadd.f32 1.0, %v4465_v10  ;;  %3340 = vst [vmem:[%s6670_s24 + $0x2c8] sm:$0xff] %v3240_v33  ;;  %v2848_v9 = vmul.f32 0.5, %v7387_v19  ;;  %v2850_v44 = vmul.f32 0.5, %v3891_v40  ;;  %3378 = vst [vmem:[%s7428_s30 + $0x10] sm:$0xff] (%p8035_p9), %v3377_v54  ;;  %v3385_v19 = vld [vmem:[%s6670_s24 + $0x30] sm:$0xff] (%p8035_p9) }
 0x3b2   : > { %v3242_v50 = vmul.f32 %v3142_v18, %v2842_v17  ;;  %v3145_v47 = vadd.f32 1.0, %v4467_v13  ;;  %v4469_v3 = vpop.eup %4468  ;;  %3380 = vst [vmem:[%s7428_s30 + $0x18] sm:$0xff] (%p8035_p9), %v3379_v38  ;;  %3386 = vst [vmem:[%s7428_s30 + $0x90] sm:$0xff] (%p8035_p9), %v3385_v19  ;;  %v3397_v28 = vld [vmem:[%s6670_s24 + $0x60] sm:$0xff] (%p8035_p9)  ;;  %v3399_v45 = vld [vmem:[%s6670_s24 + $0x68] sm:$0xff] (%p8035_p9) }
 0x3b3   : > { %v3243_v23 = vmul.f32 %v3143_v30, %v2843_v29  ;;  %v3144_v53 = vadd.f32 1.0, %v4469_v3  ;;  %3392 = vst [vmem:[%s7428_s30 + $0x108] sm:$0xff] (%p8035_p9), %v3391_v8  ;;  %3394 = vst [vmem:[%s7428_s30 + $0x110] sm:$0xff] (%p8035_p9), %v3393_v59  ;;  %v3401_v35 = vld [vmem:[%s6670_s24 + $0x70] sm:$0xff] (%p8035_p9)  ;;  %v3403_v63 = vld [vmem:[%s6670_s24 + $0x78] sm:$0xff] (%p8035_p9) }
 0x3b4   : > { %3342 = vst [vmem:[%s6670_s24 + $0x2d8] sm:$0xff] %v3242_v50  ;;  %v3245_v15 = vmul.f32 %v3145_v47, %v2845_v52  ;;  %v4471_v49 = vpop.eup %4470  ;;  %3396 = vst [vmem:[%s7428_s30 + $0x118] sm:$0xff] (%p8035_p9), %v3395_v42  ;;  %v3405_v26 = vld [vmem:[%s6670_s24 + $0x80] sm:$0xff] (%p8035_p9)  ;;  %v3407_v32 = vld [vmem:[%s6670_s24 + $0x88] sm:$0xff] (%p8035_p9) }
 0x3b5   : > { %3343 = vst [vmem:[%s6670_s24 + $0x2e0] sm:$0xff] %v3243_v23  ;;  %v4473_v41 = vpop.eup %4472  ;;  %v3244_v2 = vmul.f32 %v3144_v53, %v2844_v1  ;;  %v3146_v46 = vadd.f32 1.0, %v4471_v49  ;;  %3398 = vst [vmem:[%s7428_s30 + $0x180] sm:$0xff] (%p8035_p9), %v3397_v28  ;;  %v3409_v14 = vld [vmem:[%s6670_s24 + $0x90] sm:$0xff] (%p8035_p9)  ;;  %v3411_v39 = vld [vmem:[%s6670_s24 + $0x98] sm:$0xff] (%p8035_p9) }
 0x3b6   : > { %3345 = vst [vmem:[%s6670_s24 + $0x2f0] sm:$0xff] %v3245_v15  ;;  %v4475_v37 = vpop.eup %4474  ;;  %v3147_v62 = vadd.f32 1.0, %v4473_v41  ;;  %3400 = vst [vmem:[%s7428_s30 + $0x188] sm:$0xff] (%p8035_p9), %v3399_v45  ;;  %v3413_v57 = vld [vmem:[%s6670_s24 + $0xa0] sm:$0xff] (%p8035_p9)  ;;  %v3415_v7 = vld [vmem:[%s6670_s24 + $0xa8] sm:$0xff] (%p8035_p9) }
 0x3b7   : > { %3344 = vst [vmem:[%s6670_s24 + $0x2e8] sm:$0xff] %v3244_v2  ;;  %v3246_v51 = vmul.f32 %v3146_v46, %v2846_v61  ;;  %v3149_v56 = vadd.f32 1.0, %v4475_v37  ;;  %v4477_v48 = vpop.eup %4476  ;;  %3402 = vst [vmem:[%s7428_s30 + $0x190] sm:$0xff] (%p8035_p9), %v3401_v35  ;;  %v3417_v40 = vld [vmem:[%s6670_s24 + $0xb0] sm:$0xff] (%p8035_p9)  ;;  %v3419_v6 = vld [vmem:[%s6670_s24 + $0xb8] sm:$0xff] (%p8035_p9) }
 0x3b8   : > { %v3247_v22 = vmul.f32 %v3147_v62, %v2847_v43  ;;  %v3148_v34 = vadd.f32 1.0, %v4477_v48  ;;  %3404 = vst [vmem:[%s7428_s30 + $0x198] sm:$0xff] (%p8035_p9), %v3403_v63  ;;  %3406 = vst [vmem:[%s7428_s30 + $0x200] sm:$0xff] (%p8035_p9), %v3405_v26  ;;  %v3421_v60 = vld [vmem:[%s6670_s24 + $0xc0] sm:$0xff] (%p8035_p9)  ;;  %v3423_v5 = vld [vmem:[%s6670_s24 + $0xc8] sm:$0xff] (%p8035_p9) }
 0x3b9   : > { %3346 = vst [vmem:[%s6670_s24 + $0x2f8] sm:$0xff] %v3246_v51  ;;  %v3249_v0 = vmul.f32 %v3149_v56, %v2849_v27  ;;  %3357 = sbr.rel (!%p8035_p9) target bundleno = 997 (0x3e5), region = 48  ;;  %3408 = vst [vmem:[%s7428_s30 + $0x208] sm:$0xff] (%p8035_p9), %v3407_v32  ;;  %v3425_v16 = vld [vmem:[%s6670_s24 + $0xd0] sm:$0xff] (%p8035_p9)  ;;  %v3427_v21 = vld [vmem:[%s6670_s24 + $0xd8] sm:$0xff] (%p8035_p9) }
 0x3ba   : > { %v4479_v25 = vpop.eup %4478  ;;  %3347 = vst [vmem:[%s6670_s24 + $0x300] sm:$0xf] %v3247_v22  ;;  %v3248_v36 = vmul.f32 %v3148_v34, %v2848_v9  ;;  %3410 = vst [vmem:[%s7428_s30 + $0x210] sm:$0xff] (%p8035_p9), %v3409_v14  ;;  %v3429_v10 = vld [vmem:[%s6670_s24 + $0xe0] sm:$0xff] (%p8035_p9)  ;;  %v3431_v33 = vld [vmem:[%s6670_s24 + $0xe8] sm:$0xff] (%p8035_p9) }
 0x3bb   : > { %3349 = vst [vmem:[%s6670_s24 + $0x310] sm:$0xf] %v3249_v0  ;;  %v3150_v12 = vadd.f32 1.0, %v4479_v25  ;;  %3412 = vst [vmem:[%s7428_s30 + $0x218] sm:$0xff] (%p8035_p9), %v3411_v39  ;;  %v3433_v17 = vld [vmem:[%s6670_s24 + $0xf0] sm:$0xff] (%p8035_p9)  ;;  %v3435_v18 = vld [vmem:[%s6670_s24 + $0xf8] sm:$0xff] (%p8035_p9) }
 0x3bc   : > { %3348 = vst [vmem:[%s6670_s24 + $0x308] sm:$0xf] %v3248_v36  ;;  %3414 = vst [vmem:[%s7428_s30 + $0x280] sm:$0xff] (%p8035_p9), %v3413_v57  ;;  %v3437_v13 = vld [vmem:[%s6670_s24 + $0x100] sm:$0xff] (%p8035_p9)  ;;  %v3439_v29 = vld [vmem:[%s6670_s24 + $0x108] sm:$0xff] (%p8035_p9) }
 0x3bd   : > { %v3250_v24 = vmul.f32 %v3150_v12, %v2850_v44  ;;  %3416 = vst [vmem:[%s7428_s30 + $0x288] sm:$0xff] (%p8035_p9), %v3415_v7  ;;  %3418 = vst [vmem:[%s7428_s30 + $0x290] sm:$0xff] (%p8035_p9), %v3417_v40  ;;  %v3441_v30 = vld [vmem:[%s6670_s24 + $0x110] sm:$0xff] (%p8035_p9)  ;;  %v3443_v50 = vld [vmem:[%s6670_s24 + $0x118] sm:$0xff] (%p8035_p9) }
 0x3be   : > { %3420 = vst [vmem:[%s7428_s30 + $0x298] sm:$0xff] (%p8035_p9), %v3419_v6  ;;  %3422 = vst [vmem:[%s7428_s30 + $0x300] sm:$0xff] (%p8035_p9), %v3421_v60  ;;  %v3445_v52 = vld [vmem:[%s6670_s24 + $0x120] sm:$0xff] (%p8035_p9)  ;;  %v3447_v47 = vld [vmem:[%s6670_s24 + $0x128] sm:$0xff] (%p8035_p9) }
 0x3bf   : > { %3350 = vst [vmem:[%s6670_s24 + $0x318] sm:$0xf] %v3250_v24  ;;  %3424 = vst [vmem:[%s7428_s30 + $0x308] sm:$0xff] (%p8035_p9), %v3423_v5  ;;  %v3449_v3 = vld [vmem:[%s6670_s24 + $0x130] sm:$0xff] (%p8035_p9)  ;;  %v3451_v23 = vld [vmem:[%s6670_s24 + $0x138] sm:$0xff] (%p8035_p9) }
 0x3c0   : > { %3426 = vst [vmem:[%s7428_s30 + $0x310] sm:$0xff] %v3425_v16  ;;  %3428 = vst [vmem:[%s7428_s30 + $0x318] sm:$0xff] %v3427_v21  ;;  %v3453_v15 = vld [vmem:[%s6670_s24 + $0x140] sm:$0xff]  ;;  %v3455_v1 = vld [vmem:[%s6670_s24 + $0x148] sm:$0xff] }
 0x3c1   : > { %3430 = vst [vmem:[%s7428_s30 + $0x380] sm:$0xff] %v3429_v10  ;;  %3432 = vst [vmem:[%s7428_s30 + $0x388] sm:$0xff] %v3431_v33  ;;  %v3457_v53 = vld [vmem:[%s6670_s24 + $0x150] sm:$0xff]  ;;  %v3459_v49 = vld [vmem:[%s6670_s24 + $0x158] sm:$0xff] }
 0x3c2   : > { %3434 = vst [vmem:[%s7428_s30 + $0x390] sm:$0xff] %v3433_v17  ;;  %3436 = vst [vmem:[%s7428_s30 + $0x398] sm:$0xff] %v3435_v18  ;;  %v3461_v41 = vld [vmem:[%s6670_s24 + $0x160] sm:$0xff]  ;;  %v3463_v2 = vld [vmem:[%s6670_s24 + $0x168] sm:$0xff] }
 0x3c3   : > { %3438 = vst [vmem:[%s7428_s30 + $0x400] sm:$0xff] %v3437_v13  ;;  %3440 = vst [vmem:[%s7428_s30 + $0x408] sm:$0xff] %v3439_v29  ;;  %v3465_v61 = vld [vmem:[%s6670_s24 + $0x170] sm:$0xff]  ;;  %v3467_v46 = vld [vmem:[%s6670_s24 + $0x178] sm:$0xff] }
 0x3c4   : > { %3442 = vst [vmem:[%s7428_s30 + $0x410] sm:$0xff] %v3441_v30  ;;  %3444 = vst [vmem:[%s7428_s30 + $0x418] sm:$0xff] %v3443_v50  ;;  %v3469_v37 = vld [vmem:[%s6670_s24 + $0x180] sm:$0xff]  ;;  %v3471_v43 = vld [vmem:[%s6670_s24 + $0x188] sm:$0xff] }
 0x3c5   : > { %3446 = vst [vmem:[%s7428_s30 + $0x480] sm:$0xff] %v3445_v52  ;;  %3448 = vst [vmem:[%s7428_s30 + $0x488] sm:$0xff] %v3447_v47  ;;  %v3473_v62 = vld [vmem:[%s6670_s24 + $0x190] sm:$0xff]  ;;  %v3475_v51 = vld [vmem:[%s6670_s24 + $0x198] sm:$0xff] }
 0x3c6   : > { %3450 = vst [vmem:[%s7428_s30 + $0x490] sm:$0xff] %v3449_v3  ;;  %3452 = vst [vmem:[%s7428_s30 + $0x498] sm:$0xff] %v3451_v23  ;;  %v3477_v27 = vld [vmem:[%s6670_s24 + $0x1a0] sm:$0xff]  ;;  %v3479_v56 = vld [vmem:[%s6670_s24 + $0x1a8] sm:$0xff] }
 0x3c7   : > { %3454 = vst [vmem:[%s7428_s30 + $0x500] sm:$0xff] %v3453_v15  ;;  %3456 = vst [vmem:[%s7428_s30 + $0x508] sm:$0xff] %v3455_v1  ;;  %v3481_v48 = vld [vmem:[%s6670_s24 + $0x1b0] sm:$0xff]  ;;  %v3483_v22 = vld [vmem:[%s6670_s24 + $0x1b8] sm:$0xff] }
 0x3c8   : > { %3458 = vst [vmem:[%s7428_s30 + $0x510] sm:$0xff] %v3457_v53  ;;  %3460 = vst [vmem:[%s7428_s30 + $0x518] sm:$0xff] %v3459_v49  ;;  %v3485_v0 = vld [vmem:[%s6670_s24 + $0x1c0] sm:$0xff]  ;;  %v3487_v9 = vld [vmem:[%s6670_s24 + $0x1c8] sm:$0xff] }
 0x3c9   : > { %3462 = vst [vmem:[%s7428_s30 + $0x580] sm:$0xff] %v3461_v41  ;;  %3464 = vst [vmem:[%s7428_s30 + $0x588] sm:$0xff] %v3463_v2  ;;  %v3489_v34 = vld [vmem:[%s6670_s24 + $0x1d0] sm:$0xff]  ;;  %v3491_v25 = vld [vmem:[%s6670_s24 + $0x1d8] sm:$0xff] }
 0x3ca   : > { %3466 = vst [vmem:[%s7428_s30 + $0x590] sm:$0xff] %v3465_v61  ;;  %3468 = vst [vmem:[%s7428_s30 + $0x598] sm:$0xff] %v3467_v46  ;;  %v3493_v36 = vld [vmem:[%s6670_s24 + $0x1e0] sm:$0xff]  ;;  %v3495_v44 = vld [vmem:[%s6670_s24 + $0x1e8] sm:$0xff] }
 0x3cb   : > { %3470 = vst [vmem:[%s7428_s30 + $0x600] sm:$0xff] %v3469_v37  ;;  %3472 = vst [vmem:[%s7428_s30 + $0x608] sm:$0xff] %v3471_v43  ;;  %v3497_v12 = vld [vmem:[%s6670_s24 + $0x1f0] sm:$0xff]  ;;  %v3499_v24 = vld [vmem:[%s6670_s24 + $0x1f8] sm:$0xff] }
 0x3cc   : > { %3474 = vst [vmem:[%s7428_s30 + $0x610] sm:$0xff] %v3473_v62  ;;  %3476 = vst [vmem:[%s7428_s30 + $0x618] sm:$0xff] %v3475_v51  ;;  %v3501_v20 = vld [vmem:[%s6670_s24 + $0x200] sm:$0xff]  ;;  %v3503_v11 = vld [vmem:[%s6670_s24 + $0x208] sm:$0xff] }
 0x3cd   : > { %3478 = vst [vmem:[%s7428_s30 + $0x680] sm:$0xff] %v3477_v27  ;;  %3480 = vst [vmem:[%s7428_s30 + $0x688] sm:$0xff] %v3479_v56  ;;  %v3505_v54 = vld [vmem:[%s6670_s24 + $0x210] sm:$0xff]  ;;  %v3507_v38 = vld [vmem:[%s6670_s24 + $0x218] sm:$0xff] }
 0x3ce   : > { %3482 = vst [vmem:[%s7428_s30 + $0x690] sm:$0xff] %v3481_v48  ;;  %3484 = vst [vmem:[%s7428_s30 + $0x698] sm:$0xff] %v3483_v22  ;;  %v3509_v31 = vld [vmem:[%s6670_s24 + $0x220] sm:$0xff]  ;;  %v3511_v4 = vld [vmem:[%s6670_s24 + $0x228] sm:$0xff] }
 0x3cf   : > { %3486 = vst [vmem:[%s7428_s30 + $0x700] sm:$0xff] %v3485_v0  ;;  %3488 = vst [vmem:[%s7428_s30 + $0x708] sm:$0xff] %v3487_v9  ;;  %v3513_v19 = vld [vmem:[%s6670_s24 + $0x230] sm:$0xff]  ;;  %v3515_v58 = vld [vmem:[%s6670_s24 + $0x238] sm:$0xff] }
 0x3d0   : > { %3490 = vst [vmem:[%s7428_s30 + $0x710] sm:$0xff] %v3489_v34  ;;  %3492 = vst [vmem:[%s7428_s30 + $0x718] sm:$0xff] %v3491_v25  ;;  %v3517_v55 = vld [vmem:[%s6670_s24 + $0x240] sm:$0xff]  ;;  %v3519_v8 = vld [vmem:[%s6670_s24 + $0x248] sm:$0xff] }
 0x3d1   : > { %3494 = vst [vmem:[%s7428_s30 + $0x780] sm:$0xff] %v3493_v36  ;;  %3496 = vst [vmem:[%s7428_s30 + $0x788] sm:$0xff] %v3495_v44  ;;  %v3521_v59 = vld [vmem:[%s6670_s24 + $0x250] sm:$0xff]  ;;  %v3523_v42 = vld [vmem:[%s6670_s24 + $0x258] sm:$0xff] }
 0x3d2   : > { %3498 = vst [vmem:[%s7428_s30 + $0x790] sm:$0xff] %v3497_v12  ;;  %3500 = vst [vmem:[%s7428_s30 + $0x798] sm:$0xff] %v3499_v24  ;;  %v3525_v28 = vld [vmem:[%s6670_s24 + $0x260] sm:$0xff]  ;;  %v3527_v45 = vld [vmem:[%s6670_s24 + $0x268] sm:$0xff] }
 0x3d3   : > { %3502 = vst [vmem:[%s7428_s30 + $0x800] sm:$0xff] %v3501_v20  ;;  %3504 = vst [vmem:[%s7428_s30 + $0x808] sm:$0xff] %v3503_v11  ;;  %v3529_v35 = vld [vmem:[%s6670_s24 + $0x270] sm:$0xff]  ;;  %v3531_v63 = vld [vmem:[%s6670_s24 + $0x278] sm:$0xff] }
 0x3d4   : > { %3506 = vst [vmem:[%s7428_s30 + $0x810] sm:$0xff] %v3505_v54  ;;  %3508 = vst [vmem:[%s7428_s30 + $0x818] sm:$0xff] %v3507_v38  ;;  %v3533_v26 = vld [vmem:[%s6670_s24 + $0x280] sm:$0xff]  ;;  %v3535_v32 = vld [vmem:[%s6670_s24 + $0x288] sm:$0xff] }
 0x3d5   : > { %3510 = vst [vmem:[%s7428_s30 + $0x880] sm:$0xff] %v3509_v31  ;;  %3512 = vst [vmem:[%s7428_s30 + $0x888] sm:$0xff] %v3511_v4  ;;  %v3537_v14 = vld [vmem:[%s6670_s24 + $0x290] sm:$0xff]  ;;  %v3539_v39 = vld [vmem:[%s6670_s24 + $0x298] sm:$0xff] }
 0x3d6   : > { %3514 = vst [vmem:[%s7428_s30 + $0x890] sm:$0xff] %v3513_v19  ;;  %3516 = vst [vmem:[%s7428_s30 + $0x898] sm:$0xff] %v3515_v58  ;;  %v3541_v57 = vld [vmem:[%s6670_s24 + $0x2a0] sm:$0xff]  ;;  %v3543_v7 = vld [vmem:[%s6670_s24 + $0x2a8] sm:$0xff] }
 0x3d7   : > { %3518 = vst [vmem:[%s7428_s30 + $0x900] sm:$0xff] %v3517_v55  ;;  %3520 = vst [vmem:[%s7428_s30 + $0x908] sm:$0xff] %v3519_v8  ;;  %v3545_v40 = vld [vmem:[%s6670_s24 + $0x2b0] sm:$0xff]  ;;  %v3547_v6 = vld [vmem:[%s6670_s24 + $0x2b8] sm:$0xff] }
 0x3d8   : > { %3522 = vst [vmem:[%s7428_s30 + $0x910] sm:$0xff] %v3521_v59  ;;  %3524 = vst [vmem:[%s7428_s30 + $0x918] sm:$0xff] %v3523_v42  ;;  %v3549_v60 = vld [vmem:[%s6670_s24 + $0x2c0] sm:$0xff]  ;;  %v3551_v5 = vld [vmem:[%s6670_s24 + $0x2c8] sm:$0xff] }
 0x3d9   : > { %3526 = vst [vmem:[%s7428_s30 + $0x980] sm:$0xff] %v3525_v28  ;;  %3528 = vst [vmem:[%s7428_s30 + $0x988] sm:$0xff] %v3527_v45  ;;  %v3553_v16 = vld [vmem:[%s6670_s24 + $0x2d0] sm:$0xff]  ;;  %v3555_v21 = vld [vmem:[%s6670_s24 + $0x2d8] sm:$0xff] }
 0x3da   : > { %3530 = vst [vmem:[%s7428_s30 + $0x990] sm:$0xff] %v3529_v35  ;;  %3532 = vst [vmem:[%s7428_s30 + $0x998] sm:$0xff] %v3531_v63  ;;  %v3557_v10 = vld [vmem:[%s6670_s24 + $0x2e0] sm:$0xff]  ;;  %v3559_v33 = vld [vmem:[%s6670_s24 + $0x2e8] sm:$0xff] }
 0x3db   : > { %3534 = vst [vmem:[%s7428_s30 + $0xa00] sm:$0xff] %v3533_v26  ;;  %3536 = vst [vmem:[%s7428_s30 + $0xa08] sm:$0xff] %v3535_v32  ;;  %v3561_v17 = vld [vmem:[%s6670_s24 + $0x2f0] sm:$0xff]  ;;  %v3563_v18 = vld [vmem:[%s6670_s24 + $0x2f8] sm:$0xff] }
 0x3dc   : > { %3538 = vst [vmem:[%s7428_s30 + $0xa10] sm:$0xff] %v3537_v14  ;;  %3540 = vst [vmem:[%s7428_s30 + $0xa18] sm:$0xff] %v3539_v39  ;;  %v3565_v13 = vld [vmem:[%s6670_s24 + $0x300] sm:$0xff]  ;;  %v3567_v29 = vld [vmem:[%s6670_s24 + $0x308] sm:$0xff] }
 0x3dd   : > { %3542 = vst [vmem:[%s7428_s30 + $0xa80] sm:$0xff] %v3541_v57  ;;  %3544 = vst [vmem:[%s7428_s30 + $0xa88] sm:$0xff] %v3543_v7  ;;  %v3569_v30 = vld [vmem:[%s6670_s24 + $0x310] sm:$0xff]  ;;  %v3571_v50 = vld [vmem:[%s6670_s24 + $0x318] sm:$0xff] }
 0x3de   : > { %3546 = vst [vmem:[%s7428_s30 + $0xa90] sm:$0xff] %v3545_v40  ;;  %3548 = vst [vmem:[%s7428_s30 + $0xa98] sm:$0xff] %v3547_v6 }
 0x3df   : > { %3550 = vst [vmem:[%s7428_s30 + $0xb00] sm:$0xff] %v3549_v60  ;;  %3552 = vst [vmem:[%s7428_s30 + $0xb08] sm:$0xff] %v3551_v5 }
 0x3e0   : > { %3554 = vst [vmem:[%s7428_s30 + $0xb10] sm:$0xff] %v3553_v16  ;;  %3556 = vst [vmem:[%s7428_s30 + $0xb18] sm:$0xff] %v3555_v21 }
 0x3e1   : > { %3558 = vst [vmem:[%s7428_s30 + $0xb80] sm:$0xff] %v3557_v10  ;;  %3560 = vst [vmem:[%s7428_s30 + $0xb88] sm:$0xff] %v3559_v33 }
 0x3e2   : > { %3562 = vst [vmem:[%s7428_s30 + $0xb90] sm:$0xff] %v3561_v17  ;;  %3564 = vst [vmem:[%s7428_s30 + $0xb98] sm:$0xff] %v3563_v18 }
 0x3e3   : > { %3566 = vst [vmem:[%s7428_s30 + $0xc00] sm:$0xff] %v3565_v13  ;;  %3568 = vst [vmem:[%s7428_s30 + $0xc08] sm:$0xff] %v3567_v29 }
 0x3e4   : > { %3570 = vst [vmem:[%s7428_s30 + $0xc10] sm:$0xff] %v3569_v30  ;;  %3572 = vst [vmem:[%s7428_s30 + $0xc18] sm:$0xff] %v3571_v50 }
 0x3e5 PF: > { %p15_p10 = scmp.ge.s32.totalorder %s4611_s23, 6   ;;  %s8036_s18 = smov %s4546_s19 }
 0x3e6   : > { %s8037_s19 = smov %s4550_s20  ;;  %s8038_s20 = smov %s4621_s26 }
 0x3e7   : > { %s8039_s21 = smov %s4611_s23  ;;  %17 = sbr.rel (!%p15_p10) target bundleno = 3 (0x3), region = 106 }
 0x3ee   :  { %3588 = vsyncpa [#allocation3], 1 }
 0x3ef   :  { %3590 = vsyncpa [#allocation3 + $0x1], 1 }

</bundles_post_ra>
